<compile_context>
chip_gen: v6e
topology: v6e:2x2x1
jax: 0.10.0
libtpu: 0.0.40
codegen_flags: <defaults>
</compile_context>

<pallas_src>
import functools

import jax
import jax.numpy as jnp
from jax import lax
from jax.experimental import pallas as pl
from jax.experimental.pallas import tpu as pltpu


def _silu(x):
    return x * jax.nn.sigmoid(x)


def _round_up(x, m):
    return (x + m - 1) // m * m


def _pick_tile_h(H, cap=16):
    for t in range(min(H, cap), 0, -1):
        if H % t == 0:
            return t
    return 1


def _make_decode_kernel(H, W, T):
    """Fused decode for one (image, H-tile) grid step."""

    def kernel(zi_ref, inw_ref, inb_ref, outw_ref, outb_ref, o_ref):
        r0 = pl.program_id(1) * T           # first hidden row of this tile

        # ---- conv_in (post_quant_conv + 1/scale folded in): ONE im2col matmul
        # zi rows r0 .. r0+T+1  <->  hidden rows r0-1 .. r0+T (1-row halo for
        # conv_out); K = 9 taps * (C_lat+1) channels, MXU accumulates inside.
        zi = zi_ref[0, pl.ds(r0, T + 2), :, :]                  # (T+2, W+2, 45) bf16
        hid = lax.dot_general(
            zi, inw_ref[...],
            dimension_numbers=(((2,), (0,)), ((), ())),
            preferred_element_type=jnp.float32)                 # (T+2, W+2, 128)
        hid = _silu(hid + inb_ref[0])

        # Rows/cols outside the real HxW image stand for the zero padding of
        # the (virtual) 2x-upsampled map consumed by conv_out -> force to 0.
        row = r0 - 1 + lax.broadcasted_iota(jnp.int32, hid.shape, 0)
        col = lax.broadcasted_iota(jnp.int32, hid.shape, 1) - 1
        hid = jnp.where((row >= 0) & (row < H) & (col >= 0) & (col < W),
                        hid, 0.0)
        hidb = hid.astype(jnp.bfloat16)                         # MXU operand

        # ---- conv_out over the (never materialised) 2x-upsampled map --------
        # Row AND column upsample phases are folded into the weights; the 9
        # (row-tap, col-tap) shifted views are concatenated along channels so
        # ONE bf16 matmul (K = 9*128) emits all 4 phases (lanes = (p, q, c)).
        x9 = jnp.concatenate(
            [hidb[a:a + T, e:e + W, :] for a in range(3) for e in range(3)],
            axis=-1)                                            # (T, W, 9*128)
        out = lax.dot_general(
            x9, outw_ref[...],
            dimension_numbers=(((2,), (0,)), ((), ())),
            preferred_element_type=jnp.float32)                 # (T, W, 12)
        o_ref[0] = (out + outb_ref[0]).astype(o_ref.dtype)

    return kernel


@functools.partial(jax.jit, static_argnames=("scale_factor", "tile_h"))
def recon_model_forward(z_nchw, params, scale_factor=0.18215, tile_h=None):
    """ReconModel.forward: z.float(); decode(z / scale_factor).

    z_nchw: (N, C_lat, H, W)  ->  image (N, C_out, 2H, 2W), NCHW like PyTorch.
    """
    N, C_lat, H, W = z_nchw.shape
    KH, KW, _, hidden = params["in_w"].shape
    C_out = params["out_w"].shape[-1]
    assert (KH, KW) == (3, 3)

    if tile_h is None:
        tile_h = _pick_tile_h(H)
    assert H % tile_h == 0
    T = tile_h
    n_ht = H // T

    CH_PAD = _round_up(hidden, 128)
    C_AUG = C_lat + 1                 # latent channels + "ones" channel (pq bias)
    K_IN = 9 * C_AUG                  # conv_in im2col contraction depth
    K_OUT = 9 * CH_PAD                # conv_out concatenated-tap contraction depth
    N_OUT = 4 * C_out                 # output lanes: (row phase, col phase, channel)
    f32 = jnp.float32
    hi = jax.lax.Precision.HIGHEST

    # ---- weight prep (one-time, jit-fused) -----------------------------------
    # Fold post_quant_conv (1x1) and 1/scale into conv_in over the augmented input:
    #   y1 = (z/s) @ Wpq + bpq  ==  [z, 1] @ [[Wpq/s], [bpq]]
    pq_w = params["pq_w"].reshape(C_lat, C_lat).astype(f32) / scale_factor
    pq_b = params["pq_b"].reshape(1, C_lat).astype(f32)
    w_aug0 = jnp.concatenate([pq_w, pq_b], axis=0)               # (C_AUG, C_lat)
    in_w = params["in_w"].astype(f32)                            # (3,3,C_lat,hidden)
    in_w_aug = jnp.einsum("ij,abjh->abih", w_aug0, in_w, precision=hi)
    in_w_aug = jnp.pad(in_w_aug, ((0, 0), (0, 0), (0, 0), (0, CH_PAD - hidden)))
    in_w_flat = in_w_aug.reshape(K_IN, CH_PAD).astype(jnp.bfloat16)
    in_b = jnp.pad(params["in_b"].astype(f32),
                   ((0, CH_PAD - hidden),)).reshape(1, CH_PAD)

    # conv_out: fold nearest-2x upsample (row phase p, col phase q) into weights.
    # R[p, a, ky] = 1 iff tap ky of output row parity p reads hidden row offset a-1.
    w_out = jnp.pad(params["out_w"].astype(f32),
                    ((0, 0), (0, 0), (0, CH_PAD - hidden), (0, 0)))  # (3,3,CH_PAD,C_out)
    R = jnp.zeros((2, 3, 3), f32)
    R = R.at[0, 0, 0].set(1.).at[0, 1, 1].set(1.).at[0, 1, 2].set(1.)
    R = R.at[1, 1, 0].set(1.).at[1, 1, 1].set(1.).at[1, 2, 2].set(1.)
    w_cat = jnp.einsum("pak,qel,klhc->aehpqc", R, R, w_out, precision=hi)
    w_cat = w_cat.reshape(K_OUT, N_OUT).astype(jnp.bfloat16)
    out_b = jnp.tile(params["out_b"].astype(f32), 4).reshape(1, N_OUT)

    # ---- latent prep: NCHW -> NHWC, ones channel, 2-px halo, host im2col -----
    x = jnp.transpose(z_nchw.astype(f32), (0, 2, 3, 1))
    x = jnp.concatenate([x, jnp.ones((N, H, W, 1), f32)], axis=-1)
    xp = jnp.pad(x, ((0, 0), (2, 2), (2, 2), (0, 0)))            # (N, H+4, W+4, C_AUG)
    zi = jnp.concatenate(
        [xp[:, ky:ky + H + 2, kx:kx + W + 2, :]
         for ky in range(3) for kx in range(3)],
        axis=-1).astype(jnp.bfloat16)                            # (N, H+2, W+2, 45)

    kernel = _make_decode_kernel(H, W, T)

    # ---- VMEM budget from Mosaic-padded tile sizes (8 sublanes / 128 lanes) ---
    LANE = 128
    p8 = lambda v: _round_up(v, 8)
    zi_blk = (H + 2) * p8(W + 2) * _round_up(K_IN, LANE) * 2        # bf16
    inw_blk = p8(K_IN) * CH_PAD * 2
    inb_blk = 8 * CH_PAD * 4
    outw_blk = _round_up(K_OUT, 16) * _round_up(N_OUT, LANE) * 2
    outb_blk = 8 * LANE * 4
    out_blk = T * p8(W) * _round_up(N_OUT, LANE) * 4
    blocks = 2 * (zi_blk + inw_blk + inb_blk + outw_blk + outb_blk + out_blk)
    interm = ((T + 2) * p8(W + 2) * LANE * (2 + 4 + 4 + 2)   # zi slice, hid pre/post, hidb
              + 9 * T * p8(W) * LANE * 2 * 2                 # shifted views + x9 concat
              + 2 * T * p8(W) * LANE * 4)                    # matmul result + store temp
    vmem_limit = int(min(max(blocks + 2 * interm, 16 << 20), 48 << 20))

    out = pl.pallas_call(
        kernel,
        out_shape=jax.ShapeDtypeStruct((N, H, W, N_OUT), jnp.float32),
        grid=(N, n_ht),
        in_specs=[
            pl.BlockSpec((1, H + 2, W + 2, K_IN), lambda n, h: (n, 0, 0, 0)),
            pl.BlockSpec((K_IN, CH_PAD), lambda n, h: (0, 0)),
            pl.BlockSpec((1, CH_PAD), lambda n, h: (0, 0)),
            pl.BlockSpec((K_OUT, N_OUT), lambda n, h: (0, 0)),
            pl.BlockSpec((1, N_OUT), lambda n, h: (0, 0)),
        ],
        out_specs=pl.BlockSpec((1, T, W, N_OUT), lambda n, h: (n, h, 0, 0)),
        compiler_params=pltpu.CompilerParams(
            dimension_semantics=("parallel", "parallel"),
            vmem_limit_bytes=vmem_limit),
    )(zi, in_w_flat, in_b, w_cat, out_b)

    # (N, H, W, (p,q,c)) -> (N, C_out, 2H, 2W): the phase de-interleave rides the
    # NHWC->NCHW transpose PyTorch layout needs anyway (single XLA transpose pass).
    img = out.reshape(N, H, W, 2, 2, C_out)
    img = jnp.transpose(img, (0, 5, 1, 3, 2, 4)).reshape(N, C_out, 2 * H, 2 * W)
    return img


def init_decoder_params(latent_ch=4, hidden_ch=32, out_ch=3, seed=0):
    """Deterministic synthetic decoder parameters (HWIO conv weights)."""
    keys = jax.random.split(jax.random.PRNGKey(seed), 6)
    return {
        "pq_w": jax.random.normal(keys[0], (1, 1, latent_ch, latent_ch),
                                  jnp.float32) * 0.2,
        "pq_b": jax.random.normal(keys[1], (latent_ch,), jnp.float32) * 0.01,
        "in_w": jax.random.normal(keys[2], (3, 3, latent_ch, hidden_ch),
                                  jnp.float32) * 0.1,
        "in_b": jax.random.normal(keys[3], (hidden_ch,), jnp.float32) * 0.01,
        "out_w": jax.random.normal(keys[4], (3, 3, hidden_ch, out_ch),
                                   jnp.float32) * 0.1,
        "out_b": jax.random.normal(keys[5], (out_ch,), jnp.float32) * 0.01,
    }


def _reference_decode(z_nchw, params, scale_factor):
    """Pure-JAX (XLA) reference with identical semantics, for validation."""
    z = z_nchw.astype(jnp.float32) / scale_factor
    x = jnp.transpose(z, (0, 2, 3, 1))

    def conv(x, w, b):
        y = jax.lax.conv_general_dilated(
            x, w, window_strides=(1, 1), padding="SAME",
            dimension_numbers=("NHWC", "HWIO", "NHWC"),
            precision=jax.lax.Precision.HIGHEST)
        return y + b

    x = conv(x, params["pq_w"], params["pq_b"])
    x = conv(x, params["in_w"], params["in_b"])
    x = x * jax.nn.sigmoid(x)
    x = jnp.repeat(jnp.repeat(x, 2, axis=1), 2, axis=2)
    x = conv(x, params["out_w"], params["out_b"])
    return jnp.transpose(x, (0, 3, 1, 2))


if __name__ == "__main__":
    N, C_LAT, H, W = 2, 4, 16, 16
    key = jax.random.PRNGKey(0)
    z = jax.random.normal(key, (N, C_LAT, H, W), jnp.float32)

    params = init_decoder_params(latent_ch=C_LAT, hidden_ch=32, out_ch=3, seed=0)

    # tile_h=8 -> 2 H-tiles per image: exercises the cross-tile halo path and
    # gives 4 parallel grid steps (keeps both v7x TensorCores busy).
    img = recon_model_forward(z, params, scale_factor=0.18215, tile_h=8)
    img = jax.block_until_ready(img)

    assert img.shape == (N, 3, 2 * H, 2 * W), img.shape
    assert img.dtype == jnp.float32
    assert bool(jnp.all(jnp.isfinite(img)))

    ref = jax.block_until_ready(_reference_decode(z, params, 0.18215))
    err = float(jnp.max(jnp.abs(img - ref)))
    # bf16 MXU operands (f32 accumulation) add ~1e-2 abs error at these magnitudes.
    assert err < 8e-2, f"max abs err vs reference: {err}"

    print("KERNEL_OK")
</pallas_src>

<mosaic_0001>
module attributes {stable_mosaic.version = 11 : i64} {
  func.func @kernel(%arg0: i32, %arg1: i32, %arg2: memref<1x18x18x45xbf16, #tpu.memory_space<vmem>>, %arg3: memref<45x128xbf16, #tpu.memory_space<vmem>>, %arg4: memref<1x128xf32, #tpu.memory_space<vmem>>, %arg5: memref<1152x12xbf16, #tpu.memory_space<vmem>>, %arg6: memref<1x12xf32, #tpu.memory_space<vmem>>, %arg7: memref<1x8x16x12xf32, #tpu.memory_space<vmem>>) attributes {dimension_semantics = [#tpu.dimension_semantics<parallel>, #tpu.dimension_semantics<parallel>], iteration_bounds = array<i64: 2, 2>, scalar_prefetch = 0 : i64, scratch_operands = 0 : i64, tpu.core_type = #tpu.core_type<tc>, window_params = [{transform_indices = @transform_0, window_bounds = array<i64: 1, 18, 18, 45>}, {pipeline_mode = #tpu.pipeline_mode<synchronous>, transform_indices = @transform_1, window_bounds = array<i64: 45, 128>}, {pipeline_mode = #tpu.pipeline_mode<synchronous>, transform_indices = @transform_2, window_bounds = array<i64: 1, 128>}, {pipeline_mode = #tpu.pipeline_mode<synchronous>, transform_indices = @transform_3, window_bounds = array<i64: 1152, 12>}, {pipeline_mode = #tpu.pipeline_mode<synchronous>, transform_indices = @transform_4, window_bounds = array<i64: 1, 12>}, {transform_indices = @transform_5, window_bounds = array<i64: 1, 8, 16, 12>}]} {
    %c8_i32 = arith.constant 8 : i32
    %0 = arith.muli %arg1, %c8_i32 : i32
    %c0 = arith.constant 0 : index
    %1 = arith.index_cast %0 : i32 to index
    %c0_0 = arith.constant 0 : index
    %c0_1 = arith.constant 0 : index
    %2 = vector.load %arg2[%c0, %1, %c0_0, %c0_1] : memref<1x18x18x45xbf16, #tpu.memory_space<vmem>>, vector<1x10x18x45xbf16>
    %3 = vector.shape_cast %2 : vector<1x10x18x45xbf16> to vector<10x18x45xbf16>
    %c0_2 = arith.constant 0 : index
    %c0_3 = arith.constant 0 : index
    %4 = vector.load %arg3[%c0_2, %c0_3] : memref<45x128xbf16, #tpu.memory_space<vmem>>, vector<45x128xbf16>
    %cst = arith.constant dense<0.000000e+00> : vector<10x18x128xf32>
    %5 = tpu.matmul %3, %4, %cst {dimension_numbers = #tpu.dot_dimension_numbers<[2], [0], [0, 1], [1], [0, 0, 0, 1, 1, 1], [], []>} : vector<10x18x45xbf16>, vector<45x128xbf16>, vector<10x18x128xf32> -> vector<10x18x128xf32>
    %c0_4 = arith.constant 0 : index
    %c0_5 = arith.constant 0 : index
    %6 = vector.load %arg4[%c0_4, %c0_5] : memref<1x128xf32, #tpu.memory_space<vmem>>, vector<1x128xf32>
    %7 = vector.shape_cast %6 : vector<1x128xf32> to vector<128xf32>
    %8 = vector.shape_cast %7 : vector<128xf32> to vector<1x1x128xf32>
    %9 = vector.broadcast %8 : vector<1x1x128xf32> to vector<10x18x128xf32>
    %10 = arith.addf %5, %9 : vector<10x18x128xf32>
    %11 = arith.negf %10 : vector<10x18x128xf32>
    %12 = math.exp %11 : vector<10x18x128xf32>
    %cst_6 = arith.constant 1.000000e+00 : f32
    %13 = vector.broadcast %cst_6 : f32 to vector<10x18x128xf32>
    %14 = arith.addf %13, %12 : vector<10x18x128xf32>
    %15 = arith.divf %13, %14 : vector<10x18x128xf32>
    %16 = arith.mulf %10, %15 : vector<10x18x128xf32>
    %c1_i32 = arith.constant 1 : i32
    %17 = arith.subi %0, %c1_i32 : i32
    %18 = tpu.iota {dimensions = array<i32: 0>} : vector<10x18x128xi32>
    %19 = vector.broadcast %17 : i32 to vector<10x18x128xi32>
    %20 = arith.addi %19, %18 : vector<10x18x128xi32>
    %21 = tpu.iota {dimensions = array<i32: 1>} : vector<10x18x128xi32>
    %c1_i32_7 = arith.constant 1 : i32
    %22 = vector.broadcast %c1_i32_7 : i32 to vector<10x18x128xi32>
    %23 = arith.subi %21, %22 : vector<10x18x128xi32>
    %c0_i32 = arith.constant 0 : i32
    %24 = vector.broadcast %c0_i32 : i32 to vector<10x18x128xi32>
    %25 = arith.cmpi sge, %20, %24 : vector<10x18x128xi32>
    %c16_i32 = arith.constant 16 : i32
    %26 = vector.broadcast %c16_i32 : i32 to vector<10x18x128xi32>
    %27 = arith.cmpi slt, %20, %26 : vector<10x18x128xi32>
    %28 = arith.andi %25, %27 : vector<10x18x128xi1>
    %c0_i32_8 = arith.constant 0 : i32
    %29 = vector.broadcast %c0_i32_8 : i32 to vector<10x18x128xi32>
    %30 = arith.cmpi sge, %23, %29 : vector<10x18x128xi32>
    %31 = arith.andi %28, %30 : vector<10x18x128xi1>
    %c16_i32_9 = arith.constant 16 : i32
    %32 = vector.broadcast %c16_i32_9 : i32 to vector<10x18x128xi32>
    %33 = arith.cmpi slt, %23, %32 : vector<10x18x128xi32>
    %34 = arith.andi %31, %33 : vector<10x18x128xi1>
    %cst_10 = arith.constant 0.000000e+00 : f32
    %35 = vector.broadcast %cst_10 : f32 to vector<10x18x128xf32>
    %36 = arith.select %34, %16, %35 : vector<10x18x128xi1>, vector<10x18x128xf32>
    %37 = arith.truncf %36 : vector<10x18x128xf32> to vector<10x18x128xbf16>
    %38 = vector.extract_strided_slice %37 {offsets = [0, 0, 0], sizes = [8, 16, 128], strides = [1, 1, 1]} : vector<10x18x128xbf16> to vector<8x16x128xbf16>
    %39 = vector.extract_strided_slice %37 {offsets = [0, 1, 0], sizes = [8, 16, 128], strides = [1, 1, 1]} : vector<10x18x128xbf16> to vector<8x16x128xbf16>
    %40 = vector.extract_strided_slice %37 {offsets = [0, 2, 0], sizes = [8, 16, 128], strides = [1, 1, 1]} : vector<10x18x128xbf16> to vector<8x16x128xbf16>
    %41 = vector.extract_strided_slice %37 {offsets = [1, 0, 0], sizes = [8, 16, 128], strides = [1, 1, 1]} : vector<10x18x128xbf16> to vector<8x16x128xbf16>
    %42 = vector.extract_strided_slice %37 {offsets = [1, 1, 0], sizes = [8, 16, 128], strides = [1, 1, 1]} : vector<10x18x128xbf16> to vector<8x16x128xbf16>
    %43 = vector.extract_strided_slice %37 {offsets = [1, 2, 0], sizes = [8, 16, 128], strides = [1, 1, 1]} : vector<10x18x128xbf16> to vector<8x16x128xbf16>
    %44 = vector.extract_strided_slice %37 {offsets = [2, 0, 0], sizes = [8, 16, 128], strides = [1, 1, 1]} : vector<10x18x128xbf16> to vector<8x16x128xbf16>
    %45 = vector.extract_strided_slice %37 {offsets = [2, 1, 0], sizes = [8, 16, 128], strides = [1, 1, 1]} : vector<10x18x128xbf16> to vector<8x16x128xbf16>
    %46 = vector.extract_strided_slice %37 {offsets = [2, 2, 0], sizes = [8, 16, 128], strides = [1, 1, 1]} : vector<10x18x128xbf16> to vector<8x16x128xbf16>
    %47 = tpu.concatenate %38, %39, %40, %41, %42, %43, %44, %45, %46 in 2 : vector<8x16x128xbf16>, vector<8x16x128xbf16>, vector<8x16x128xbf16>, vector<8x16x128xbf16>, vector<8x16x128xbf16>, vector<8x16x128xbf16>, vector<8x16x128xbf16>, vector<8x16x128xbf16>, vector<8x16x128xbf16> -> vector<8x16x1152xbf16>
    %c0_11 = arith.constant 0 : index
    %c0_12 = arith.constant 0 : index
    %48 = vector.load %arg5[%c0_11, %c0_12] : memref<1152x12xbf16, #tpu.memory_space<vmem>>, vector<1152x12xbf16>
    %cst_13 = arith.constant dense<0.000000e+00> : vector<8x16x12xf32>
    %49 = tpu.matmul %47, %48, %cst_13 {dimension_numbers = #tpu.dot_dimension_numbers<[2], [0], [0, 1], [1], [0, 0, 0, 1, 1, 1], [], []>} : vector<8x16x1152xbf16>, vector<1152x12xbf16>, vector<8x16x12xf32> -> vector<8x16x12xf32>
    %c0_14 = arith.constant 0 : index
    %c0_15 = arith.constant 0 : index
    %50 = vector.load %arg6[%c0_14, %c0_15] : memref<1x12xf32, #tpu.memory_space<vmem>>, vector<1x12xf32>
    %51 = vector.shape_cast %50 : vector<1x12xf32> to vector<12xf32>
    %52 = vector.shape_cast %51 : vector<12xf32> to vector<1x1x12xf32>
    %53 = vector.broadcast %52 : vector<1x1x12xf32> to vector<8x16x12xf32>
    %54 = arith.addf %49, %53 : vector<8x16x12xf32>
    %c0_16 = arith.constant 0 : index
    %c0_17 = arith.constant 0 : index
    %c0_18 = arith.constant 0 : index
    %c0_19 = arith.constant 0 : index
    %55 = vector.load %arg7[%c0_16, %c0_17, %c0_18, %c0_19] : memref<1x8x16x12xf32, #tpu.memory_space<vmem>>, vector<1x8x16x12xf32>
    %56 = vector.shape_cast %55 : vector<1x8x16x12xf32> to vector<8x16x12xf32>
    %57 = vector.shape_cast %54 : vector<8x16x12xf32> to vector<1x8x16x12xf32>
    tpu.vector_store %arg7[%c0_16, %c0_17, %c0_18, %c0_19], %57 {strides = array<i32>} : memref<1x8x16x12xf32, #tpu.memory_space<vmem>>, vector<1x8x16x12xf32>,
    return
  }
  func.func @transform_0(%arg0: i32, %arg1: i32) -> (i32, i32, i32, i32) {
    %c0_i32 = arith.constant 0 : i32
    %c0_i32_0 = arith.constant 0 : i32
    %c0_i32_1 = arith.constant 0 : i32
    %c0_i32_2 = arith.constant 0 : i32
    return %arg0, %c0_i32, %c0_i32_0, %c0_i32_1 : i32, i32, i32, i32
  }
  func.func @transform_1(%arg0: i32, %arg1: i32) -> (i32, i32) {
    %c0_i32 = arith.constant 0 : i32
    %c0_i32_0 = arith.constant 0 : i32
    %c0_i32_1 = arith.constant 0 : i32
    return %c0_i32, %c0_i32_0 : i32, i32
  }
  func.func @transform_2(%arg0: i32, %arg1: i32) -> (i32, i32) {
    %c0_i32 = arith.constant 0 : i32
    %c0_i32_0 = arith.constant 0 : i32
    %c0_i32_1 = arith.constant 0 : i32
    return %c0_i32, %c0_i32_0 : i32, i32
  }
  func.func @transform_3(%arg0: i32, %arg1: i32) -> (i32, i32) {
    %c0_i32 = arith.constant 0 : i32
    %c0_i32_0 = arith.constant 0 : i32
    %c0_i32_1 = arith.constant 0 : i32
    return %c0_i32, %c0_i32_0 : i32, i32
  }
  func.func @transform_4(%arg0: i32, %arg1: i32) -> (i32, i32) {
    %c0_i32 = arith.constant 0 : i32
    %c0_i32_0 = arith.constant 0 : i32
    %c0_i32_1 = arith.constant 0 : i32
    return %c0_i32, %c0_i32_0 : i32, i32
  }
  func.func @transform_5(%arg0: i32, %arg1: i32) -> (i32, i32, i32, i32) {
    %c0_i32 = arith.constant 0 : i32
    %c0_i32_0 = arith.constant 0 : i32
    %c0_i32_1 = arith.constant 0 : i32
    return %arg0, %arg1, %c0_i32, %c0_i32_0 : i32, i32, i32, i32
  }
}

</mosaic_0001>

<bundles_post_ra>
// kernel: tile.8
= control target key start
LH: loop header
LB: loop body
LE: loop exit
PB: predicated region body
PF: predicated region fallthrough
CT: control target
= control target key end

     0   :  { %s22_s0 = inlined_call_operand.vmem [shape: f32[3], index: 0, kind: input, shape index: {}]   ;;  %s23_s1 = inlined_call_operand.vmem [shape: f32[4,3], index: 1, kind: output, shape index: {}]  }
   0x1   :  { %v4_v0 = vld [vmem:[%s22_s0] ss:$0 sm:$0xff] }
   0x2   :  { %5 = vst [vmem:[%s23_s1] sm:$0xf] %v4_v0 }

// kernel: tile.9
= control target key start
LH: loop header
LB: loop body
LE: loop exit
PB: predicated region body
PF: predicated region fallthrough
CT: control target
= control target key end

     0   :  { %vm8_vm0 = vcmask 23552   ;;  %s40_s8 = smov 3   ;;  %s41_s9 = smov 6   ;;  %vm14_vm1 = vcmask 97352   ;;  %vm20_vm2 = vcmask 72752   ;;  %vm26_vm3 = vcmask 48152   ;;  %s58_s0 = inlined_call_operand.vmem [shape: f32[4,3], index: 0, kind: input, shape index: {}]   ;;  %s59_s1 = inlined_call_operand.vmem [shape: f32[1,12], index: 1, kind: output, shape index: {}]  }
   0x1   :  { %v5_v0 = vld [vmem:[%s58_s0] sm:$0xf]  ;;  %s39_s0 = smov 9  }
   0x2   :  { %6 = vst [vmem:[#allocation1] sm:$0xf] %v5_v0 }
   0x9   :  { %v11_v1 = vld [vmem:[#allocation1 + $0x3] sm:$0x1]   ;;  %v23_v2 = vld [vmem:[#allocation1 + $0x1] sm:$0x1]   ;;  %v7_v3 = vld [vmem:[#allocation1] sm:$0x1]  }
   0xa   :  { %12 = vrot.lane.b32.xlu0 %v11_v1, %s39_s0  ;;  %24 = vrot.lane.b32.xlu1 %v23_v2, %s40_s8  ;;  %v17_v4 = vld [vmem:[#allocation1 + $0x2] sm:$0x1]   ;;  %9 = vst.msk [vmem:[#allocation0] sm:$0x1] %vm8_vm0, %v7_v3  }
   0xe   :  { %18 = vrot.lane.b32.xlu0 %v17_v4, %s41_s9 }
  0x7c   :  { %v13_v5 = vpop.permute.xlu0 %12   ;;  %v25_v6 = vpop.permute.xlu1 %24  }
  0x7d   :  { %15 = vst.msk [vmem:[#allocation0] sm:$0x1] %vm14_vm1, %v13_v5  }
  0x80   :  { %v19_v7 = vpop.permute.xlu0 %18  }
  0x81   :  { %21 = vst.msk [vmem:[#allocation0] sm:$0x1] %vm20_vm2, %v19_v7  }
  0x82   :  { %27 = vst.msk [vmem:[#allocation0] sm:$0x1] %vm26_vm3, %v25_v6  }
  0x89   :  { %v32_v8 = vld [vmem:[#allocation0] sm:$0x1] }
  0x8a   :  { %35 = vst [vmem:[%s59_s1] sm:$0x1] %v32_v8 }

// kernel: recon_model_forward.1
= control target key start
LH: loop header
LB: loop body
LE: loop exit
PB: predicated region body
PF: predicated region fallthrough
CT: control target
= control target key end

     0   :  { %s6162_s18 = smov 0   ;;  %s6164_s19 = smov 0   ;;  %s8630_s0 = inlined_call_operand.vmem [shape: bf16[2,18,18,45], index: 0, kind: input, shape index: {}]   ;;  %s8631_s1 = inlined_call_operand.vmem [shape: bf16[45,128], index: 1, kind: input, shape index: {}]   ;;  %s8632_s2 = inlined_call_operand.vmem [shape: f32[1,128], index: 2, kind: input, shape index: {}]   ;;  %s8633_s3 = inlined_call_operand.vmem [shape: bf16[1152,12], index: 3, kind: input, shape index: {}]   ;;  %s8634_s4 = inlined_call_operand.vmem [shape: f32[1,12], index: 4, kind: input, shape index: {}]   ;;  %s8635_s5 = inlined_call_operand.vmem [shape: f32[2,16,16,12], index: 5, kind: output, shape index: {}]  }
   0x1   :  { %s6166_s20 = smov 0   ;;  %s6168_s21 = smov 0  }
   0x2   :  { %s6170_s22 = smov 0  }
   0x3 LB: > { %s24_s23 = sadd.s32 1, %s6119_s20  ;;  %s27_s24 = sadd.s32 1, %s6123_s21  ;;  %s6127_s22 = sphi %s6170_s22, %s15_s22   ;;  %s6123_s21 = sphi %s6168_s21, %s9052_s21   ;;  %s6119_s20 = sphi %s6166_s20, %s9051_s20   ;;  %s6115_s19 = sphi %s6164_s19, %s9050_s19   ;;  %s6111_s18 = sphi %s6162_s18, %s9049_s18  }
   0x4   : > { %p25_p0 = scmp.ge.s32.totalorder %s24_s23, 2  ;;  %p4954_p1 = scmp.ge.s32.totalorder %s6127_s22, 1 }
   0x5   : > { %p201_p2 = scmp.lt.s32.totalorder %s6127_s22, 5 }
   0x6   : > { %s9054_s23 = smov (%p25_p0, %s24_s23), 0  ;;  %s9056_s24 = smov (!%p25_p0, %s27_s24), %s6123_s21 }
   0x7   : > { %p202_p3 = pnand %p4954_p1, %p201_p2  ;;  %p29_p4 = scmp.ge.s32.totalorder %s9056_s24, 2 }
   0x9   : > { %s9058_s24 = smov (%p29_p4, %s9056_s24), 0  ;;  %205 = sbr.rel (%p202_p3) target bundleno = 756 (0x2f4), region = 40 }
   0xe   : > { %v5654_v0 = vld [vmem:[%s8631_s1 + $0x10] sm:$0x7f]   ;;  %vm1627_vm0 = vcmask 1045504   ;;  %vm1628_vm1 = vcmask 1046528   ;;  %v338_v1 = vlaneseq  ;;  %v6129_v2 = vmov 65535   ;;  %p234_p5 = scmp.lt.s32.totalorder %s6115_s19, 1 }
   0xf   : > { %v1629_v3 = vsel %vm1627_vm0, 4294967295, %v6129_v2  ;;  %v5655_v6 = vld [vmem:[%s8631_s1 + $0x8] sm:$0xff]   ;;  %v6130_v7 = vmov 1966171168   ;;  %s5260_s29 = smul.u32 96, %s6111_s18  ;;  %v5656_v11 = vld [vmem:[%s8631_s1] sm:$0xff]  }
  0x10   : > { %v1630_v4 = vsel %vm1628_vm1, %v1629_v3, 0  ;;  %s9060_s19 = smov (!%p234_p5, %s6115_s19), 1  ;;  %v336_v8 = vunpack.c.l.s4 %v6130_v7  ;;  %v6203_v9 = vshrl.u32 %v338_v1, 7  ;;  %vm1590_vm2 = vcmask 367616   ;;  %s6502_s16 = sshll.u32 %s6111_s18, 3 }
  0x11   : > { %v1632_v5 = vand.u32 %v5654_v0, %v1630_v4  ;;  %s5610_s30 = smul.u32 216, %s9060_s19  ;;  %vm3581_vm15 = vsmask.f32 7424  ;;  %p242_p6 = scmp.lt.s32.totalorder %s6502_s16, 15 }
  0x12   : > { %v337_v10 = vunpack.c.0.s8 %v336_v8  ;;  %s4958_s25 = sshll.u32 %s9060_s19, 5 }
  0x13   : > { %5548 = vmatprep.subr.bf16.mxu0 %v1632_v5  ;;  %s238_s10 = scalar_lea.vmem %s8630_s0, %s5610_s30 }
  0x14   : > { %5549 = vmatpush3.bf16.msra.mxu0 %v1632_v5  ;;  %v6214_v12 = vsub.s32 %v337_v10, %v6203_v9  ;;  %s6216_s11 = scalar_lea.vmem %s238_s10, %s5260_s29  ;;  %s5109_s29 = sadd.s32 4294967295, %s6502_s16 }
  0x15   : > { %5550 = vmatprep.subr.bf16.mxu0 %v5655_v6  ;;  %v4964_v13 = vld.sshfl [vmem:[%s6216_s11] sm:$0x33 pattern:$0x75316420]  ;;  %s9062_s16 = smov (!%p242_p6, %s6502_s16), 15 }
  0x16   : > { %v4965_v14 = vld.sshfl [vmem:[%s6216_s11 + $0x4] sm:$0x33 pattern:$0x75316420]  ;;  %v334_v15 = vcombine.high %v4964_v13, %v4964_v13  ;;  %v341_v16 = vrot.slane %v4964_v13, %v6214_v12  ;;  %s4957_s17 = sshll.u32 %s9062_s16, 1 }
  0x17   : > { %v358_v17 = vcombine.high %v4965_v14, %v4965_v14  ;;  %v365_v18 = vrot.slane %v4965_v14, %v6214_v12  ;;  %v4966_v19 = vld.sshfl [vmem:[%s6216_s11 + $0x8] sm:$0x1 pattern:$0x75316420]  ;;  %s246_s26 = sadd.s32 %s4958_s25, %s4957_s17 }
  0x18   : > { %5551 = vmatpush3.bf16.msra.mxu0 %v5655_v6  ;;  %v348_v20 = vrot.slane %v334_v15, %v6214_v12  ;;  %v4967_v21 = vld.sshfl [vmem:[%s6216_s11 + $0xc] sm:$0x33 pattern:$0x75316420]  ;;  %v388_v24 = vrot.slane %v4966_v19, %v6214_v12  ;;  %s4959_s27 = sshll.u32 %s246_s26, 3 }
  0x19   : > { %5552 = vmatprep.subr.bf16.mxu0 %v5656_v11  ;;  %v372_v22 = vrot.slane %v358_v17, %v6214_v12  ;;  %v4968_v23 = vld.sshfl [vmem:[%s6216_s11 + $0x10] sm:$0x33 pattern:$0x75316420]  ;;  %v396_v25 = vcombine.high %v4967_v21, %v4967_v21  ;;  %v403_v26 = vrot.slane %v4967_v21, %v6214_v12  ;;  %s8518_s28 = scalar_lea.vmem %s8635_s5, %s4959_s27 }
  0x1a   : > { %v964_v27 = vcombine.low %v341_v16, %v348_v20  ;;  %v4994_v28 = vcombine.high %v341_v16, %v348_v20  ;;  %v420_v29 = vcombine.high %v4968_v23, %v4968_v23  ;;  %v427_v30 = vrot.slane %v4968_v23, %v6214_v12  ;;  %v4969_v39 = vld.sshfl [vmem:[%s6216_s11 + $0x14] sm:$0x1 pattern:$0x75316420] }
  0x1b   : > { %v966_v31 = vcombine.low %v365_v18, %v372_v22  ;;  %v4995_v32 = vcombine.high %v365_v18, %v372_v22  ;;  %v410_v33 = vrot.slane %v396_v25, %v6214_v12  ;;  %v411_v34 = vcombine.high %v403_v26, %v403_v26  ;;  %v4970_v44 = vld.sshfl [vmem:[%s6216_s11 + $0x18] sm:$0x33 pattern:$0x75316420] }
  0x1c   : > { %5553 = vmatpush3.bf16.msra.mxu0 %v5656_v11  ;;  %v974_v35 = vrot.slane %v964_v27, %v6214_v12  ;;  %v981_v36 = vrot.slane %v4994_v28, %v6214_v12  ;;  %v434_v37 = vrot.slane %v420_v29, %v6214_v12  ;;  %v435_v38 = vcombine.high %v427_v30, %v427_v30  ;;  %v4971_v48 = vld.sshfl [vmem:[%s6216_s11 + $0x1c] sm:$0x33 pattern:$0x75316420] }
  0x1d   : > { %v988_v40 = vrot.slane %v966_v31, %v6214_v12  ;;  %v995_v41 = vrot.slane %v4995_v32, %v6214_v12  ;;  %v412_v42 = vcombine.high %v410_v33, %v410_v33  ;;  %v1013_v43 = vcombine.low %v388_v24, %v403_v26  ;;  %v4972_v58 = vld.sshfl [vmem:[%s6216_s11 + $0x20] sm:$0x1 pattern:$0x75316420] }
  0x1e   : > { %v996_v45 = vcombine.low %v974_v35, %v981_v36  ;;  %v1014_v46 = vcombine.low %v410_v33, %v411_v34  ;;  %v1016_v47 = vcombine.low %v434_v37, %v435_v38  ;;  %v436_v49 = vcombine.high %v434_v37, %v434_v37  ;;  %v4973_v3 = vld.sshfl [vmem:[%s6216_s11 + $0x24] sm:$0x33 pattern:$0x75316420] }
  0x1f   : > { %v997_v50 = vcombine.low %v988_v40, %v995_v41  ;;  %v1015_v51 = vcombine.low %v412_v42, %v427_v30  ;;  %v1023_v52 = vrot.slane %v1013_v43, %v6214_v12  ;;  %v450_v53 = vrot.slane %v4969_v39, %v6214_v12  ;;  %v4974_v7 = vld.sshfl [vmem:[%s6216_s11 + $0x28] sm:$0x33 pattern:$0x75316420] }
  0x20   : > { %v1004_v54 = vrot.slane %v996_v45, %v6214_v12  ;;  %v1030_v55 = vrot.slane %v1014_v46, %v6214_v12  ;;  %v1044_v56 = vrot.slane %v1016_v47, %v6214_v12  ;;  %v458_v57 = vcombine.high %v4970_v44, %v4970_v44  ;;  %v4975_v27 = vld.sshfl [vmem:[%s6216_s11 + $0x2c] sm:$0x1 pattern:$0x75316420] }
  0x21   : > { %v1011_v59 = vrot.slane %v997_v50, %v6214_v12  ;;  %v1037_v60 = vrot.slane %v1015_v51, %v6214_v12  ;;  %v465_v61 = vrot.slane %v4970_v44, %v6214_v12  ;;  %v482_v62 = vcombine.high %v4971_v48, %v4971_v48  ;;  %v4976_v31 = vld.sshfl [vmem:[%s6216_s11 + $0x30] sm:$0x33 pattern:$0x75316420] }
  0x22   : > { %v1045_v63 = vcombine.low %v1023_v52, %v1030_v55  ;;  %v472_v0 = vrot.slane %v458_v57, %v6214_v12  ;;  %v489_v1 = vrot.slane %v4971_v48, %v6214_v12  ;;  %v1062_v2 = vcombine.low %v436_v49, %v450_v53  ;;  %v4977_v41 = vld.sshfl [vmem:[%s6216_s11 + $0x34] sm:$0x33 pattern:$0x75316420] }
  0x23   : > { %v1012_v4 = vcombine.low %v1004_v54, %v1011_v59  ;;  %v1046_v5 = vcombine.low %v1037_v60, %v1044_v56  ;;  %v496_v6 = vrot.slane %v482_v62, %v6214_v12  ;;  %v512_v8 = vrot.slane %v4972_v58, %v6214_v12  ;;  %v4978_v50 = vld.sshfl [vmem:[%s6216_s11 + $0x38] sm:$0x1 pattern:$0x75316420] }
  0x24   : > { %v1053_v10 = vrot.slane %v1045_v63, %v6214_v12  ;;  %v1063_v11 = vcombine.low %v465_v61, %v472_v0  ;;  %v4996_v13 = vcombine.high %v465_v61, %v472_v0  ;;  %v1072_v14 = vrot.slane %v1062_v2, %v6214_v12  ;;  %v4979_v54 = vld.sshfl [vmem:[%s6216_s11 + $0x3c] sm:$0x33 pattern:$0x75316420] }
  0x25   : > { %5554 = vmatprep.mubr.msk.bf16.mxu0 %vm1590_vm2, %v1012_v4  ;;  %v1060_v15 = vrot.slane %v1046_v5, %v6214_v12  ;;  %v1065_v16 = vcombine.low %v489_v1, %v496_v6  ;;  %v520_v17 = vcombine.high %v4973_v3, %v4973_v3  ;;  %v527_v18 = vrot.slane %v4973_v3, %v6214_v12  ;;  %v4980_v4 = vld.sshfl [vmem:[%s6216_s11 + $0x40] sm:$0x33 pattern:$0x75316420] }
  0x26   : > { %v1079_v19 = vrot.slane %v1063_v11, %v6214_v12  ;;  %v1086_v20 = vrot.slane %v4996_v13, %v6214_v12  ;;  %v551_v21 = vrot.slane %v4974_v7, %v6214_v12  ;;  %v4997_v22 = vcombine.high %v489_v1, %v496_v6 }
  0x27   : > { %v1061_v23 = vcombine.low %v1053_v10, %v1060_v15  ;;  %v1093_v24 = vrot.slane %v1065_v16, %v6214_v12  ;;  %v534_v25 = vrot.slane %v520_v17, %v6214_v12  ;;  %v535_v26 = vcombine.high %v527_v18, %v527_v18  ;;  %v4981_v10 = vld.sshfl [vmem:[%s6216_s11 + $0x44] sm:$0x1 pattern:$0x75316420] }
  0x28   : > { %v1094_v28 = vcombine.low %v1072_v14, %v1079_v19  ;;  %v1112_v29 = vcombine.low %v512_v8, %v527_v18  ;;  %v1121_v30 = vrot.slane %v4997_v22, %v6214_v12  ;;  %v544_v32 = vcombine.high %v4974_v7, %v4974_v7  ;;  %v4982_v16 = vld.sshfl [vmem:[%s6216_s11 + $0x48] sm:$0x33 pattern:$0x75316420] }
  0x29   : > { %5555 = vmatmul.mubr.msk.bf16.vlgmr.msra.gmra.mxu0 %vm1590_vm2, %v1061_v23  ;;  %v1095_v33 = vcombine.low %v1086_v20, %v1093_v24  ;;  %v536_v34 = vcombine.high %v534_v25, %v534_v25  ;;  %v1113_v35 = vcombine.low %v534_v25, %v535_v26  ;;  %v559_v36 = vcombine.high %v551_v21, %v551_v21  ;;  %v4983_v25 = vld.sshfl [vmem:[%s6216_s11 + $0x4c] sm:$0x33 pattern:$0x75316420] }
  0x2a   : > { %v1102_v37 = vrot.slane %v1094_v28, %v6214_v12  ;;  %v1128_v38 = vrot.slane %v1112_v29, %v6214_v12  ;;  %v558_v39 = vrot.slane %v544_v32, %v6214_v12  ;;  %v574_v40 = vrot.slane %v4975_v27, %v6214_v12 }
  0x2b   : > { %v1109_v42 = vrot.slane %v1095_v33, %v6214_v12  ;;  %v1114_v43 = vcombine.low %v536_v34, %v551_v21  ;;  %v1135_v44 = vrot.slane %v1113_v35, %v6214_v12  ;;  %v582_v45 = vcombine.high %v4976_v31, %v4976_v31  ;;  %v4985_v35 = vld.sshfl [vmem:[%s6216_s11 + $0x54] sm:$0x33 pattern:$0x75316420] }
  0x2c   : > { %v1143_v46 = vcombine.low %v1121_v30, %v1128_v38  ;;  %v560_v47 = vcombine.high %v558_v39, %v558_v39  ;;  %v589_v48 = vrot.slane %v4976_v31, %v6214_v12  ;;  %v1160_v49 = vcombine.low %v558_v39, %v559_v36  ;;  %v4984_v30 = vld.sshfl [vmem:[%s6216_s11 + $0x50] sm:$0x1 pattern:$0x75316420] }
  0x2d   : > { %v1110_v51 = vcombine.low %v1102_v37, %v1109_v42  ;;  %v1142_v52 = vrot.slane %v1114_v43, %v6214_v12  ;;  %v596_v53 = vrot.slane %v582_v45, %v6214_v12  ;;  %v606_v55 = vcombine.high %v4977_v41, %v4977_v41 }
  0x2e   : > { %v1151_v56 = vrot.slane %v1143_v46, %v6214_v12  ;;  %v1161_v57 = vcombine.low %v560_v47, %v574_v40  ;;  %v1170_v58 = vrot.slane %v1160_v49, %v6214_v12  ;;  %v613_v59 = vrot.slane %v4977_v41, %v6214_v12 }
  0x2f   : > { %5558 = vmatprep.mubr.msk.bf16.mxu0 %vm1590_vm2, %v1110_v51  ;;  %v1144_v60 = vcombine.low %v1135_v44, %v1142_v52  ;;  %v1162_v61 = vcombine.low %v589_v48, %v596_v53  ;;  %v4998_v62 = vcombine.high %v589_v48, %v596_v53  ;;  %v620_v63 = vrot.slane %v606_v55, %v6214_v12 }
  0x30   : > { %v1177_v0 = vrot.slane %v1161_v57, %v6214_v12  ;;  %v636_v1 = vrot.slane %v4978_v50, %v6214_v12  ;;  %v644_v2 = vcombine.high %v4979_v54, %v4979_v54  ;;  %v651_v3 = vrot.slane %v4979_v54, %v6214_v12 }
  0x31   : > { %v1158_v5 = vrot.slane %v1144_v60, %v6214_v12  ;;  %v1184_v6 = vrot.slane %v1162_v61, %v6214_v12  ;;  %v1191_v7 = vrot.slane %v4998_v62, %v6214_v12  ;;  %v1209_v8 = vcombine.low %v613_v59, %v620_v63  ;;  %v4987_v60 = vld.sshfl [vmem:[%s6216_s11 + $0x5c] sm:$0x1 pattern:$0x75316420] }
  0x32   : > { %v1192_v11 = vcombine.low %v1170_v58, %v1177_v0  ;;  %v658_v13 = vrot.slane %v644_v2, %v6214_v12  ;;  %v659_v14 = vcombine.high %v651_v3, %v651_v3  ;;  %v4999_v15 = vcombine.high %v613_v59, %v620_v63 }
  0x33   : > { %v1159_v17 = vcombine.low %v1151_v56, %v1158_v5  ;;  %v1193_v18 = vcombine.low %v1184_v6, %v1191_v7  ;;  %v1211_v19 = vcombine.low %v636_v1, %v651_v3  ;;  %v1219_v20 = vrot.slane %v1209_v8, %v6214_v12  ;;  %v4986_v56 = vld.sshfl [vmem:[%s6216_s11 + $0x58] sm:$0x33 pattern:$0x75316420] }
  0x34   : > { %v1200_v21 = vrot.slane %v1192_v11, %v6214_v12  ;;  %v1212_v22 = vcombine.low %v658_v13, %v659_v14  ;;  %v1226_v23 = vrot.slane %v4999_v15, %v6214_v12  ;;  %v660_v24 = vcombine.high %v658_v13, %v658_v13  ;;  %v4988_v6 = vld.sshfl [vmem:[%s6216_s11 + $0x60] sm:$0x33 pattern:$0x75316420] }
  0x35   : > { %5559 = vmatmul.mubr.msk.bf16.gmra.mxu0 %vm1590_vm2, %v1159_v17  ;;  %v1207_v26 = vrot.slane %v1193_v18, %v6214_v12  ;;  %v1233_v27 = vrot.slane %v1211_v19, %v6214_v12  ;;  %v668_v28 = vcombine.high %v4980_v4, %v4980_v4  ;;  %v675_v29 = vrot.slane %v4980_v4, %v6214_v12  ;;  %v4989_v17 = vld.sshfl [vmem:[%s6216_s11 + $0x64] sm:$0x33 pattern:$0x75316420] }
  0x36   : > { %v1240_v31 = vrot.slane %v1212_v22, %v6214_v12  ;;  %v1241_v32 = vcombine.low %v1219_v20, %v1226_v23  ;;  %v698_v33 = vrot.slane %v4981_v10, %v6214_v12  ;;  %v706_v34 = vcombine.high %v4982_v16, %v4982_v16 }
  0x37   : > { %v1208_v36 = vcombine.low %v1200_v21, %v1207_v26  ;;  %v682_v37 = vrot.slane %v668_v28, %v6214_v12  ;;  %v683_v38 = vcombine.high %v675_v29, %v675_v29  ;;  %v713_v39 = vrot.slane %v4982_v16, %v6214_v12  ;;  %v4990_v26 = vld.sshfl [vmem:[%s6216_s11 + $0x68] sm:$0x1 pattern:$0x75316420] }
  0x38   : > { %v1242_v40 = vcombine.low %v1233_v27, %v1240_v31  ;;  %v1249_v41 = vrot.slane %v1241_v32, %v6214_v12  ;;  %v720_v42 = vrot.slane %v706_v34, %v6214_v12  ;;  %v1258_v43 = vcombine.low %v660_v24, %v675_v29  ;;  %v4991_v31 = vld.sshfl [vmem:[%s6216_s11 + $0x6c] sm:$0x33 pattern:$0x75316420] }
  0x39   : > { %5562 = vmatprep.mubr.msk.bf16.mxu0 %vm1590_vm2, %v1208_v36  ;;  %v684_v44 = vcombine.high %v682_v37, %v682_v37  ;;  %v1259_v45 = vcombine.low %v682_v37, %v683_v38  ;;  %v730_v46 = vcombine.high %v4983_v25, %v4983_v25  ;;  %v737_v47 = vrot.slane %v4983_v25, %v6214_v12 }
  0x3a   : > { %v1256_v48 = vrot.slane %v1242_v40, %v6214_v12  ;;  %v1261_v49 = vcombine.low %v713_v39, %v720_v42  ;;  %v1268_v50 = vrot.slane %v1258_v43, %v6214_v12  ;;  %v760_v51 = vrot.slane %v4984_v30, %v6214_v12  ;;  %v4992_v40 = vld.sshfl [vmem:[%s6216_s11 + $0x70] sm:$0x33 pattern:$0x75316420] }
  0x3b   : > { %v1260_v52 = vcombine.low %v684_v44, %v698_v33  ;;  %v1275_v53 = vrot.slane %v1259_v45, %v6214_v12  ;;  %v744_v54 = vrot.slane %v730_v46, %v6214_v12  ;;  %v775_v55 = vrot.slane %v4985_v35, %v6214_v12 }
  0x3c   : > { %v1257_v57 = vcombine.low %v1249_v41, %v1256_v48  ;;  %v1289_v58 = vrot.slane %v1261_v49, %v6214_v12  ;;  %v5000_v59 = vcombine.high %v713_v39, %v720_v42  ;;  %v768_v61 = vcombine.high %v4985_v35, %v4985_v35 }
  0x3d   : > { %v1282_v62 = vrot.slane %v1260_v52, %v6214_v12  ;;  %v1290_v63 = vcombine.low %v1268_v50, %v1275_v53  ;;  %v1308_v0 = vcombine.low %v737_v47, %v744_v54  ;;  %v5001_v1 = vcombine.high %v737_v47, %v744_v54 }
  0x3e   : > { %5563 = vmatmul.mubr.msk.bf16.gmra.mxu0 %vm1590_vm2, %v1257_v57  ;;  %v1310_v2 = vcombine.low %v760_v51, %v775_v55  ;;  %v1317_v3 = vrot.slane %v5000_v59, %v6214_v12  ;;  %v782_v4 = vrot.slane %v768_v61, %v6214_v12  ;;  %v783_v5 = vcombine.high %v775_v55, %v775_v55  ;;  %v4993_v61 = vld.sshfl [vmem:[%s6216_s11 + $0x74] sm:$0x1 pattern:$0x75316420] }
  0x3f   : > { %v1291_v7 = vcombine.low %v1282_v62, %v1289_v58  ;;  %v1298_v8 = vrot.slane %v1290_v63, %v6214_v12  ;;  %v1324_v10 = vrot.slane %v1308_v0, %v6214_v12  ;;  %v1331_v11 = vrot.slane %v5001_v1, %v6214_v12 }
  0x40   : > { %v1338_v13 = vrot.slane %v1310_v2, %v6214_v12  ;;  %v784_v14 = vcombine.high %v782_v4, %v782_v4  ;;  %v792_v15 = vcombine.high %v4986_v56, %v4986_v56  ;;  %v799_v16 = vrot.slane %v4986_v56, %v6214_v12 }
  0x41   : > { %v1305_v18 = vrot.slane %v1291_v7, %v6214_v12  ;;  %v1339_v19 = vcombine.low %v1317_v3, %v1324_v10  ;;  %v822_v20 = vrot.slane %v4987_v60, %v6214_v12  ;;  %v1356_v21 = vcombine.low %v782_v4, %v783_v5 }
  0x42   : > { %v1340_v22 = vcombine.low %v1331_v11, %v1338_v13  ;;  %v806_v23 = vrot.slane %v792_v15, %v6214_v12  ;;  %v807_v24 = vcombine.high %v799_v16, %v799_v16  ;;  %v1357_v25 = vcombine.low %v784_v14, %v799_v16 }
  0x43   : > { %v1306_v27 = vcombine.low %v1298_v8, %v1305_v18  ;;  %v1347_v28 = vrot.slane %v1339_v19, %v6214_v12  ;;  %v1366_v29 = vrot.slane %v1356_v21, %v6214_v12  ;;  %v830_v30 = vcombine.high %v4988_v6, %v4988_v6 }
  0x44   : > { %v1354_v32 = vrot.slane %v1340_v22, %v6214_v12  ;;  %v808_v33 = vcombine.high %v806_v23, %v806_v23  ;;  %v1358_v34 = vcombine.low %v806_v23, %v807_v24  ;;  %v1373_v35 = vrot.slane %v1357_v25, %v6214_v12 }
  0x45   : > { %5566 = vmatprep.mubr.msk.bf16.mxu0 %vm1590_vm2, %v1306_v27  ;;  %v837_v36 = vrot.slane %v4988_v6, %v6214_v12  ;;  %v844_v37 = vrot.slane %v830_v30, %v6214_v12  ;;  %v854_v38 = vcombine.high %v4989_v17, %v4989_v17  ;;  %v861_v39 = vrot.slane %v4989_v17, %v6214_v12 }
  0x46   : > { %v1355_v41 = vcombine.low %v1347_v28, %v1354_v32  ;;  %v1359_v42 = vcombine.low %v808_v33, %v822_v20  ;;  %v1380_v43 = vrot.slane %v1358_v34, %v6214_v12  ;;  %v1388_v44 = vcombine.low %v1366_v29, %v1373_v35  ;;  %v4963_v34 = vld [vmem:[%s8632_s2] ss:$0 sm:$0xff]  ;;  %v5657_v35 = vld [vmem:[%s8633_s3 + $0xf8] sm:$0xff]  }
  0x47   : > { %v868_v45 = vrot.slane %v854_v38, %v6214_v12  ;;  %v1405_v46 = vcombine.low %v837_v36, %v844_v37  ;;  %v5002_v47 = vcombine.high %v837_v36, %v844_v37  ;;  %v884_v48 = vrot.slane %v4990_v26, %v6214_v12  ;;  %5340 = vmatprep.subr.bf16.mxu0 %v5657_v35  ;;  %v5658_v37 = vld [vmem:[%s8633_s3 + $0xb8] sm:$0xff]  }
  0x48   : > { %5567 = vmatmul.mubr.msk.bf16.gmra.mxu0 %vm1590_vm2, %v1355_v41  ;;  %v1387_v49 = vrot.slane %v1359_v42, %v6214_v12  ;;  %v1396_v50 = vrot.slane %v1388_v44, %v6214_v12  ;;  %v892_v51 = vcombine.high %v4991_v31, %v4991_v31  ;;  %v899_v52 = vrot.slane %v4991_v31, %v6214_v12 }
  0x49   : > { %v1407_v53 = vcombine.low %v861_v39, %v868_v45  ;;  %v5003_v54 = vcombine.high %v861_v39, %v868_v45  ;;  %v1415_v55 = vrot.slane %v1405_v46, %v6214_v12  ;;  %v1422_v56 = vrot.slane %v5002_v47, %v6214_v12  ;;  %5341 = vmatpush3.bf16.msra.mxu0 %v5658_v37 }
  0x4a   : > { %v1389_v57 = vcombine.low %v1380_v43, %v1387_v49  ;;  %v906_v58 = vrot.slane %v892_v51, %v6214_v12  ;;  %v907_v59 = vcombine.high %v899_v52, %v899_v52  ;;  %v916_v60 = vcombine.high %v4992_v40, %v4992_v40 }
  0x4b   : > { %v1429_v62 = vrot.slane %v1407_v53, %v6214_v12  ;;  %v1436_v63 = vrot.slane %v5003_v54, %v6214_v12  ;;  %v1437_v0 = vcombine.low %v1415_v55, %v1422_v56  ;;  %v923_v1 = vrot.slane %v4992_v40, %v6214_v12  ;;  %v5660_v55 = vld [vmem:[%s8633_s3 + $0xf0] sm:$0xff]  }
  0x4c   : > { %v1403_v2 = vrot.slane %v1389_v57, %v6214_v12  ;;  %v908_v3 = vcombine.high %v906_v58, %v906_v58  ;;  %v930_v4 = vrot.slane %v916_v60, %v6214_v12  ;;  %v1454_v5 = vcombine.low %v884_v48, %v899_v52  ;;  %v5659_v57 = vld [vmem:[%s8633_s3 + $0x78] sm:$0xff]   ;;  %5342 = vmatprep.subr.bf16.mxu0 %v5660_v55  ;;  %v5670_v55 = vld [vmem:[%s8633_s3 + $0xa0] sm:$0xff]  }
  0x4d   : > { %v1438_v6 = vcombine.low %v1429_v62, %v1436_v63  ;;  %v1445_v7 = vrot.slane %v1437_v0, %v6214_v12  ;;  %v931_v8 = vcombine.high %v923_v1, %v923_v1  ;;  %v1455_v10 = vcombine.low %v906_v58, %v907_v59  ;;  %5276 = vmatprep.subr.bf16.mxu1 %v5659_v57  ;;  %v5662_v63 = vld [vmem:[%s8633_s3 + $0xb0] sm:$0xff]  }
  0x4e   : > { %v1404_v11 = vcombine.low %v1396_v50, %v1403_v2  ;;  %v1456_v13 = vcombine.low %v908_v3, %v923_v1  ;;  %v1464_v14 = vrot.slane %v1454_v5, %v6214_v12  ;;  %v932_v15 = vcombine.high %v930_v4, %v930_v4  ;;  %v5661_v1 = vld [vmem:[%s8633_s3 + $0x38] sm:$0xff]   ;;  %5343 = vmatpush3.bf16.msra.mxu0 %v5662_v63 }
  0x4f   : > { %v1452_v16 = vrot.slane %v1438_v6, %v6214_v12  ;;  %v1457_v17 = vcombine.low %v930_v4, %v931_v8  ;;  %v1471_v18 = vrot.slane %v1455_v10, %v6214_v12  ;;  %v946_v19 = vrot.slane %v4993_v61, %v6214_v12  ;;  %5277 = vmatpush3.bf16.msra.mxu1 %v5661_v1 }
  0x50   : > { %5570 = vmatprep.mubr.msk.bf16.mxu0 %vm1590_vm2, %v1404_v11  ;;  %v1478_v20 = vrot.slane %v1456_v13, %v6214_v12  ;;  %v6131_v31 = vmov 1983009808   ;;  %v2901_v37 = vadd.s32 16, %v6203_v9 }
  0x51   : > { %v1453_v21 = vcombine.low %v1445_v7, %v1452_v16  ;;  %v1485_v22 = vrot.slane %v1457_v17, %v6214_v12  ;;  %v1486_v23 = vcombine.low %v1464_v14, %v1471_v18  ;;  %v1503_v24 = vcombine.low %v932_v15, %v946_v19 }
  0x52   : > { %v949_v32 = vunpack.c.l.s4 %v6131_v31  ;;  %v5666_v31 = vld [vmem:[%s8633_s3 + $0xa8] sm:$0xff]  }
  0x53   : > { %5571 = vmatmul.mubr.msk.bf16.gmra.mxu0 %vm1590_vm2, %v1453_v21  ;;  %v1487_v25 = vcombine.low %v1478_v20, %v1485_v22  ;;  %v1494_v26 = vrot.slane %v1486_v23, %v6214_v12  ;;  %v1510_v27 = vrot.slane %v1503_v24, %v6214_v12  ;;  %v5664_v20 = vld [vmem:[%s8633_s3 + $0xe8] sm:$0xff]   ;;  %v5663_v24 = vld [vmem:[%s8633_s3 + $0x70] sm:$0xff]  }
  0x54   : > { %v950_v33 = vunpack.c.0.s8 %v949_v32  ;;  %5344 = vmatprep.subr.bf16.mxu0 %v5664_v20  ;;  %5278 = vmatprep.subr.bf16.mxu1 %v5663_v24 }
  0x55   : > { %v1501_v28 = vrot.slane %v1487_v25, %v6214_v12  ;;  %v1517_v30 = vrot.slane %v1510_v27, %v6214_v12  ;;  %v947_v12 = vcombine.high %v4963_v34, %v4963_v34  ;;  %5345 = vmatpush3.bf16.msra.mxu0 %v5666_v31 }
  0x56   : > { %v6385_v36 = vsub.s32 %v950_v33, %v6203_v9 }
  0x57   : > { %v1502_v29 = vcombine.low %v1494_v26, %v1501_v28 }
  0x58   : > { %v954_v38 = vrot.slane %v4963_v34, %v6385_v36  ;;  %v961_v39 = vrot.slane %v947_v12, %v6385_v36  ;;  %v5665_v12 = vld [vmem:[%s8633_s3 + $0x30] sm:$0xff]  }
  0x59   : > { %5574 = vmatprep.mubr.msk.bf16.mxu0 %vm1590_vm2, %v1502_v29  ;;  %5279 = vmatpush3.bf16.msra.mxu1 %v5665_v12 }
  0x5a   : > { %v962_v40 = vcombine.high %v954_v38, %v954_v38  ;;  %v963_v41 = vcombine.high %v961_v39, %v961_v39  ;;  %v1552_v42 = vcombine.low %v954_v38, %v954_v38 }
  0x5b   : > { %5575 = vmatmul.mubr.msk.bf16.gmra.mxu0 %vm1590_vm2, %v1517_v30 }
  0x5c   : > { %v1553_v43 = vcombine.low %v962_v40, %v961_v39  ;;  %v1535_v44 = vcombine.low %v954_v38, %v962_v40  ;;  %v1536_v45 = vcombine.low %v961_v39, %v963_v41  ;;  %v1560_v46 = vrot.slane %v1552_v42, %v6385_v36 }
  0x5d   : > { %v1569_v48 = vcombine.low %v963_v41, %v954_v38 }
  0x5e   : > { %v6394_v47 = vrot.slane %v1553_v43, %v6385_v36  ;;  %v6397_v49 = vrot.slane %v1535_v44, %v6385_v36  ;;  %v6400_v50 = vrot.slane %v1536_v45, %v6385_v36  ;;  %v5668_v44 = vld [vmem:[%s8633_s3 + $0xe0] sm:$0xff]  }
  0x5f   : > { %v6406_v52 = vrot.slane %v1569_v48, %v6385_v36  ;;  %5346 = vmatprep.subr.bf16.mxu0 %v5668_v44 }
  0x60   : > { %v6403_v51 = vcombine.low %v1560_v46, %v6394_v47  ;;  %v6410_v53 = vcombine.low %v6397_v49, %v6400_v50  ;;  %v6446_v10 = vcombine.low %v6400_v50, %v1560_v46  ;;  %5347 = vmatpush3.bf16.msra.mxu0 %v5670_v55  ;;  %v6566_v24 = vcombine.low %v6400_v50, %v6397_v49 }
  0x61   : > { %8727 = vst [vmem:[#allocation2_spill] sm:$0xff] %v6406_v52  ;;  %v6421_v59 = vcombine.low %v6406_v52, %v6394_v47  ;;  %v6450_v11 = vcombine.low %v6406_v52, %v6397_v49 }
  0x62   : > { %8729 = vst [vmem:[#allocation4_spill] sm:$0xff] %v6446_v10 }
  0x63   : > { %8728 = vst [vmem:[#allocation3_spill] sm:$0xff] %v6421_v59  ;;  %8730 = vst [vmem:[#allocation5_spill] sm:$0xff] %v6450_v11 }
  0xe9   : > { %v5556_v54 = vpop.f32.mrf.mxu0 }
  0xea   : > { %v1677_v56 = vadd.f32 %v5556_v54, %v6403_v51  ;;  %v5667_v54 = vld [vmem:[%s8633_s3 + $0x68] sm:$0xff]  }
  0xeb   : > { %v1668_v58 = vpop.f32.mrf.mxu0  ;;  %5280 = vmatprep.subr.bf16.mxu1 %v5667_v54 }
  0xec   : > { %v1819_v60 = vcombine.high %v1677_v56, %v1677_v56  ;;  %v6424_v61 = vrot.slane %v1677_v56, %v6385_v36  ;;  %v1669_v62 = vadd.f32 %v1668_v58, %v6410_v53  ;;  %v6538_v58 = vcombine.low %v6394_v47, %v6406_v52 }
  0xed   : > { %v5557_v0 = vpop.f32.mrf.mxu0 }
  0xee   : > { %v6434_v2 = vrot.slane %v1819_v60, %v6385_v36  ;;  %v6438_v3 = vcombine.high %v6424_v61, %v6424_v61  ;;  %v5027_v4 = vmul.f32 -1.442695, %v6424_v61  ;;  %v1785_v5 = vcombine.high %v1669_v62, %v1669_v62  ;;  %8731 = vst [vmem:[#allocation6_spill] sm:$0xff] %v6538_v58 }
  0xef   : > { %v6442_v6 = vrot.slane %v1669_v62, %v6385_v36  ;;  %v1680_v7 = vadd.f32 %v5557_v0, %v6421_v59  ;;  %v1671_v8 = vpop.f32.mrf.mxu0  ;;  %v5669_v62 = vld [vmem:[%s8633_s3 + $0x28] sm:$0xff]  }
  0xf0   : > { %v6454_v13 = vcombine.high %v6434_v2, %v6434_v2  ;;  %5729 = vpow2.f32 %v5027_v4  ;;  %v5028_v14 = vmul.f32 -1.442695, %v6438_v3  ;;  %v5029_v15 = vmul.f32 -1.442695, %v6434_v2  ;;  %5281 = vmatpush3.bf16.msra.mxu1 %v5669_v62 }
  0xf1   : > { %v6459_v16 = vrot.slane %v1785_v5, %v6385_v36  ;;  %v6463_v17 = vcombine.high %v6442_v6, %v6442_v6  ;;  %v5019_v18 = vmul.f32 -1.442695, %v6442_v6  ;;  %v1836_v19 = vcombine.high %v1680_v7, %v1680_v7 }
  0xf2   : > { %5731 = vpow2.f32 %v5028_v14  ;;  %v5030_v21 = vmul.f32 -1.442695, %v6454_v13  ;;  %v6471_v22 = vrot.slane %v1680_v7, %v6385_v36  ;;  %v1672_v23 = vadd.f32 %v1671_v8, %v6410_v53 }
  0xf3   : > { %5733 = vpow2.f32 %v5029_v15  ;;  %v6479_v25 = vcombine.high %v6459_v16, %v6459_v16  ;;  %v5020_v26 = vmul.f32 -1.442695, %v6463_v17  ;;  %v5021_v27 = vmul.f32 -1.442695, %v6459_v16 }
  0xf4   : > { %5735 = vpow2.f32 %v5030_v21  ;;  %v6484_v28 = vrot.slane %v1836_v19, %v6385_v36  ;;  %v6488_v29 = vcombine.high %v6471_v22, %v6471_v22  ;;  %v5031_v30 = vmul.f32 -1.442695, %v6471_v22 }
  0xf5   : > { %5737 = vpow2.f32 %v5019_v18  ;;  %v5022_v32 = vmul.f32 -1.442695, %v6479_v25  ;;  %v1802_v33 = vcombine.high %v1672_v23, %v1672_v23  ;;  %v6496_v34 = vrot.slane %v1672_v23, %v6385_v36  ;;  %v5560_v35 = vpop.f32.mrf.mxu0 }
  0xf6   : > { %5739 = vpow2.f32 %v5020_v26  ;;  %v6507_v38 = vcombine.high %v6484_v28, %v6484_v28  ;;  %v5032_v39 = vmul.f32 -1.442695, %v6488_v29  ;;  %v5033_v40 = vmul.f32 -1.442695, %v6484_v28 }
  0xf7   : > { %5741 = vpow2.f32 %v5021_v27  ;;  %v6512_v41 = vrot.slane %v1802_v33, %v6385_v36  ;;  %v6516_v42 = vcombine.high %v6496_v34, %v6496_v34  ;;  %v1684_v43 = vpop.f32.mrf.mxu0  ;;  %v1693_v46 = vadd.f32 %v5560_v35, %v6446_v10 }
  0xf8   : > { %5743 = vpow2.f32 %v5022_v32  ;;  %v5034_v45 = vmul.f32 -1.442695, %v6507_v38  ;;  %v1685_v48 = vadd.f32 %v1684_v43, %v6450_v11  ;;  %v5023_v57 = vmul.f32 -1.442695, %v6496_v34 }
  0xf9   : > { %5745 = vpow2.f32 %v5031_v30  ;;  %v6533_v56 = vcombine.high %v6512_v41, %v6512_v41  ;;  %v5561_v60 = vpop.f32.mrf.mxu0  ;;  %v5024_v63 = vmul.f32 -1.442695, %v6516_v42  ;;  %v1887_v0 = vcombine.high %v1693_v46, %v1693_v46 }
  0xfa   : > { %5747 = vpow2.f32 %v5032_v39  ;;  %v6545_v1 = vrot.slane %v1693_v46, %v6385_v36  ;;  %v5025_v4 = vmul.f32 -1.442695, %v6512_v41  ;;  %v1853_v47 = vcombine.high %v1685_v48, %v1685_v48 }
  0xfb   : > { %5749 = vpow2.f32 %v5033_v40  ;;  %v1687_v5 = vpop.f32.mrf.mxu0  ;;  %v6548_v7 = vstv %s5109_s29  ;;  %v6550_v8 = vadd.s32 4294967295, %v2901_v37  ;;  %v6553_v14 = vrot.slane %v1685_v48, %v6385_v36 }
  0xfc   : > { %8732 = vst [vmem:[#allocation7_spill] sm:$0xff] %v6548_v7  ;;  %5751 = vpow2.f32 %v5034_v45  ;;  %v5026_v18 = vmul.f32 -1.442695, %v6533_v56  ;;  %v6557_v19 = vrot.slane %v1887_v0, %v6385_v36  ;;  %v6561_v20 = vcombine.high %v6545_v1, %v6545_v1 }
  0xfd   : > { %8733 = vst [vmem:[#allocation8_spill] sm:$0xff] %v6550_v8  ;;  %8734 = vst [vmem:[#allocation9_spill] sm:$0xff] %v6553_v14  ;;  %v5730_v15 = vpop.eup %5729  ;;  %5753 = vpow2.f32 %v5023_v57  ;;  %v1696_v23 = vadd.f32 %v5561_v60, %v6538_v58  ;;  %v6569_v30 = vadd.s32 4294967295, %v6203_v9  ;;  %v6572_v31 = vmul.f32 -1.442695, %v6545_v1 }
  0xfe   : > { %8735 = vst [vmem:[#allocation10_spill] sm:$0xff] %v6557_v19  ;;  %v2535_v21 = vadd.f32 1.0, %v5730_v15  ;;  %5755 = vpow2.f32 %v5024_v63  ;;  %v5564_v26 = vpop.f32.mrf.mxu0  ;;  %v6575_v32 = vrot.slane %v1853_v47, %v6385_v36  ;;  %v6579_v12 = vcombine.high %v6553_v14, %v6553_v14 }
  0xff   : > { %v5732_v27 = vpop.eup %5731  ;;  %8736 = vst [vmem:[#allocation11_spill] sm:$0xff] %v6569_v30  ;;  %5757 = vpow2.f32 %v5025_v4  ;;  %v6582_v49 = vmul.f32 -1.442695, %v6553_v14  ;;  %v6588_v39 = vcombine.high %v6557_v19, %v6557_v19  ;;  %v6591_v40 = vmul.f32 -1.442695, %v6561_v20 }
 0x100   : > { %8737 = vst [vmem:[#allocation12_spill] sm:$0xff] %v6575_v32  ;;  %v5734_v33 = vpop.eup %5733  ;;  %v2536_v35 = vadd.f32 1.0, %v5732_v27  ;;  %5759 = vrcp.f32 %v2535_v21  ;;  %8738 = vst [vmem:[#allocation13_spill] sm:$0xff] %v6579_v12  ;;  %v6584_v50 = vpop.f32.mrf.mxu0  ;;  %v1904_v45 = vcombine.high %v1696_v23, %v1696_v23  ;;  %v1688_v46 = vadd.f32 %v1687_v5, %v6566_v24 }
 0x101   : > { %v5736_v9 = vpop.eup %5735  ;;  %v2537_v37 = vadd.f32 1.0, %v5734_v33  ;;  %5761 = vpow2.f32 %v5026_v18  ;;  %8739 = vst [vmem:[#allocation14_spill] sm:$0xff] %v6588_v39  ;;  %v6597_v57 = vmul.f32 -1.442695, %v6557_v19  ;;  %v6601_v60 = vcombine.high %v6575_v32, %v6575_v32 }
 0x102   : > { %v5738_v43 = vpop.eup %5737  ;;  %v2538_v44 = vadd.f32 1.0, %v5736_v9  ;;  %5763 = vrcp.f32 %v2536_v35  ;;  %v6594_v48 = vpop.f32.mrf.mxu0  ;;  %vm2905_vm3 = vcmp.ge.s32.totalorder %v6548_v7, 0  ;;  %vm2915_vm4 = vcmp.lt.s32.totalorder %v6548_v7, 16 }
 0x103   : > { %v5740_v54 = vpop.eup %5739  ;;  %5765 = vrcp.f32 %v2537_v37  ;;  %v2527_v55 = vadd.f32 1.0, %v5738_v43  ;;  %8740 = vst [vmem:[#allocation15_spill] sm:$0xff] %v6601_v60  ;;  %v6606_v0 = vmul.f32 -1.442695, %v6579_v12  ;;  %v1709_v4 = vadd.f32 %v5564_v26, %v6410_v53  ;;  %vm6694_vm6 = vmand %vm2905_vm3, %vm2915_vm4 }
 0x104   : > { %v5742_v62 = vpop.eup %5741  ;;  %5767 = vrcp.f32 %v2538_v44  ;;  %v2528_v63 = vadd.f32 1.0, %v5740_v54  ;;  %v6609_v47 = vpop.f32.mrf.mxu0  ;;  %v6612_v18 = vmul.f32 -1.442695, %v6588_v39  ;;  %v6615_v21 = vrot.slane %v1696_v23, %v6385_v36  ;;  %v5673_v39 = vld [vmem:[%s8633_s3 + $0x20] sm:$0xff]  }
 0x105   : > { %v5744_v5 = vpop.eup %5743  ;;  %v2529_v15 = vadd.f32 1.0, %v5742_v62  ;;  %5769 = vrcp.f32 %v2527_v55  ;;  %v6618_v35 = vrot.slane %v1904_v45, %v6385_v36  ;;  %v1870_v9 = vcombine.high %v1688_v46, %v1688_v46 }
 0x106   : > { %8741 = vst [vmem:[#allocation16_spill] sm:$0xff] %v6615_v21  ;;  %v5746_v27 = vpop.eup %5745  ;;  %v2530_v33 = vadd.f32 1.0, %v5744_v5  ;;  %5771 = vrcp.f32 %v2528_v63  ;;  %vm2970_vm5 = vcmp.lt.s32.totalorder %v6550_v8, 16  ;;  %v6622_v43 = vmul.f32 -1.442695, %v6575_v32 }
 0x107   : > { %8742 = vst [vmem:[#allocation17_spill] sm:$0xff] %v6618_v35  ;;  %v5748_v37 = vpop.eup %5747  ;;  %5773 = vrcp.f32 %v2529_v15  ;;  %v2539_v26 = vadd.f32 1.0, %v5746_v27  ;;  %v6625_v44 = vmul.f32 -1.442695, %v6601_v60  ;;  %v6628_v55 = vrot.slane %v1688_v46, %v6385_v36  ;;  %vm6736_vm7 = vmand %vm6694_vm6, %vm2970_vm5 }
 0x108   : > { %v5750_v23 = vpop.eup %5749  ;;  %5775 = vrcp.f32 %v2530_v33  ;;  %v2540_v54 = vadd.f32 1.0, %v5748_v37  ;;  %v1955_v45 = vcombine.high %v1709_v4, %v1709_v4  ;;  %v6630_v62 = vpop.f32.mrf.mxu0  ;;  %v6634_v15 = vcombine.high %v6615_v21, %v6615_v21 }
 0x109   : > { %8743 = vst [vmem:[#allocation18_spill] sm:$0xff] %v6628_v55  ;;  %v5752_v63 = vpop.eup %5751  ;;  %v2541_v5 = vadd.f32 1.0, %v5750_v23  ;;  %5777 = vrcp.f32 %v2539_v26  ;;  %v6637_v27 = vrot.slane %v1870_v9, %v6385_v36  ;;  %v6641_v46 = vcombine.high %v6618_v35, %v6618_v35 }
 0x10a   : > { %8744 = vst [vmem:[#allocation19_spill] sm:$0xff] %v6634_v15  ;;  %v5754_v52 = vpop.eup %5753  ;;  %v2542_v32 = vadd.f32 1.0, %v5752_v63  ;;  %5779 = vrcp.f32 %v2540_v54  ;;  %v6644_v33 = vmul.f32 -1.442695, %v6615_v21  ;;  %v6646_v37 = vpop.f32.mrf.mxu0  ;;  %v6649_v12 = vmul.f32 -1.442695, %v6618_v35 }
 0x10b   : > { %8745 = vst [vmem:[#allocation20_spill] sm:$0xff] %v6637_v27  ;;  %8746 = vst [vmem:[#allocation21_spill] sm:$0xff] %v6641_v46  ;;  %v5756_v26 = vpop.eup %5755  ;;  %5781 = vrcp.f32 %v2541_v5  ;;  %v2531_v23 = vadd.f32 1.0, %v5754_v52  ;;  %v6652_v9 = vrot.slane %v1709_v4, %v6385_v36  ;;  %v5672_v54 = vld [vmem:[%s8633_s3 + $0xd8] sm:$0xff]   ;;  %v6659_v21 = vcombine.high %v6628_v55, %v6628_v55  ;;  %v5671_v4 = vld [vmem:[%s8633_s3 + $0x60] sm:$0xff]  }
 0x10c   : > { %v5758_v63 = vpop.eup %5757  ;;  %5783 = vrcp.f32 %v2542_v32  ;;  %v2532_v60 = vadd.f32 1.0, %v5756_v26  ;;  %v6662_v5 = vrot.slane %v1955_v45, %v6385_v36  ;;  %v6664_v52 = vpop.f32.mrf.mxu0  ;;  %v5674_v35 = vld [vmem:[%s8633_s3 + $0x98] sm:$0xff]   ;;  %v6673_v26 = vmul.f32 -1.442695, %v6634_v15  ;;  %5348 = vmatprep.subr.bf16.mxu0 %v5672_v54  ;;  %5282 = vmatprep.subr.bf16.mxu1 %v5671_v4 }
 0x10d   : > { %8747 = vst [vmem:[#allocation22_spill] sm:$0xff] %v6652_v9  ;;  %8748 = vst [vmem:[#allocation23_spill] sm:$0xff] %v6659_v21  ;;  %v5760_v11 = vpop.eup %5759  ;;  %v2533_v32 = vadd.f32 1.0, %v5758_v63  ;;  %5785 = vrcp.f32 %v2531_v23  ;;  %v6677_v45 = vcombine.high %v6637_v27, %v6637_v27  ;;  %v6688_v23 = vcombine.high %v6652_v9, %v6652_v9  ;;  %5349 = vmatpush3.bf16.msra.mxu0 %v5674_v35  ;;  %v5676_v35 = vld [vmem:[%s8633_s3 + $0xd0] sm:$0xff]  }
 0x10e   : > { %8749 = vst [vmem:[#allocation24_spill] sm:$0xff] %v6662_v5  ;;  %8750 = vst [vmem:[#allocation25_spill] sm:$0xff] %v6664_v52  ;;  %v5762_v19 = vpop.eup %5761  ;;  %v2805_v14 = vmul.f32 %v5760_v11, %v6424_v61  ;;  %5787 = vrcp.f32 %v2532_v60  ;;  %v6684_v52 = vmul.f32 -1.442695, %v6641_v46  ;;  %v8752_v54 = vmov 0  ;;  %v6703_v46 = vpop.f32.mrf.mxu0  ;;  %5283 = vmatpush3.bf16.msra.mxu1 %v5673_v39  ;;  %v5678_v39 = vld [vmem:[%s8633_s3 + $0x90] sm:$0xff]   ;;  %5350 = vmatprep.subr.bf16.mxu0 %v5676_v35 }
 0x10f   : > { %8751 = vst [vmem:[#allocation26_spill] sm:$0xff] %v6677_v45  ;;  %v5764_v63 = vpop.eup %5763  ;;  %v8753_v54 = vsel %vm6694_vm6, 4294967295, %v8752_v54  ;;  %v2534_v61 = vadd.f32 1.0, %v5762_v19  ;;  %5789 = vrcp.f32 %v2533_v32  ;;  %v6699_v11 = vmul.f32 -1.442695, %v6628_v55  ;;  %8755 = vst [vmem:[#allocation28_spill] sm:$0xff] %v6703_v46 }
 0x110   : > { %8754 = vst [vmem:[#allocation27_spill] sm:$0xff] %v8753_v54  ;;  %v1701_v60 = vadd.f32 %v6584_v50, %v6538_v58  ;;  %v5766_v4 = vpop.eup %5765  ;;  %5791 = vpow2.f32 %v6572_v31  ;;  %v6710_v7 = vmul.f32 -1.442695, %v6659_v21  ;;  %v6713_v19 = vmul.f32 -1.442695, %v6637_v27  ;;  %v5675_v50 = vld [vmem:[%s8633_s3 + $0x58] sm:$0xff]  }
 0x111   : > { %v6717_v32 = vcombine.high %v6662_v5, %v6662_v5  ;;  %v5768_v58 = vpop.eup %5767  ;;  %v3131_v31 = vrot.slane %v2805_v14, %v6385_v36  ;;  %5793 = vrcp.f32 %v2534_v61  ;;  %v6727_v21 = vmul.f32 -1.442695, %v6677_v45  ;;  %v5677_v55 = vld [vmem:[%s8633_s3 + $0x18] sm:$0xff]   ;;  %5284 = vmatprep.subr.bf16.mxu1 %v5675_v50  ;;  %5351 = vmatpush3.bf16.msra.mxu0 %v5678_v39  ;;  %v5680_v50 = vld [vmem:[%s8633_s3 + $0xc8] sm:$0xff]  }
 0x112   : > { %v1921_v27 = vcombine.high %v1701_v60, %v1701_v60  ;;  %v5770_v15 = vpop.eup %5769  ;;  %5795 = vpow2.f32 %v6591_v40  ;;  %v6742_v14 = vmul.f32 -1.442695, %v6652_v9  ;;  %v6745_v61 = vmul.f32 -1.442695, %v6688_v23  ;;  %5285 = vmatpush3.bf16.msra.mxu1 %v5677_v55  ;;  %v5682_v55 = vld [vmem:[%s8633_s3 + $0x88] sm:$0xff]   ;;  %5352 = vmatprep.subr.bf16.mxu0 %v5680_v50 }
 0x113   : > { %v6748_v35 = vmul.f32 -1.442695, %v6662_v5  ;;  %v5772_v8 = vpop.eup %5771  ;;  %v6751_v45 = vmul.f32 %v5764_v63, %v6438_v3  ;;  %v6754_v10 = vmul.f32 %v5766_v4, %v6434_v2  ;;  %5797 = vpow2.f32 %v6597_v57  ;;  %v6760_v9 = vpop.f32.mrf.mxu0  ;;  %v5679_v57 = vld [vmem:[%s8633_s3 + $0x50] sm:$0xff]  }
 0x114   : > { %v6758_v40 = vrot.slane %v1701_v60, %v6385_v36  ;;  %v5774_v39 = vpop.eup %5773  ;;  %v2798_v5 = vmul.f32 %v5772_v8, %v6463_v17  ;;  %5799 = vpow2.f32 %v6612_v18  ;;  %v6768_v2 = vmul.f32 -1.442695, %v6717_v32  ;;  %v5681_v60 = vld [vmem:[%s8633_s3 + $0x10] sm:$0xff]   ;;  %5286 = vmatprep.subr.bf16.mxu1 %v5679_v57 }
 0x115   : > { %8758 = vst [vmem:[#allocation29_spill] sm:$0xff] %v6754_v10  ;;  %v6771_v3 = vrot.slane %v1921_v27, %v6385_v36  ;;  %v5776_v63 = vpop.eup %5775  ;;  %v3533_v17 = vsel %vm6736_vm7, %v3131_v31, 0.0  ;;  %v6782_v8 = vmul.f32 %v5768_v58, %v6454_v13  ;;  %5801 = vpow2.f32 %v6582_v49  ;;  %v6789_v27 = vpop.f32.mrf.mxu0  ;;  %5353 = vmatpush3.bf16.msra.mxu0 %v5682_v55 }
 0x116   : > { %v6787_v18 = vadd.f32 %v6594_v48, %v6403_v51  ;;  %v5778_v4 = vpop.eup %5777  ;;  %v2797_v46 = vmul.f32 %v5770_v15, %v6442_v6  ;;  %v2799_v31 = vmul.f32 %v5774_v39, %v6459_v16  ;;  %v2800_v13 = vmul.f32 %v5776_v63, %v6479_v25  ;;  %5287 = vmatpush3.bf16.msra.mxu1 %v5681_v60  ;;  %v5684_v25 = vld [vmem:[%s8633_s3 + $0xc0] sm:$0xff]   ;;  %v5685_v60 = vld [vmem:[%s8633_s3 + $0x8] sm:$0xff]  }
 0x117   : > { %8759 = vst [vmem:[#allocation30_spill] sm:$0xff] %v6782_v8  ;;  %5803 = vpow2.f32 %v6606_v0  ;;  %v5780_v58 = vpop.eup %5779  ;;  %v6801_v48 = vmul.f32 %v5778_v4, %v6471_v22  ;;  %v6806_v6 = vcombine.high %v6758_v40, %v6758_v40  ;;  %v6808_v16 = vpop.f32.mrf.mxu0  ;;  %vm2935_vm8 = vcmp.ge.s32.totalorder %v6569_v30, 0  ;;  %v5686_v39 = vld [vmem:[%s8633_s3 + $0x80] sm:$0xff]   ;;  %5354 = vmatprep.subr.bf16.mxu0 %v5684_v25  ;;  %v8776_v30 = vld [vmem:[#allocation4_spill] sm:$0xff] }
 0x118   : > { %5805 = vpow2.f32 %v6622_v43  ;;  %v5782_v0 = vpop.eup %5781  ;;  %v3091_v15 = vcombine.low %v2797_v46, %v2798_v5  ;;  %v3092_v50 = vcombine.low %v2799_v31, %v2800_v13  ;;  %v6817_v22 = vcombine.high %v6771_v3, %v6771_v3  ;;  %v5683_v43 = vld [vmem:[%s8633_s3 + $0x48] sm:$0xff]   ;;  %vm6899_vm9 = vmand %vm6694_vm6, %vm2935_vm8  ;;  %v8782_v8 = vld [vmem:[#allocation10_spill] sm:$0xff] }
 0x119   : > { %8760 = vst [vmem:[#allocation31_spill] sm:$0xff] %v6801_v48  ;;  %5807 = vpow2.f32 %v6625_v44  ;;  %v5784_v57 = vpop.eup %5783  ;;  %v6826_v55 = vmul.f32 %v5780_v58, %v6488_v29  ;;  %v6829_v5 = vmul.f32 %v5782_v0, %v6484_v28  ;;  %v6834_v63 = vpop.f32.mrf.mxu0  ;;  %v6839_v46 = vpack.c.bf16 %v3533_v17, %v3533_v17  ;;  %5288 = vmatprep.subr.bf16.mxu1 %v5683_v43  ;;  %vm5186_vm3 = vmpackc.low %vm6694_vm6, %vm6899_vm9 }
 0x11a   : > { %5809 = vpow2.f32 %v6644_v33  ;;  %v5786_v4 = vpop.eup %5785  ;;  %v6843_v28 = vmul.f32 -1.442695, %v6758_v40  ;;  %v1972_v29 = vcombine.high %v6787_v18, %v6787_v18  ;;  %5355 = vmatpush3.bf16.msra.mxu0 %v5686_v39  ;;  %v3106_v31 = vrot.slane %v3092_v50, %v6385_v36  ;;  %5289 = vmatpush3.bf16.msra.mxu1 %v5685_v60 }
 0x11b   : > { %8761 = vst [vmem:[#allocation32_spill] sm:$0xff] %v6826_v55  ;;  %8762 = vst [vmem:[#allocation33_spill] sm:$0xff] %v6829_v5  ;;  %5811 = vpow2.f32 %v6673_v26  ;;  %v5788_v33 = vpop.eup %5787  ;;  %v6850_v13 = vmul.f32 -1.442695, %v6806_v6  ;;  %v6853_v17 = vmul.f32 -1.442695, %v6771_v3  ;;  %v6855_v26 = vpop.f32.mrf.mxu0  ;;  %v3099_v25 = vrot.slane %v3091_v15, %v6385_v36 }
 0x11c   : > { %8763 = vst [vmem:[#allocation34_spill] sm:$0xff] %v6839_v46  ;;  %5813 = vpow2.f32 %v6649_v12  ;;  %v5790_v58 = vpop.eup %5789  ;;  %v2802_v0 = vmul.f32 %v5788_v33, %v6516_v42  ;;  %v6862_v50 = vrot.slane %v6787_v18, %v6385_v36  ;;  %v5687_v12 = vld [vmem:[%s8633_s3 + $0x40] sm:$0xff]   ;;  %v6870_v60 = vmul.f32 %v5784_v57, %v6507_v38 }
 0x11d   : > { %5815 = vpow2.f32 %v6684_v52  ;;  %v5792_v43 = vpop.eup %5791  ;;  %v6874_v42 = vmul.f32 -1.442695, %v6817_v22  ;;  %v6876_v52 = vpop.f32.mrf.mxu0  ;;  %v5688_v18 = vld [vmem:[%s8633_s3] sm:$0xff]   ;;  %v2801_v33 = vmul.f32 %v5786_v4, %v6496_v34  ;;  %v6884_v38 = vrot.slane %v1972_v29, %v6385_v36  ;;  %5290 = vmatprep.subr.bf16.mxu1 %v5687_v12 }
 0x11e   : > { %5817 = vpow2.f32 %v6699_v11  ;;  %v5794_v15 = vpop.eup %5793  ;;  %v2551_v44 = vadd.f32 1.0, %v5792_v43  ;;  %v6886_v57 = vcombine.low %v3099_v25, %v3106_v31  ;;  %v2803_v39 = vmul.f32 %v5790_v58, %v6512_v41  ;;  %5291 = vmatpush3.bf16.msra.mxu1 %v5688_v18 }
 0x11f   : > { %5819 = vpow2.f32 %v6710_v7  ;;  %v5796_v11 = vpop.eup %5795  ;;  %v2804_v49 = vmul.f32 %v5794_v15, %v6533_v56  ;;  %v5577_v46 = vpop.f32.mrf.mxu0  ;;  %v3108_v34 = vcombine.low %v2801_v33, %v2802_v0  ;;  %v6893_v7 = vcombine.high %v6862_v50, %v6862_v50 }
 0x120   : > { %8764 = vst [vmem:[#allocation35_spill] sm:$0xff] %v6886_v57  ;;  %5821 = vpow2.f32 %v6713_v19  ;;  %v5798_v5 = vpop.eup %5797  ;;  %v2552_v4 = vadd.f32 1.0, %v5796_v11  ;;  %v8765_v41 = vmov 0  ;;  %v6908_v58 = vcombine.high %v6884_v38, %v6884_v38 }
 0x121   : > { %5823 = vrcp.f32 %v2551_v44  ;;  %v5800_v29 = vpop.eup %5799  ;;  %v8766_v41 = vsel %vm6899_vm9, 4294967295, %v8765_v41  ;;  %v3109_v56 = vcombine.low %v2803_v39, %v2804_v49  ;;  %v2553_v19 = vadd.f32 1.0, %v5798_v5 }
 0x122   : > { %8767 = vst [vmem:[#allocation36_spill] sm:$0xff] %v8766_v41  ;;  %5825 = vpow2.f32 %v6727_v21  ;;  %v1704_v44 = vadd.f32 %v6609_v47, %v6410_v53  ;;  %v5802_v46 = vpop.eup %5801  ;;  %v2554_v31 = vadd.f32 1.0, %v5800_v29  ;;  %v1725_v25 = vadd.f32 %v6630_v62, %v6566_v24 }
 0x123   : > { %5827 = vrcp.f32 %v2552_v4  ;;  %v2543_v12 = vadd.f32 1.0, %v5802_v46  ;;  %v6913_v49 = vmul.f32 -1.442695, %v6862_v50  ;;  %v3123_v43 = vrot.slane %v3109_v56, %v6385_v36 }
 0x124   : > { %v5804_v0 = vpop.eup %5803  ;;  %5829 = vrcp.f32 %v2553_v19  ;;  %v1938_v21 = vcombine.high %v1704_v44, %v1704_v44  ;;  %v3116_v15 = vrot.slane %v3108_v34, %v6385_v36  ;;  %v6921_v62 = vrot.slane %v1704_v44, %v6385_v36 }
 0x125   : > { %v5806_v5 = vpop.eup %5805  ;;  %5831 = vrcp.f32 %v2554_v31  ;;  %v2544_v39 = vadd.f32 1.0, %v5804_v0  ;;  %v2023_v4 = vcombine.high %v1725_v25, %v1725_v25  ;;  %v1717_v29 = vadd.f32 %v6646_v37, %v6421_v59 }
 0x126   : > { %v5808_v18 = vpop.eup %5807  ;;  %v2545_v24 = vadd.f32 1.0, %v5806_v5  ;;  %5833 = vrcp.f32 %v2543_v12  ;;  %v6926_v46 = vmul.f32 -1.442695, %v6893_v7  ;;  %v6929_v34 = vrot.slane %v1938_v21, %v6385_v36 }
 0x127   : > { %v5810_v33 = vpop.eup %5809  ;;  %v2546_v11 = vadd.f32 1.0, %v5808_v18  ;;  %5835 = vrcp.f32 %v2544_v39  ;;  %v6931_v0 = vcombine.low %v3116_v15, %v3123_v43  ;;  %v6934_v12 = vmul.f32 -1.442695, %v6884_v38 }
 0x128   : > { %v5812_v19 = vpop.eup %5811  ;;  %5837 = vrcp.f32 %v2545_v24  ;;  %v2555_v56 = vadd.f32 1.0, %v5810_v33  ;;  %v6938_v37 = vcombine.high %v6921_v62, %v6921_v62  ;;  %v6941_v18 = vrot.slane %v1725_v25, %v6385_v36 }
 0x129   : > { %v5814_v31 = vpop.eup %5813  ;;  %8768 = vst [vmem:[#allocation37_spill] sm:$0xff] %v6931_v0  ;;  %5839 = vrcp.f32 %v2546_v11  ;;  %v2556_v44 = vadd.f32 1.0, %v5812_v19  ;;  %v6944_v43 = vrot.slane %v2023_v4, %v6385_v36  ;;  %v1989_v15 = vcombine.high %v1717_v29, %v1717_v29 }
 0x12a   : > { %v5816_v5 = vpop.eup %5815  ;;  %v2557_v39 = vadd.f32 1.0, %v5814_v31  ;;  %5841 = vrcp.f32 %v2555_v56  ;;  %8769 = vst [vmem:[#allocation38_spill] sm:$0xff] %v6941_v18  ;;  %v6947_v19 = vmul.f32 -1.442695, %v6908_v58  ;;  %v6951_v56 = vcombine.high %v6929_v34, %v6929_v34 }
 0x12b   : > { %v5818_v21 = vpop.eup %5817  ;;  %v2558_v24 = vadd.f32 1.0, %v5816_v5  ;;  %5843 = vrcp.f32 %v2556_v44  ;;  %8770 = vst [vmem:[#allocation39_spill] sm:$0xff] %v6944_v43  ;;  %v6957_v4 = vmul.f32 -1.442695, %v6921_v62  ;;  %v6964_v47 = vcombine.high %v6941_v18, %v6941_v18 }
 0x12c   : > { %v5820_v33 = vpop.eup %5819  ;;  %5845 = vrcp.f32 %v2557_v39  ;;  %v2547_v11 = vadd.f32 1.0, %v5818_v21  ;;  %8771 = vst [vmem:[#allocation40_spill] sm:$0xff] %v6951_v56  ;;  %v6960_v21 = vmul.f32 -1.442695, %v6938_v37  ;;  %v6968_v25 = vcombine.high %v6944_v43, %v6944_v43 }
 0x12d   : > { %v5822_v31 = vpop.eup %5821  ;;  %5847 = vrcp.f32 %v2558_v24  ;;  %v2548_v44 = vadd.f32 1.0, %v5820_v33  ;;  %8772 = vst [vmem:[#allocation41_spill] sm:$0xff] %v6964_v47  ;;  %v6971_v24 = vrot.slane %v1717_v29, %v6385_v36  ;;  %v6974_v33 = vrot.slane %v1989_v15, %v6385_v36 }
 0x12e   : > { %v5824_v5 = vpop.eup %5823  ;;  %v2549_v39 = vadd.f32 1.0, %v5822_v31  ;;  %5849 = vrcp.f32 %v2547_v11  ;;  %8773 = vst [vmem:[#allocation42_spill] sm:$0xff] %v6968_v25  ;;  %v6977_v0 = vmul.f32 -1.442695, %v6929_v34  ;;  %v6980_v54 = vmul.f32 -1.442695, %v6951_v56 }
 0x12f   : > { %v5826_v59 = vpop.eup %5825  ;;  %5851 = vrcp.f32 %v2548_v44  ;;  %8774 = vst [vmem:[#allocation43_spill] sm:$0xff] %v6971_v24  ;;  %8775 = vst [vmem:[#allocation44_spill] sm:$0xff] %v6974_v33  ;;  %v6985_v29 = vmul.f32 -1.442695, %v6941_v18  ;;  %v6988_v15 = vmul.f32 -1.442695, %v6944_v43 }
 0x130   : > { %v5828_v11 = vpop.eup %5827  ;;  %v2550_v31 = vadd.f32 1.0, %v5826_v59  ;;  %5853 = vrcp.f32 %v2549_v39  ;;  %v2821_v59 = vmul.f32 %v5824_v5, %v6545_v1  ;;  %v6992_v39 = vmul.f32 -1.442695, %v6964_v47  ;;  %v8777_v56 = vld [vmem:[#allocation25_spill] sm:$0xff] }
 0x131   : > { %v5830_v44 = vpop.eup %5829  ;;  %v2822_v57 = vmul.f32 %v5828_v11, %v6561_v20  ;;  %5855 = vpow2.f32 %v6742_v14  ;;  %v1728_v55 = vadd.f32 %v8777_v56, %v8776_v30  ;;  %v6998_v20 = vmul.f32 -1.442695, %v6968_v25  ;;  %v8780_v11 = vld [vmem:[#allocation9_spill] sm:$0xff] }
 0x132   : > { %v5832_v41 = vpop.eup %5831  ;;  %5857 = vrcp.f32 %v2550_v31  ;;  %v7002_v14 = vcombine.high %v6971_v24, %v6971_v24  ;;  %v7006_v1 = vcombine.high %v6974_v33, %v6974_v33  ;;  %v7011_v30 = vmul.f32 -1.442695, %v6971_v24 }
 0x133   : > { %v5834_v48 = vpop.eup %5833  ;;  %5859 = vpow2.f32 %v6745_v61  ;;  %v2040_v61 = vcombine.high %v1728_v55, %v1728_v55  ;;  %v3191_v43 = vcombine.low %v2821_v59, %v2822_v57  ;;  %v7015_v25 = vmul.f32 -1.442695, %v6974_v33  ;;  %v8787_v59 = vld [vmem:[#allocation5_spill] sm:$0xff] }
 0x134   : > { %8778 = vst [vmem:[#allocation4_spill] sm:$0xff] %v7002_v14  ;;  %8779 = vst [vmem:[#allocation25_spill] sm:$0xff] %v7006_v1  ;;  %v5836_v5 = vpop.eup %5835  ;;  %v2813_v31 = vmul.f32 %v5834_v48, %v8780_v11  ;;  %5861 = vpow2.f32 %v6748_v35  ;;  %v7018_v47 = vrot.slane %v1728_v55, %v6385_v36  ;;  %v7021_v10 = vmul.f32 %v5830_v44, %v8782_v8  ;;  %v8784_v48 = vld [vmem:[#allocation14_spill] sm:$0xff]  ;;  %v8788_v8 = vld [vmem:[#allocation28_spill] sm:$0xff] }
 0x135   : > { %v5838_v56 = vpop.eup %5837  ;;  %5863 = vpow2.f32 %v6768_v2  ;;  %v7024_v35 = vmul.f32 %v5832_v41, %v8784_v48  ;;  %v7028_v11 = vrot.slane %v2040_v61, %v6385_v36  ;;  %v7032_v2 = vmul.f32 -1.442695, %v7002_v14  ;;  %v8789_v41 = vld [vmem:[#allocation15_spill] sm:$0xff]  ;;  %v8790_v61 = vld [vmem:[#allocation16_spill] sm:$0xff] }
 0x136   : > { %8781 = vst [vmem:[#allocation9_spill] sm:$0xff] %v7018_v47  ;;  %v5840_v18 = vpop.eup %5839  ;;  %8783 = vst [vmem:[#allocation10_spill] sm:$0xff] %v7021_v10  ;;  %5865 = vpow2.f32 %v6843_v28  ;;  %v7035_v55 = vmul.f32 -1.442695, %v7006_v1  ;;  %v1720_v44 = vadd.f32 %v8788_v8, %v8787_v59  ;;  %v3150_v28 = vcombine.low %v6870_v60, %v2813_v31  ;;  %v8793_v59 = vld [vmem:[#allocation13_spill] sm:$0xff]  ;;  %v8796_v31 = vld [vmem:[#allocation12_spill] sm:$0xff] }
 0x137   : > { %8785 = vst [vmem:[#allocation14_spill] sm:$0xff] %v7024_v35  ;;  %8786 = vst [vmem:[#allocation45_spill] sm:$0xff] %v7028_v11  ;;  %v5842_v57 = vpop.eup %5841  ;;  %5867 = vpow2.f32 %v6850_v13  ;;  %v7040_v48 = vmul.f32 %v5840_v18, %v8789_v41  ;;  %v5689_v13 = vld [vmem:[%s8633_s3 + $0x178] sm:$0xff]   ;;  %v7051_v14 = vrot.slane %v3191_v43, %v6385_v36  ;;  %v7054_v8 = vmul.f32 %v5836_v5, %v8793_v59  ;;  %v8798_v41 = vld [vmem:[#allocation19_spill] sm:$0xff] }
 0x138   : > { %v5844_v10 = vpop.eup %5843  ;;  %v7044_v33 = vmul.f32 %v5842_v57, %v8790_v61  ;;  %5869 = vpow2.f32 %v6853_v17  ;;  %v7059_v60 = vcombine.high %v7018_v47, %v7018_v47  ;;  %v7062_v17 = vmul.f32 %v5838_v56, %v8796_v31  ;;  %5404 = vmatprep.subr.bf16.mxu1 %v5689_v13  ;;  %v8800_v56 = vld [vmem:[#allocation17_spill] sm:$0xff] }
 0x139   : > { %v5846_v1 = vpop.eup %5845  ;;  %8792 = vst [vmem:[#allocation28_spill] sm:$0xff] %v7051_v14  ;;  %8794 = vst [vmem:[#allocation15_spill] sm:$0xff] %v7054_v8  ;;  %5871 = vpow2.f32 %v6874_v42  ;;  %v7069_v43 = vcombine.high %v7028_v11, %v7028_v11  ;;  %v5697_v42 = vld [vmem:[%s8633_s3 + $0x1f8] sm:$0xff]   ;;  %v7075_v61 = vmul.f32 %v5844_v10, %v8798_v41  ;;  %v2006_v31 = vcombine.high %v1720_v44, %v1720_v44 }
 0x13a   : > { %8791 = vst [vmem:[#allocation5_spill] sm:$0xff] %v7044_v33  ;;  %8795 = vst [vmem:[#allocation16_spill] sm:$0xff] %v7059_v60  ;;  %v5848_v18 = vpop.eup %5847  ;;  %5873 = vpow2.f32 %v6913_v49  ;;  %v7078_v59 = vmul.f32 %v5846_v1, %v8800_v56  ;;  %v7082_v57 = vrot.slane %v3150_v28, %v6385_v36  ;;  %v7088_v33 = vmul.f32 -1.442695, %v7018_v47  ;;  %5468 = vmatprep.subr.bf16.mxu0 %v5697_v42  ;;  %v8803_v56 = vld [vmem:[#allocation21_spill] sm:$0xff] }
 0x13b   : > { %8797 = vst [vmem:[#allocation13_spill] sm:$0xff] %v7069_v43  ;;  %v5850_v5 = vpop.eup %5849  ;;  %8799 = vst [vmem:[#allocation12_spill] sm:$0xff] %v7075_v61  ;;  %5875 = vpow2.f32 %v6926_v46  ;;  %v7092_v1 = vmul.f32 -1.442695, %v7059_v60  ;;  %v7095_v46 = vmul.f32 -1.442695, %v7028_v11  ;;  %v7098_v28 = vrot.slane %v1720_v44, %v6385_v36 }
 0x13c   : > { %8801 = vst [vmem:[#allocation19_spill] sm:$0xff] %v7078_v59  ;;  %v5852_v49 = vpop.eup %5851  ;;  %5877 = vpow2.f32 %v6934_v12  ;;  %v7101_v13 = vmul.f32 %v5848_v18, %v8803_v56  ;;  %v7105_v12 = vrot.slane %v2006_v31, %v6385_v36  ;;  %v7113_v44 = vmul.f32 -1.442695, %v7069_v43  ;;  %v8805_v56 = vld [vmem:[#allocation18_spill] sm:$0xff]  ;;  %v8807_v60 = vld [vmem:[#allocation20_spill] sm:$0xff] }
 0x13d   : > { %v5854_v10 = vpop.eup %5853  ;;  %5879 = vpow2.f32 %v6947_v19  ;;  %8802 = vst [vmem:[#allocation17_spill] sm:$0xff] %v7098_v28  ;;  %v1741_v19 = vadd.f32 %v6760_v9, %v6410_v53  ;;  %v7116_v47 = vmul.f32 %v5850_v5, %v8805_v56  ;;  %v8812_v59 = vld [vmem:[#allocation26_spill] sm:$0xff] }
 0x13e   : > { %v5856_v41 = vpop.eup %5855  ;;  %5881 = vpow2.f32 %v6957_v4  ;;  %8804 = vst [vmem:[#allocation21_spill] sm:$0xff] %v7105_v12  ;;  %v8806_v4 = vld [vmem:[#allocation23_spill] sm:$0xff]  ;;  %v7122_v24 = vmul.f32 %v5854_v10, %v8807_v60  ;;  %v7135_v60 = vcombine.high %v7105_v12, %v7105_v12 }
 0x13f   : > { %v5858_v42 = vpop.eup %5857  ;;  %v2567_v11 = vadd.f32 1.0, %v5856_v41  ;;  %5883 = vpow2.f32 %v6960_v21  ;;  %v7119_v31 = vmul.f32 %v5852_v49, %v8806_v4  ;;  %v7127_v21 = vcombine.high %v7098_v28, %v7098_v28 }
 0x140   : > { %v5860_v18 = vpop.eup %5859  ;;  %5885 = vpow2.f32 %v6977_v0  ;;  %v7130_v41 = vmul.f32 -1.442695, %v7098_v28  ;;  %8809 = vst [vmem:[#allocation23_spill] sm:$0xff] %v7135_v60  ;;  %v2091_v49 = vcombine.high %v1741_v19, %v1741_v19  ;;  %v7143_v61 = vmul.f32 %v5858_v42, %v8812_v59 }
 0x141   : > { %v5862_v9 = vpop.eup %5861  ;;  %v2568_v35 = vadd.f32 1.0, %v5860_v18  ;;  %5887 = vrcp.f32 %v2567_v11  ;;  %8808 = vst [vmem:[#allocation18_spill] sm:$0xff] %v7127_v21  ;;  %v7138_v11 = vrot.slane %v1741_v19, %v6385_v36  ;;  %v8811_v18 = vld [vmem:[#allocation6_spill] sm:$0xff]  ;;  %v7151_v19 = vmul.f32 -1.442695, %v7105_v12 }
 0x142   : > { %v5864_v5 = vpop.eup %5863  ;;  %v2569_v56 = vadd.f32 1.0, %v5862_v9  ;;  %5889 = vpow2.f32 %v6980_v54  ;;  %v1733_v4 = vadd.f32 %v6789_v27, %v8811_v18  ;;  %v7154_v59 = vrot.slane %v2091_v49, %v6385_v36 }
 0x143   : > { %v5866_v0 = vpop.eup %5865  ;;  %v2570_v10 = vadd.f32 1.0, %v5864_v5  ;;  %5891 = vrcp.f32 %v2568_v35  ;;  %8810 = vst [vmem:[#allocation20_spill] sm:$0xff] %v7138_v11  ;;  %v7148_v35 = vmul.f32 -1.442695, %v7127_v21  ;;  %v1744_v49 = vadd.f32 %v6808_v16, %v6410_v53 }
 0x144   : > { %v5868_v43 = vpop.eup %5867  ;;  %5893 = vrcp.f32 %v2569_v56  ;;  %v2559_v9 = vadd.f32 1.0, %v5866_v0  ;;  %8813 = vst [vmem:[#allocation6_spill] sm:$0xff] %v7154_v59  ;;  %v2057_v42 = vcombine.high %v1733_v4, %v1733_v4  ;;  %v7157_v56 = vmul.f32 -1.442695, %v7135_v60 }
 0x145   : > { %v5870_v28 = vpop.eup %5869  ;;  %5895 = vrcp.f32 %v2570_v10  ;;  %v2560_v8 = vadd.f32 1.0, %v5868_v43  ;;  %v7161_v43 = vcombine.high %v7138_v11, %v7138_v11  ;;  %v7171_v21 = vmul.f32 -1.442695, %v7138_v11 }
 0x146   : > { %v5872_v5 = vpop.eup %5871  ;;  %v2561_v27 = vadd.f32 1.0, %v5870_v28  ;;  %5897 = vrcp.f32 %v2559_v9  ;;  %v7164_v28 = vrot.slane %v1733_v4, %v6385_v36  ;;  %v7178_v4 = vrot.slane %v2057_v42, %v6385_v36 }
 0x147   : > { %v5874_v14 = vpop.eup %5873  ;;  %v2562_v54 = vadd.f32 1.0, %v5872_v5  ;;  %5899 = vrcp.f32 %v2560_v8  ;;  %8814 = vst [vmem:[#allocation26_spill] sm:$0xff] %v7161_v43 }
 0x148   : > { %v5876_v0 = vpop.eup %5875  ;;  %5901 = vrcp.f32 %v2561_v27  ;;  %v2571_v10 = vadd.f32 1.0, %v5874_v14  ;;  %8815 = vst [vmem:[#allocation46_spill] sm:$0xff] %v7164_v28  ;;  %v7175_v14 = vcombine.high %v7154_v59, %v7154_v59  ;;  %8817 = vst [vmem:[#allocation48_spill] sm:$0xff] %v7178_v4  ;;  %v7181_v27 = vmul.f32 -1.442695, %v7154_v59 }
 0x149   : > { %v5878_v9 = vpop.eup %5877  ;;  %5903 = vrcp.f32 %v2562_v54  ;;  %v2572_v5 = vadd.f32 1.0, %v5876_v0  ;;  %v2108_v54 = vcombine.high %v1744_v49, %v1744_v49 }
 0x14a   : > { %v5880_v12 = vpop.eup %5879  ;;  %v2573_v60 = vadd.f32 1.0, %v5878_v9  ;;  %5905 = vrcp.f32 %v2571_v10  ;;  %8816 = vst [vmem:[#allocation47_spill] sm:$0xff] %v7175_v14  ;;  %8818 = vst [vmem:[#allocation49_spill] sm:$0xff] %v7181_v27  ;;  %v7184_v9 = vmul.f32 -1.442695, %v7161_v43  ;;  %v7188_v10 = vcombine.high %v7164_v28, %v7164_v28 }
 0x14b   : > { %v5882_v53 = vpop.eup %5881  ;;  %v2574_v16 = vadd.f32 1.0, %v5880_v12  ;;  %5907 = vrcp.f32 %v2572_v5  ;;  %v7191_v12 = vrot.slane %v1744_v49, %v6385_v36  ;;  %v1736_v5 = vadd.f32 %v6834_v63, %v8811_v18 }
 0x14c   : > { %v5884_v0 = vpop.eup %5883  ;;  %5909 = vrcp.f32 %v2573_v60  ;;  %v2563_v8 = vadd.f32 1.0, %v5882_v53  ;;  %8819 = vst [vmem:[#allocation50_spill] sm:$0xff] %v7188_v10  ;;  %v7196_v60 = vmul.f32 -1.442695, %v7175_v14  ;;  %v7200_v53 = vcombine.high %v7178_v4, %v7178_v4 }
 0x14d   : > { %v5886_v11 = vpop.eup %5885  ;;  %5911 = vrcp.f32 %v2574_v16  ;;  %v2564_v42 = vadd.f32 1.0, %v5884_v0  ;;  %8820 = vst [vmem:[#allocation51_spill] sm:$0xff] %v7191_v12  ;;  %v7203_v16 = vmul.f32 -1.442695, %v7164_v28  ;;  %v7206_v49 = vmul.f32 -1.442695, %v7178_v4 }
 0x14e   : > { %v5888_v59 = vpop.eup %5887  ;;  %v2565_v27 = vadd.f32 1.0, %v5886_v11  ;;  %5913 = vrcp.f32 %v2563_v8  ;;  %8821 = vst [vmem:[#allocation52_spill] sm:$0xff] %v7196_v60  ;;  %8822 = vst [vmem:[#allocation53_spill] sm:$0xff] %v7200_v53  ;;  %v7209_v63 = vrot.slane %v2108_v54, %v6385_v36  ;;  %v7212_v8 = vmul.f32 -1.442695, %v7188_v10  ;;  %v8826_v28 = vld [vmem:[#allocation22_spill] sm:$0xff] }
 0x14f   : > { %v5890_v43 = vpop.eup %5889  ;;  %5915 = vrcp.f32 %v2564_v42  ;;  %v2074_v0 = vcombine.high %v1736_v5, %v1736_v5  ;;  %v7218_v42 = vcombine.high %v7191_v12, %v7191_v12  ;;  %v7221_v4 = vrot.slane %v1736_v5, %v6385_v36 }
 0x150   : > { %8823 = vst [vmem:[#allocation54_spill] sm:$0xff] %v7209_v63  ;;  %v5892_v11 = vpop.eup %5891  ;;  %v2566_v18 = vadd.f32 1.0, %v5890_v43  ;;  %5917 = vrcp.f32 %v2565_v27  ;;  %v2837_v43 = vmul.f32 %v5888_v59, %v8826_v28  ;;  %v7225_v27 = vmul.f32 -1.442695, %v7200_v53 }
 0x151   : > { %v5894_v14 = vpop.eup %5893  ;;  %v2838_v60 = vmul.f32 %v5892_v11, %v6688_v23  ;;  %5919 = vpow2.f32 %v6985_v29  ;;  %8824 = vst [vmem:[#allocation55_spill] sm:$0xff] %v7218_v42  ;;  %8825 = vst [vmem:[#allocation56_spill] sm:$0xff] %v7221_v4  ;;  %v7228_v10 = vrot.slane %v2074_v0, %v6385_v36  ;;  %v7236_v5 = vcombine.high %v7209_v63, %v7209_v63 }
 0x152   : > { %v5896_v54 = vpop.eup %5895  ;;  %5921 = vrcp.f32 %v2566_v18  ;;  %v7239_v11 = vmul.f32 -1.442695, %v7191_v12  ;;  %v7244_v0 = vmul.f32 -1.442695, %v7209_v63  ;;  %v7255_v12 = vcombine.high %v7221_v4, %v7221_v4 }
 0x153   : > { %8827 = vst [vmem:[#allocation22_spill] sm:$0xff] %v7228_v10  ;;  %v5898_v23 = vpop.eup %5897  ;;  %v7231_v29 = vmul.f32 %v5896_v54, %v6717_v32  ;;  %5923 = vpow2.f32 %v6992_v39  ;;  %8828 = vst [vmem:[#allocation57_spill] sm:$0xff] %v7236_v5  ;;  %v3272_v28 = vcombine.low %v2837_v43, %v2838_v60  ;;  %v8829_v54 = vld [vmem:[#allocation24_spill] sm:$0xff]  ;;  %v7251_v39 = vmul.f32 -1.442695, %v7218_v42 }
 0x154   : > { %v5900_v59 = vpop.eup %5899  ;;  %v2829_v18 = vmul.f32 %v5898_v23, %v6758_v40  ;;  %5925 = vpow2.f32 %v6988_v15  ;;  %v7247_v53 = vmul.f32 %v5894_v14, %v8829_v54  ;;  %8830 = vst [vmem:[#allocation24_spill] sm:$0xff] %v7255_v12  ;;  %v7261_v15 = vcombine.high %v7228_v10, %v7228_v10  ;;  %v8832_v14 = vld [vmem:[#allocation2_spill] sm:$0xff] }
 0x155   : > { %v5902_v32 = vpop.eup %5901  ;;  %5927 = vpow2.f32 %v6998_v20  ;;  %v1757_v43 = vadd.f32 %v6855_v26, %v8832_v14  ;;  %v7269_v54 = vmul.f32 -1.442695, %v7236_v5  ;;  %v7278_v63 = vmul.f32 %v5900_v59, %v6806_v6 }
 0x156   : > { %v5904_v60 = vpop.eup %5903  ;;  %v3231_v40 = vcombine.low %v7101_v13, %v2829_v18  ;;  %5929 = vpow2.f32 %v7011_v30  ;;  %8831 = vst [vmem:[#allocation58_spill] sm:$0xff] %v7261_v15  ;;  %v7272_v13 = vmul.f32 -1.442695, %v7221_v4  ;;  %v7275_v18 = vrot.slane %v3272_v28, %v6385_v36 }
 0x157   : > { %v5906_v20 = vpop.eup %5905  ;;  %5931 = vpow2.f32 %v7032_v2  ;;  %v7281_v26 = vmul.f32 %v5902_v32, %v6771_v3  ;;  %v7285_v2 = vmul.f32 %v5904_v60, %v6817_v22  ;;  %v7292_v28 = vmul.f32 -1.442695, %v7255_v12 }
 0x158   : > { %v5908_v30 = vpop.eup %5907  ;;  %8833 = vst [vmem:[#allocation2_spill] sm:$0xff] %v7275_v18  ;;  %5933 = vpow2.f32 %v7015_v25  ;;  %v7288_v23 = vmul.f32 %v5906_v20, %v6862_v50  ;;  %v7296_v3 = vmul.f32 -1.442695, %v7228_v10  ;;  %v7299_v6 = vmul.f32 -1.442695, %v7261_v15 }
 0x159   : > { %v5910_v14 = vpop.eup %5909  ;;  %8834 = vst [vmem:[#allocation59_spill] sm:$0xff] %v7285_v2  ;;  %5935 = vpow2.f32 %v7035_v55  ;;  %v7302_v22 = vrot.slane %v1757_v43, %v6385_v36  ;;  %v7305_v50 = vmul.f32 %v5908_v30, %v6893_v7  ;;  %v7316_v60 = vrot.slane %v3231_v40, %v6385_v36 }
 0x15a   : > { %8835 = vst [vmem:[#allocation60_spill] sm:$0xff] %v7288_v23  ;;  %v5912_v5 = vpop.eup %5911  ;;  %5937 = vpow2.f32 %v7088_v33  ;;  %v7308_v55 = vmul.f32 %v5910_v14, %v6884_v38  ;;  %v1749_v33 = vadd.f32 %v6876_v52, %v6403_v51  ;;  %v8840_v52 = vld [vmem:[#allocation7_spill] sm:$0xff] }
 0x15b   : > { %8836 = vst [vmem:[#allocation61_spill] sm:$0xff] %v7302_v22  ;;  %v5914_v25 = vpop.eup %5913  ;;  %8837 = vst [vmem:[#allocation62_spill] sm:$0xff] %v7305_v50  ;;  %5939 = vpow2.f32 %v7092_v1  ;;  %v7321_v7 = vcombine.high %v7302_v22, %v7302_v22  ;;  %v2889_v43 = vadd.s32 1, %v8840_v52  ;;  %v7331_v40 = vmul.f32 %v5912_v5, %v6908_v58  ;;  %v8864_v50 = vld [vmem:[#allocation34_spill] sm:$0xff] }
 0x15c   : > { %8838 = vst [vmem:[#allocation63_spill] sm:$0xff] %v7308_v55  ;;  %v5916_v59 = vpop.eup %5915  ;;  %5941 = vpow2.f32 %v7095_v46  ;;  %v2125_v51 = vcombine.high %v1749_v33, %v1749_v33  ;;  %v7335_v46 = vmul.f32 -1.442695, %v7302_v22 }
 0x15d   : > { %8839 = vst [vmem:[#allocation64_spill] sm:$0xff] %v7321_v7  ;;  %v5918_v38 = vpop.eup %5917  ;;  %5943 = vpow2.f32 %v7113_v44  ;;  %v7328_v30 = vmul.f32 %v5916_v59, %v6938_v37  ;;  %v7340_v44 = vmul.f32 %v5914_v25, %v6921_v62  ;;  %v7348_v58 = vmul.f32 -1.442695, %v7321_v7 }
 0x15e   : > { %v5920_v20 = vpop.eup %5919  ;;  %5945 = vpow2.f32 %v7130_v41  ;;  %8841 = vst [vmem:[#allocation7_spill] sm:$0xff] %v7335_v46  ;;  %v7344_v59 = vmul.f32 %v5918_v38, %v6929_v34  ;;  %v7351_v41 = vrot.slane %v1749_v33, %v6385_v36  ;;  %v7354_v62 = vrot.slane %v2125_v51, %v6385_v36  ;;  %v8849_v34 = vld [vmem:[#allocation31_spill] sm:$0xff] }
 0x15f   : > { %v5922_v14 = vpop.eup %5921  ;;  %v2583_v32 = vadd.f32 1.0, %v5920_v20  ;;  %5947 = vpow2.f32 %v7148_v35  ;;  %8842 = vst [vmem:[#allocation65_spill] sm:$0xff] %v7348_v58  ;;  %vm2906_vm10 = vcmp.ge.s32.totalorder %v2889_v43, 0  ;;  %vm2916_vm11 = vcmp.lt.s32.totalorder %v2889_v43, 16  ;;  %v8852_v43 = vld [vmem:[#allocation33_spill] sm:$0xff] }
 0x160   : > { %v5924_v37 = vpop.eup %5923  ;;  %5949 = vpow2.f32 %v7151_v19  ;;  %8843 = vst [vmem:[#allocation66_spill] sm:$0xff] %v7354_v62  ;;  %v7361_v19 = vcombine.high %v7351_v41, %v7351_v41  ;;  %vm7367_vm12 = vmand %vm2906_vm10, %vm2916_vm11  ;;  %v3704_v58 = vrot.slane %v8864_v50, 1 }
 0x161   : > { %v5926_v5 = vpop.eup %5925  ;;  %v2584_v1 = vadd.f32 1.0, %v5924_v37  ;;  %5951 = vrcp.f32 %v2583_v32  ;;  %v8844_v32 = vld [vmem:[#allocation29_spill] sm:$0xff]  ;;  %vm7386_vm13 = vmand %vm7367_vm12, %vm2935_vm8 }
 0x162   : > { %v5928_v35 = vpop.eup %5927  ;;  %v2585_v25 = vadd.f32 1.0, %v5926_v5  ;;  %5953 = vpow2.f32 %v7157_v56  ;;  %v8845_v51 = vcombine.low %v6751_v45, %v8844_v32  ;;  %v8848_v56 = vld [vmem:[#allocation30_spill] sm:$0xff]  ;;  %v8854_v45 = vld [vmem:[#allocation40_spill] sm:$0xff]  ;;  %vm5189_vm14 = vmpackc.low %vm7367_vm12, %vm7386_vm13 }
 0x163   : > { %v5930_v33 = vpop.eup %5929  ;;  %v2586_v38 = vadd.f32 1.0, %v5928_v35  ;;  %5955 = vrcp.f32 %v2584_v1  ;;  %v8850_v7 = vcombine.low %v8848_v56, %v8849_v34  ;;  %v8851_v1 = vld [vmem:[#allocation32_spill] sm:$0xff]  ;;  %v7380_v32 = vmul.f32 %v5922_v14, %v8854_v45  ;;  %v8859_v34 = vld [vmem:[#allocation35_spill] sm:$0xff]  ;;  %vm7488_vm10 = vmand %vm7367_vm12, %vm2970_vm5 }
 0x164   : > { %v3140_v20 = vrot.slane %v8845_v51, %v6385_v36  ;;  %v5932_v37 = vpop.eup %5931  ;;  %5957 = vrcp.f32 %v2585_v25  ;;  %v2575_v22 = vadd.f32 1.0, %v5930_v33  ;;  %v8853_v35 = vcombine.low %v8851_v1, %v8852_v43  ;;  %v8862_v43 = vld [vmem:[#allocation37_spill] sm:$0xff]  ;;  %v5692_v1 = vld [vmem:[%s8633_s3 + $0x130] sm:$0xff]  }
 0x165   : > { %v3147_v15 = vrot.slane %v8850_v7, %v6385_v36  ;;  %v5934_v12 = vpop.eup %5933  ;;  %5959 = vrcp.f32 %v2586_v38  ;;  %v2576_v25 = vadd.f32 1.0, %v5932_v37  ;;  %v8860_v56 = vsel %vm6899_vm9, %v8859_v34, 0.0  ;;  %v5701_v51 = vld [vmem:[%s8633_s3 + $0x118] sm:$0xff]  }
 0x166   : > { %v3157_v10 = vrot.slane %v8853_v35, %v6385_v36  ;;  %v8863_v35 = vsel %vm6694_vm6, %v8862_v43, 0.0  ;;  %v5936_v45 = vpop.eup %5935  ;;  %v2577_v38 = vadd.f32 1.0, %v5934_v12  ;;  %5961 = vrcp.f32 %v2575_v22 }
 0x167   : > { %v3561_v14 = vpack.c.bf16 %v8863_v35, %v8860_v56  ;;  %v3148_v37 = vcombine.low %v3140_v20, %v3147_v15  ;;  %v5938_v23 = vpop.eup %5937  ;;  %v2578_v4 = vadd.f32 1.0, %v5936_v45  ;;  %5963 = vrcp.f32 %v2576_v25  ;;  %v5700_v35 = vld [vmem:[%s8633_s3 + $0x1f0] sm:$0xff]  }
 0x168   : > { %v3165_v42 = vcombine.low %v3157_v10, %v7082_v57  ;;  %v5940_v46 = vpop.eup %5939  ;;  %5965 = vrcp.f32 %v2577_v38  ;;  %v2587_v18 = vadd.f32 1.0, %v5938_v23  ;;  %v5698_v23 = vld [vmem:[%s8633_s3 + $0x1b8] sm:$0xff]   ;;  %v2890_v45 = vadd.s32 2, %v8840_v52 }
 0x169   : > { %v3703_v55 = vrot.slane %v3561_v14, 1  ;;  %v3534_v2 = vsel %vm7386_vm13, %v3148_v37, 0.0  ;;  %v5942_v57 = vpop.eup %5941  ;;  %5967 = vrcp.f32 %v2578_v4  ;;  %v2588_v10 = vadd.f32 1.0, %v5940_v46 }
 0x16a   : > { %v3535_v56 = vsel %vm7367_vm12, %v3165_v42, 0.0  ;;  %v7410_v15 = vpack.c.bf16 %v3165_v42, %v3148_v37  ;;  %v5944_v22 = vpop.eup %5943  ;;  %v2589_v20 = vadd.f32 1.0, %v5942_v57  ;;  %5969 = vrcp.f32 %v2587_v18 }
 0x16b   : > { %v7408_v12 = vpack.c.bf16 %v3535_v56, %v3534_v2  ;;  %v3705_v25 = vsel %vm1628_vm1, %v3703_v55, %v3704_v58  ;;  %v5946_v4 = vpop.eup %5945  ;;  %v2590_v46 = vadd.f32 1.0, %v5944_v22  ;;  %5971 = vrcp.f32 %v2588_v10 }
 0x16c   : > { %5212 = vmatprep.mubr.msk.bf16.mxu0 %vm5189_vm14, %v7410_v15  ;;  %v3585_v42 = vshll.u32 %v3561_v14, 16  ;;  %v3590_v18 = vshll.u32 %v8864_v50, 16  ;;  %v5948_v2 = vpop.eup %5947  ;;  %5973 = vrcp.f32 %v2589_v20  ;;  %v2579_v55 = vadd.f32 1.0, %v5946_v4  ;;  %v5702_v50 = vld [vmem:[%s8633_s3 + $0x1b0] sm:$0xff]  }
 0x16d   : > { %4486 = vmatmul.mubr.bf16.vlgmr.msra.gmra.mxu0 %v3705_v25  ;;  %v3583_v58 = vshrl.u32 %v3561_v14, 16  ;;  %v5950_v38 = vpop.eup %5949  ;;  %5975 = vrcp.f32 %v2590_v46  ;;  %v2580_v37 = vadd.f32 1.0, %v5948_v2  ;;  %v8865_v57 = vcombine.low %v7062_v17, %v7040_v48  ;;  %v5703_v48 = vld [vmem:[%s8633_s3 + $0x1e8] sm:$0xff]  }
 0x16e   : > { %v3587_v56 = vrot.slane %v3585_v42, 1  ;;  %5469 = vmatpush3.bf16.msra.mxu0 %v5698_v23  ;;  %v5952_v22 = vpop.eup %5951  ;;  %v2581_v20 = vadd.f32 1.0, %v5950_v38  ;;  %5977 = vrcp.f32 %v2579_v55  ;;  %vm2907_vm0 = vcmp.ge.s32.totalorder %v2890_v45, 0  ;;  %v5690_v55 = vld [vmem:[%s8633_s3 + $0x138] sm:$0xff]  }
 0x16f   : > { %v3181_v10 = vrot.slane %v8865_v57, %v6385_v36  ;;  %vm2917_vm2 = vcmp.lt.s32.totalorder %v2890_v45, 16  ;;  %5470 = vmatprep.subr.bf16.mxu0 %v5700_v35  ;;  %v5954_v17 = vpop.eup %5953  ;;  %5979 = vrcp.f32 %v2580_v37  ;;  %v3592_v23 = vrot.slane %v3590_v18, 1 }
 0x170   : > { %v3588_v14 = vor.u32 %v3587_v56, %v3583_v58  ;;  %vm7441_vm4 = vmand %vm2907_vm0, %vm2917_vm2  ;;  %v8868_v4 = vcombine.low %v7116_v47, %v7119_v31  ;;  %v5956_v42 = vpop.eup %5955  ;;  %v2582_v2 = vadd.f32 1.0, %v5954_v17  ;;  %5981 = vrcp.f32 %v2581_v20  ;;  %v5691_v56 = vld [vmem:[%s8633_s3 + $0x170] sm:$0xff]   ;;  %v5706_v17 = vld [vmem:[%s8633_s3 + $0x1e0] sm:$0xff]  }
 0x171   : > { %v7451_v35 = vcombine.high %v7354_v62, %v7354_v62  ;;  %vm7457_vm7 = vmand %vm7441_vm4, %vm2935_vm8  ;;  %v8872_v47 = vcombine.low %v7122_v24, %v7143_v61  ;;  %v7468_v58 = vpop.eup %5957  ;;  %5983 = vpow2.f32 %v7171_v21  ;;  %v5187_v37 = vpack.c.bf16 %v8862_v43, %v8859_v34  ;;  %v5704_v24 = vld [vmem:[%s8633_s3 + $0x1a8] sm:$0xff]   ;;  %v8873_v21 = vld [vmem:[#allocation28_spill] sm:$0xff] }
 0x172   : > { %v3188_v46 = vrot.slane %v8868_v4, %v6385_v36  ;;  %v3593_v45 = vsel %vm3581_vm15, %v3588_v14, %v3592_v23  ;;  %5471 = vmatpush3.bf16.msra.mxu0 %v5702_v50  ;;  %v5960_v61 = vpop.eup %5959  ;;  %5985 = vrcp.f32 %v2582_v2  ;;  %v7481_v57 = vmul.f32 -1.442695, %v7351_v41  ;;  %v8877_v43 = vld [vmem:[#allocation15_spill] sm:$0xff]  ;;  %vm7510_vm11 = vmpackc.low %vm7441_vm4, %vm7457_vm7 }
 0x173   : > { %8869 = vst [vmem:[#allocation29_spill] sm:$0xff] %v7451_v35  ;;  %v3198_v31 = vrot.slane %v8872_v47, %v6385_v36  ;;  %4388 = vmatprep.mubr.bf16.mxu1 %v3593_v45  ;;  %v3172_v50 = vrot.slane %v8877_v43, %v6385_v36  ;;  %5472 = vmatprep.subr.bf16.mxu0 %v5703_v48  ;;  %v5962_v14 = vpop.eup %5961  ;;  %5987 = vpow2.f32 %v7184_v9  ;;  %v7499_v23 = vmul.f32 -1.442695, %v7361_v19  ;;  %v8880_v2 = vld [vmem:[#allocation43_spill] sm:$0xff]  ;;  %vm7680_vm2 = vmand %vm7441_vm4, %vm2970_vm5 }
 0x174   : > { %v3189_v38 = vcombine.low %v3181_v10, %v3188_v46  ;;  %v7502_v4 = vmul.f32 -1.442695, %v7354_v62  ;;  %5188 = vmatmul.mubr.msk.bf16.vlgmr.msra.gmra.mxu1 %vm5186_vm3, %v5187_v37  ;;  %v5964_v9 = vpop.eup %5963  ;;  %v7520_v47 = vmul.f32 %v5962_v14, %v8880_v2  ;;  %v8882_v37 = vld [vmem:[#allocation52_spill] sm:$0xff]  ;;  %v7534_v43 = vmul.f32 -1.442695, %v7451_v35  ;;  %v8883_v2 = vld [vmem:[#allocation38_spill] sm:$0xff] }
 0x175   : > { %v3206_v10 = vcombine.low %v3198_v31, %v8873_v21  ;;  %v8881_v31 = vld [vmem:[#allocation49_spill] sm:$0xff]  ;;  %5405 = vmatpush3.bf16.msra.mxu1 %v5690_v55  ;;  %v5966_v21 = vpop.eup %5965  ;;  %v5693_v55 = vld [vmem:[%s8633_s3 + $0x168] sm:$0xff]   ;;  %v8886_v35 = vld [vmem:[#allocation4_spill] sm:$0xff]  ;;  %v3597_v62 = vshll.u32 %v7408_v12, 16 }
 0x176   : > { %v3537_v46 = vsel %vm7457_vm7, %v3189_v38, 0.0  ;;  %5989 = vpow2.f32 %v8881_v31  ;;  %5406 = vmatprep.subr.bf16.mxu1 %v5691_v56  ;;  %5473 = vmatpush3.bf16.msra.mxu0 %v5704_v24  ;;  %v7545_v31 = vmul.f32 %v5952_v22, %v8883_v2  ;;  %v3536_v56 = vsel %vm7488_vm10, %v3172_v50, 0.0  ;;  %v5709_v24 = vld [vmem:[%s8633_s3 + $0x1d8] sm:$0xff]   ;;  %v8885_v2 = vld [vmem:[#allocation42_spill] sm:$0xff]  ;;  %v8887_v50 = vld [vmem:[#allocation44_spill] sm:$0xff] }
 0x177   : > { %v3538_v18 = vsel %vm7441_vm4, %v3206_v10, 0.0  ;;  %v7525_v45 = vpack.c.bf16 %v3206_v10, %v3189_v38  ;;  %5991 = vpow2.f32 %v8882_v37  ;;  %v5708_v38 = vld [vmem:[%s8633_s3 + $0x1a0] sm:$0xff]   ;;  %v5968_v10 = vpop.eup %5967  ;;  %5474 = vmatprep.subr.bf16.mxu0 %v5706_v17  ;;  %v8884_v22 = vld [vmem:[#allocation41_spill] sm:$0xff]  ;;  %v7564_v37 = vmul.f32 %v5960_v61, %v8885_v2 }
 0x178   : > { %v7536_v14 = vpack.c.bf16 %v3538_v18, %v3537_v46  ;;  %5993 = vpow2.f32 %v7203_v16  ;;  %v7558_v46 = vpop.eup %5969  ;;  %v7561_v18 = vmul.f32 %v5956_v42, %v8884_v22  ;;  %v3564_v16 = vpack.c.bf16 %v3536_v56, %v3536_v56  ;;  %v5694_v42 = vld [vmem:[%s8633_s3 + $0x128] sm:$0xff]   ;;  %v8888_v22 = vld [vmem:[#allocation25_spill] sm:$0xff] }
 0x179   : > { %5215 = vmatprep.mubr.msk.bf16.mxu0 %vm7510_vm11, %v7525_v45  ;;  %5995 = vpow2.f32 %v7212_v8  ;;  %v5972_v7 = vpop.eup %5971  ;;  %v7568_v34 = vmul.f32 %v5964_v9, %v8886_v35  ;;  %v7571_v17 = vmul.f32 %v5966_v21, %v8887_v50  ;;  %5407 = vmatpush3.bf16.msra.mxu1 %v5692_v1  ;;  %v7579_v8 = vmul.f32 %v5968_v10, %v8888_v22 }
 0x17a   : > { %5997 = vpow2.f32 %v7206_v49  ;;  %v5974_v61 = vpop.eup %5973  ;;  %v3602_v35 = vshll.u32 %v3564_v16, 16  ;;  %v3706_v9 = vrot.slane %v7408_v12, 1  ;;  %5408 = vmatprep.subr.bf16.mxu1 %v5693_v55  ;;  %v5695_v49 = vld [vmem:[%s8633_s3 + $0x160] sm:$0xff]   ;;  %5475 = vmatpush3.bf16.msra.mxu0 %v5708_v38  ;;  %v3595_v21 = vshrl.u32 %v7408_v12, 16  ;;  %v8889_v55 = vld [vmem:[#allocation39_spill] sm:$0xff] }
 0x17b   : > { %5999 = vpow2.f32 %v7225_v27  ;;  %v7586_v1 = vpop.eup %5975  ;;  %v3599_v56 = vrot.slane %v3597_v62, 1  ;;  %v3707_v10 = vrot.slane %v3564_v16, 1  ;;  %5476 = vmatprep.subr.bf16.mxu0 %v5709_v24  ;;  %v5710_v27 = vld [vmem:[%s8633_s3 + $0x198] sm:$0xff]   ;;  %v7595_v50 = vmul.f32 %v7468_v58, %v8889_v55  ;;  %v5712_v62 = vld [vmem:[%s8633_s3 + $0x1d0] sm:$0xff]  }
 0x17c   : > { %6001 = vpow2.f32 %v7239_v11  ;;  %v5978_v2 = vpop.eup %5977  ;;  %v3604_v11 = vrot.slane %v3602_v35, 1  ;;  %v8890_v24 = vld [vmem:[#allocation17_spill] sm:$0xff] }
 0x17d   : > { %6003 = vpow2.f32 %v7251_v39  ;;  %v7603_v12 = vpop.eup %5979  ;;  %v7606_v16 = vmul.f32 %v5978_v2, %v8890_v24  ;;  %v3600_v22 = vor.u32 %v3599_v56, %v3595_v21  ;;  %v7610_v58 = vsel %vm1628_vm1, %v3706_v9, %v3707_v10  ;;  %5409 = vmatpush3.bf16.msra.mxu1 %v5694_v42  ;;  %v8891_v9 = vld [vmem:[#allocation16_spill] sm:$0xff] }
 0x17e   : > { %6005 = vpow2.f32 %v7244_v0  ;;  %v7612_v55 = vpop.eup %5981  ;;  %4494 = vmatmul.mubr.bf16.gmra.mxu0 %v7610_v58  ;;  %v2891_v2 = vadd.s32 3, %v8840_v52  ;;  %5410 = vmatprep.subr.bf16.mxu1 %v5695_v49  ;;  %v5696_v0 = vld [vmem:[%s8633_s3 + $0x120] sm:$0xff]   ;;  %v7625_v21 = vmul.f32 %v5972_v7, %v8891_v9  ;;  %v5699_v49 = vld [vmem:[%s8633_s3 + $0x158] sm:$0xff]   ;;  %v5714_v10 = vld [vmem:[%s8633_s3 + $0x190] sm:$0xff]  }
 0x17f   : > { %6007 = vpow2.f32 %v7269_v54  ;;  %v5984_v42 = vpop.eup %5983  ;;  %v7631_v54 = vsel %vm3581_vm15, %v3600_v22, %v3604_v11  ;;  %5477 = vmatpush3.bf16.msra.mxu0 %v5710_v27  ;;  %v8892_v27 = vld [vmem:[#allocation9_spill] sm:$0xff] }
 0x180   : > { %6009 = vpow2.f32 %v7272_v13  ;;  %v7639_v24 = vpop.eup %5985  ;;  %v2599_v7 = vadd.f32 1.0, %v5984_v42  ;;  %4396 = vmatprep.mubr.bf16.mxu1 %v7631_v54  ;;  %vm2908_vm6 = vcmp.ge.s32.totalorder %v2891_v2, 0  ;;  %vm2918_vm9 = vcmp.lt.s32.totalorder %v2891_v2, 16  ;;  %5478 = vmatprep.subr.bf16.mxu0 %v5712_v62  ;;  %v5715_v13 = vld [vmem:[%s8633_s3 + $0x1c8] sm:$0xff]   ;;  %v8893_v9 = vld [vmem:[#allocation45_spill] sm:$0xff]  ;;  %v8896_v62 = vld [vmem:[#allocation14_spill] sm:$0xff] }
 0x181   : > { %6011 = vpow2.f32 %v7292_v28  ;;  %v5988_v11 = vpop.eup %5987  ;;  %v7648_v22 = vmul.f32 %v7558_v46, %v8892_v27  ;;  %v7651_v39 = vmul.f32 %v5974_v61, %v8893_v9  ;;  %vm7654_vm0 = vmand %vm2908_vm6, %vm2918_vm9  ;;  %v8897_v2 = vld [vmem:[#allocation5_spill] sm:$0xff]  ;;  %5191 = vmatmul.mubr.msk.bf16.gmra.mxu1 %vm5189_vm14, %v7410_v15  ;;  %v8900_v27 = vld [vmem:[#allocation19_spill] sm:$0xff] }
 0x182   : > { %6013 = vpow2.f32 %v7296_v3  ;;  %v8898_v42 = vcombine.low %v8896_v62, %v8897_v2  ;;  %v2600_v61 = vadd.f32 1.0, %v5988_v11  ;;  %v8899_v3 = vld [vmem:[#allocation12_spill] sm:$0xff]  ;;  %v8902_v62 = vcombine.low %v7278_v63, %v7281_v26  ;;  %5411 = vmatpush3.bf16.msra.mxu1 %v5696_v0  ;;  %vm7694_vm12 = vmand %vm7654_vm0, %vm2935_vm8  ;;  %v8907_v26 = vld [vmem:[#allocation10_spill] sm:$0xff] }
 0x183   : > { %v5990_v46 = vpop.eup %5989  ;;  %6015 = vrcp.f32 %v2599_v7  ;;  %v8901_v9 = vcombine.low %v8899_v3, %v8900_v27  ;;  %v3213_v25 = vrot.slane %v8907_v26, %v6385_v36  ;;  %5412 = vmatprep.subr.bf16.mxu1 %v5699_v49  ;;  %v5705_v0 = vld [vmem:[%s8633_s3 + $0x150] sm:$0xff]   ;;  %5479 = vmatpush3.bf16.msra.mxu0 %v5714_v10  ;;  %v5718_v49 = vld [vmem:[%s8633_s3 + $0x1c0] sm:$0xff]   ;;  %v3607_v26 = vshrl.u32 %v7536_v14, 16  ;;  %vm7721_vm13 = vmpackc.low %vm7654_vm0, %vm7694_vm12 }
 0x184   : > { %v3222_v38 = vrot.slane %v8898_v42, %v6385_v36  ;;  %v3246_v2 = vrot.slane %v8902_v62, %v6385_v36  ;;  %v5992_v15 = vpop.eup %5991  ;;  %v2601_v11 = vadd.f32 1.0, %v5990_v46  ;;  %6017 = vpow2.f32 %v7299_v6  ;;  %v5716_v6 = vld [vmem:[%s8633_s3 + $0x188] sm:$0xff]   ;;  %5480 = vmatprep.subr.bf16.mxu0 %v5715_v13  ;;  %v5707_v13 = vld [vmem:[%s8633_s3 + $0x110] sm:$0xff]   ;;  %vm7765_vm4 = vmand %vm7654_vm0, %vm2970_vm5 }
 0x185   : > { %v3229_v35 = vrot.slane %v8901_v9, %v6385_v36  ;;  %v5994_v42 = vpop.eup %5993  ;;  %v2602_v46 = vadd.f32 1.0, %v5992_v15  ;;  %6019 = vrcp.f32 %v2600_v61  ;;  %v3539_v10 = vsel %vm7680_vm2, %v3213_v25, 0.0  ;;  %v5711_v63 = vld [vmem:[%s8633_s3 + $0x148] sm:$0xff]  }
 0x186   : > { %v3247_v27 = vcombine.low %v7316_v60, %v3246_v2  ;;  %v5996_v9 = vpop.eup %5995  ;;  %6021 = vrcp.f32 %v2601_v11  ;;  %v2591_v62 = vadd.f32 1.0, %v5994_v42  ;;  %5413 = vmatpush3.bf16.msra.mxu1 %v5701_v51  ;;  %v5720_v51 = vld [vmem:[%s8633_s3 + $0x180] sm:$0xff]  }
 0x187   : > { %v3230_v3 = vcombine.low %v3222_v38, %v3229_v35  ;;  %v5998_v56 = vpop.eup %5997  ;;  %6023 = vrcp.f32 %v2602_v46  ;;  %v2592_v15 = vadd.f32 1.0, %v5996_v9  ;;  %v8908_v35 = vmov 0  ;;  %5414 = vmatprep.subr.bf16.mxu1 %v5705_v0  ;;  %5481 = vmatpush3.bf16.msra.mxu0 %v5716_v6 }
 0x188   : > { %v3541_v60 = vsel %vm7654_vm0, %v3247_v27, 0.0  ;;  %v8909_v35 = vsel %vm7721_vm13, 4294967295, %v8908_v35  ;;  %v6000_v61 = vpop.eup %5999  ;;  %v2593_v2 = vadd.f32 1.0, %v5998_v56  ;;  %6025 = vrcp.f32 %v2591_v62  ;;  %5482 = vmatprep.subr.bf16.mxu0 %v5718_v49  ;;  %v5713_v49 = vld [vmem:[%s8633_s3 + $0x108] sm:$0xff]  }
 0x189   : > { %v3540_v38 = vsel %vm7694_vm12, %v3230_v3, 0.0  ;;  %8910 = vst [vmem:[#allocation30_spill] sm:$0xff] %v8909_v35  ;;  %v7730_v11 = vpack.c.bf16 %v3247_v27, %v3230_v3  ;;  %v6002_v25 = vpop.eup %6001  ;;  %v2594_v42 = vadd.f32 1.0, %v6000_v61  ;;  %6027 = vrcp.f32 %v2592_v15 }
 0x18a   : > { %v7728_v5 = vpack.c.bf16 %v3541_v60, %v3540_v38  ;;  %v3566_v46 = vpack.c.bf16 %v3539_v10, %v3539_v10  ;;  %v3609_v56 = vshll.u32 %v7536_v14, 16  ;;  %v6004_v9 = vpop.eup %6003  ;;  %6029 = vrcp.f32 %v2593_v2  ;;  %5415 = vmatpush3.bf16.msra.mxu1 %v5707_v13 }
 0x18b   : > { %v2603_v3 = vadd.f32 1.0, %v6002_v25  ;;  %5218 = vmatprep.mubr.msk.bf16.mxu0 %vm7721_vm13, %v7730_v11  ;;  %v3709_v0 = vrot.slane %v7536_v14, 1  ;;  %v2892_v6 = vadd.s32 4, %v8840_v52  ;;  %v6006_v27 = vpop.eup %6005  ;;  %6031 = vrcp.f32 %v2594_v42  ;;  %5416 = vmatprep.subr.bf16.mxu1 %v5711_v63  ;;  %v5717_v14 = vld [vmem:[%s8633_s3 + $0x140] sm:$0xff]  }
 0x18c   : > { %v2604_v62 = vadd.f32 1.0, %v6004_v9  ;;  %v3611_v38 = vrot.slane %v3609_v56, 1  ;;  %v3614_v15 = vshll.u32 %v3566_v46, 16  ;;  %v6008_v10 = vpop.eup %6007  ;;  %v2605_v60 = vadd.f32 1.0, %v6006_v27  ;;  %5483 = vmatpush3.bf16.msra.mxu0 %v5720_v51  ;;  %v5719_v27 = vld [vmem:[%s8633_s3 + $0x100] sm:$0xff]  }
 0x18d   : > { %6033 = vrcp.f32 %v2603_v3  ;;  %v3710_v61 = vrot.slane %v3566_v46, 1  ;;  %vm2909_vm14 = vcmp.ge.s32.totalorder %v2892_v6, 0  ;;  %v6010_v2 = vpop.eup %6009  ;;  %v2606_v25 = vadd.f32 1.0, %v6008_v10  ;;  %v7789_v10 = vld [vmem:[%s8633_s3 + $0x238] sm:$0xff]  }
 0x18e   : > { %6035 = vrcp.f32 %v2604_v62  ;;  %v3612_v42 = vor.u32 %v3611_v38, %v3607_v26  ;;  %v3616_v13 = vrot.slane %v3614_v15, 1  ;;  %v6012_v56 = vpop.eup %6011  ;;  %v2595_v9 = vadd.f32 1.0, %v6010_v2  ;;  %5417 = vmatpush3.bf16.msra.mxu1 %v5713_v49  ;;  %v8920_v2 = vld [vmem:[#allocation13_spill] sm:$0xff] }
 0x18f   : > { %6037 = vrcp.f32 %v2605_v60  ;;  %v7751_v7 = vsel %vm1628_vm1, %v3709_v0, %v3710_v61  ;;  %vm2919_vm3 = vcmp.lt.s32.totalorder %v2892_v6, 16  ;;  %v6014_v46 = vpop.eup %6013  ;;  %v2596_v63 = vadd.f32 1.0, %v6012_v56  ;;  %5418 = vmatprep.subr.bf16.mxu1 %v5717_v14  ;;  %v8919_v60 = vld [vmem:[#allocation23_spill] sm:$0xff] }
 0x190   : > { %8911 = vst [vmem:[#allocation31_spill] sm:$0xff] %v7751_v7  ;;  %6039 = vrcp.f32 %v2606_v25  ;;  %v7754_v3 = vsel %vm3581_vm15, %v3612_v42, %v3616_v13  ;;  %4502 = vmatmul.mubr.bf16.gmra.mxu0 %v7751_v7  ;;  %v8912_v26 = vcombine.low %v7340_v44, %v7328_v30  ;;  %v6016_v62 = vpop.eup %6015  ;;  %v2597_v38 = vadd.f32 1.0, %v6014_v46  ;;  %vm7774_vm7 = vmand %vm2909_vm14, %vm2919_vm3  ;;  %v8925_v42 = vld [vmem:[#allocation2_spill] sm:$0xff] }
 0x191   : > { %6041 = vrcp.f32 %v2595_v9  ;;  %4404 = vmatprep.mubr.bf16.mxu1 %v7754_v3  ;;  %v8917_v44 = vcombine.low %v7344_v59, %v7380_v32  ;;  %v8918_v15 = vcombine.low %v7247_v53, %v7231_v29  ;;  %v6018_v6 = vpop.eup %6017  ;;  %v7793_v61 = vmul.f32 %v7639_v24, %v8919_v60  ;;  %vm7803_vm10 = vmand %vm7774_vm7, %vm2935_vm8  ;;  %v8923_v29 = vld [vmem:[#allocation59_spill] sm:$0xff]  ;;  %v8926_v9 = vld [vmem:[#allocation21_spill] sm:$0xff] }
 0x192   : > { %v3263_v51 = vrot.slane %v8912_v26, %v6385_v36  ;;  %v7797_v59 = vmul.f32 %v7586_v1, %v8920_v2  ;;  %6043 = vrcp.f32 %v2596_v63  ;;  %5194 = vmatmul.mubr.msk.bf16.gmra.mxu1 %vm7510_vm11, %v7525_v45  ;;  %v3254_v32 = vrot.slane %v8923_v29, %v6385_v36  ;;  %v6020_v24 = vpop.eup %6019  ;;  %v8927_v63 = vld [vmem:[#allocation7_spill] sm:$0xff]  ;;  %vm7849_vm6 = vmpackc.low %vm7774_vm7, %vm7803_vm10  ;;  %v8933_v2 = vld [vmem:[#allocation46_spill] sm:$0xff] }
 0x193   : > { %v3270_v28 = vrot.slane %v8917_v44, %v6385_v36  ;;  %v3287_v49 = vrot.slane %v8918_v15, %v6385_v36  ;;  %v8924_v1 = vcombine.low %v7648_v22, %v7625_v21  ;;  %6045 = vrcp.f32 %v2597_v38  ;;  %v6022_v56 = vpop.eup %6021  ;;  %5419 = vmatpush3.bf16.msra.mxu1 %v5719_v27  ;;  %v8928_v22 = vld [vmem:[#allocation18_spill] sm:$0xff]  ;;  %v8940_v27 = vld [vmem:[#allocation53_spill] sm:$0xff]  ;;  %vm7898_vm9 = vmand %vm7774_vm7, %vm2970_vm5 }
 0x194   : > { %v7821_v46 = vmul.f32 %v7612_v55, %v8926_v9  ;;  %6047 = vpow2.f32 %v8927_v63  ;;  %v3542_v26 = vsel %vm7765_vm4, %v3254_v32, 0.0  ;;  %v3621_v44 = vshll.u32 %v7728_v5, 16  ;;  %v6024_v21 = vpop.eup %6023  ;;  %5578 = vmatprep.subr.bf16.mxu1 %v7789_v10  ;;  %v8935_v53 = vld [vmem:[#allocation26_spill] sm:$0xff] }
 0x195   : > { %v7816_v14 = vrot.slane %v8924_v1, %v6385_v36  ;;  %v3271_v25 = vcombine.low %v3263_v51, %v3270_v28  ;;  %v3288_v13 = vcombine.low %v8925_v42, %v3287_v49  ;;  %v7829_v38 = vmul.f32 %v7603_v12, %v8928_v22  ;;  %v6026_v15 = vpop.eup %6025  ;;  %v8930_v12 = vld [vmem:[#allocation65_spill] sm:$0xff]  ;;  %v8934_v42 = vld [vmem:[#allocation20_spill] sm:$0xff] }
 0x196   : > { %v8929_v51 = vcombine.low %v7579_v8, %v7606_v16  ;;  %v2598_v49 = vadd.f32 1.0, %v6018_v6  ;;  %6049 = vpow2.f32 %v8930_v12  ;;  %v6028_v16 = vpop.eup %6027  ;;  %v7854_v29 = vmul.f32 %v6026_v15, %v8933_v2  ;;  %v8938_v15 = vld [vmem:[#allocation50_spill] sm:$0xff] }
 0x197   : > { %v3543_v55 = vsel %vm7803_vm10, %v3271_v25, 0.0  ;;  %v3544_v0 = vsel %vm7774_vm7, %v3288_v13, 0.0  ;;  %6051 = vpow2.f32 %v7481_v57  ;;  %v7857_v32 = vpack.c.bf16 %v3288_v13, %v3271_v25  ;;  %v6030_v1 = vpop.eup %6029 }
 0x198   : > { %v3328_v28 = vrot.slane %v8929_v51, %v6385_v36  ;;  %v7843_v60 = vpack.c.bf16 %v3544_v0, %v3543_v55  ;;  %v3568_v6 = vpack.c.bf16 %v3542_v26, %v3542_v26  ;;  %v7860_v9 = vmul.f32 %v6016_v62, %v8934_v42  ;;  %v6032_v55 = vpop.eup %6031  ;;  %v8936_v0 = vld [vmem:[#allocation6_spill] sm:$0xff] }
 0x199   : > { %v7863_v63 = vmul.f32 %v6020_v24, %v8935_v53  ;;  %v3619_v22 = vshrl.u32 %v7728_v5, 16  ;;  %v3623_v51 = vrot.slane %v3621_v44, 1  ;;  %v7867_v12 = vmul.f32 %v6022_v56, %v8936_v0  ;;  %5221 = vmatprep.mubr.msk.bf16.mxu0 %vm7849_vm6, %v7857_v32  ;;  %v8937_v24 = vld [vmem:[#allocation47_spill] sm:$0xff]  ;;  %v8939_v0 = vld [vmem:[#allocation48_spill] sm:$0xff] }
 0x19a   : > { %6053 = vpow2.f32 %v7499_v23  ;;  %v3626_v62 = vshll.u32 %v3568_v6, 16  ;;  %v6034_v25 = vpop.eup %6033  ;;  %v7876_v13 = vmul.f32 %v6024_v21, %v8937_v24  ;;  %v3712_v56 = vrot.slane %v7728_v5, 1  ;;  %v8961_v24 = vld [vmem:[#allocation57_spill] sm:$0xff] }
 0x19b   : > { %6055 = vpow2.f32 %v7502_v4  ;;  %v3624_v26 = vor.u32 %v3623_v51, %v3619_v22  ;;  %v6036_v44 = vpop.eup %6035  ;;  %v7881_v2 = vmul.f32 %v6028_v16, %v8938_v15  ;;  %v3713_v42 = vrot.slane %v3568_v6, 1  ;;  %v8946_v22 = vld [vmem:[#allocation63_spill] sm:$0xff] }
 0x19c   : > { %6057 = vrcp.f32 %v2598_v49  ;;  %v3628_v23 = vrot.slane %v3626_v62, 1  ;;  %v6038_v53 = vpop.eup %6037  ;;  %v7884_v57 = vmul.f32 %v6030_v1, %v8939_v0  ;;  %v7887_v7 = vmul.f32 %v6032_v55, %v8940_v27  ;;  %v8945_v1 = vld [vmem:[#allocation62_spill] sm:$0xff] }
 0x19d   : > { %v2893_v21 = vadd.s32 5, %v8840_v52  ;;  %v8941_v4 = vcombine.low %v7331_v40, %v7520_v47  ;;  %v6040_v16 = vpop.eup %6039  ;;  %v7906_v27 = vsel %vm1628_vm1, %v3712_v56, %v3713_v42  ;;  %v8947_v40 = vcombine.low %v8945_v1, %v8946_v22  ;;  %v8949_v56 = vld [vmem:[#allocation56_spill] sm:$0xff]  ;;  %v8954_v22 = vld [vmem:[#allocation55_spill] sm:$0xff] }
 0x19e   : > { %v7903_v6 = vsel %vm3581_vm15, %v3624_v26, %v3628_v23  ;;  %8944 = vst [vmem:[#allocation32_spill] sm:$0xff] %v7906_v27  ;;  %v8948_v30 = vcombine.low %v7568_v34, %v7571_v17  ;;  %v6042_v55 = vpop.eup %6041  ;;  %4510 = vmatmul.mubr.bf16.gmra.mxu0 %v7906_v27  ;;  %v8952_v42 = vld [vmem:[#allocation60_spill] sm:$0xff]  ;;  %6059 = vpow2.f32 %v7534_v43  ;;  %v7971_v62 = vmul.f32 %v6040_v16, %v8961_v24 }
 0x19f   : > { %v3311_v5 = vrot.slane %v8941_v4, %v6385_v36  ;;  %v3304_v47 = vrot.slane %v8947_v40, %v6385_v36  ;;  %4412 = vmatprep.mubr.bf16.mxu1 %v7903_v6  ;;  %vm2910_vm0 = vcmp.ge.s32.totalorder %v2893_v21, 0  ;;  %vm2920_vm2 = vcmp.lt.s32.totalorder %v2893_v21, 16  ;;  %v6044_v26 = vpop.eup %6043 }
 0x1a0   : > { %v3321_v51 = vrot.slane %v8948_v30, %v6385_v36  ;;  %v2865_v15 = vmul.f32 %v6042_v55, %v8949_v56  ;;  %vm7923_vm12 = vmand %vm2910_vm0, %vm2920_vm2  ;;  %5197 = vmatmul.mubr.msk.bf16.gmra.mxu1 %vm7721_vm13, %v7730_v11  ;;  %v8953_v0 = vrot.slane %v8952_v42, %v6385_v36  ;;  %v6046_v21 = vpop.eup %6045  ;;  %v7938_v40 = vmul.f32 %v6036_v44, %v8954_v22  ;;  %v8958_v44 = vld [vmem:[#allocation22_spill] sm:$0xff] }
 0x1a1   : > { %v3312_v34 = vcombine.low %v3304_v47, %v3311_v5  ;;  %vm2953_vm14 = vmand %vm7923_vm12, %vm2935_vm8  ;;  %v6048_v5 = vpop.eup %6047  ;;  %v8955_v47 = vld [vmem:[#allocation24_spill] sm:$0xff]  ;;  %v7958_v56 = vmul.f32 %v6046_v21, %v8958_v44  ;;  %v8960_v22 = vld [vmem:[#allocation54_spill] sm:$0xff]  ;;  %v3633_v1 = vshll.u32 %v7843_v60, 16  ;;  %v8968_v23 = vcombine.low %v7595_v50, %v7564_v37 }
 0x1a2   : > { %v3329_v17 = vcombine.low %v3321_v51, %v3328_v28  ;;  %v3545_v4 = vsel %vm7898_vm9, %v8953_v0, 0.0  ;;  %v7946_v30 = vmul.f32 %v6044_v26, %v8955_v47  ;;  %v3395_v49 = vcombine.low %v7887_v7, %v2865_v15  ;;  %vm7953_vm3 = vmpackc.low %vm7923_vm12, %vm2953_vm14  ;;  %v8959_v7 = vld [vmem:[#allocation51_spill] sm:$0xff] }
 0x1a3   : > { %v3570_v28 = vpack.c.bf16 %v3545_v4, %v3545_v4  ;;  %v3546_v51 = vsel %vm2953_vm14, %v3312_v34, 0.0  ;;  %v2615_v42 = vadd.f32 1.0, %v6048_v5  ;;  %v6050_v4 = vpop.eup %6049  ;;  %v7965_v15 = vmul.f32 %v6034_v25, %v8959_v7  ;;  %vm8001_vm10 = vmand %vm7923_vm12, %vm2970_vm5 }
 0x1a4   : > { %v3547_v55 = vsel %vm7923_vm12, %v3329_v17, 0.0  ;;  %v7962_v26 = vpack.c.bf16 %v3329_v17, %v3312_v34  ;;  %v7968_v47 = vmul.f32 %v6038_v53, %v8960_v22  ;;  %v6052_v27 = vpop.eup %6051  ;;  %v2616_v21 = vadd.f32 1.0, %v6050_v4 }
 0x1a5   : > { %v7960_v0 = vpack.c.bf16 %v3547_v55, %v3546_v51  ;;  %v3631_v34 = vshrl.u32 %v7843_v60, 16  ;;  %v3638_v17 = vshll.u32 %v3570_v28, 16  ;;  %v3715_v25 = vrot.slane %v7843_v60, 1 }
 0x1a6   : > { %5224 = vmatprep.mubr.msk.bf16.mxu0 %vm7953_vm3, %v7962_v26  ;;  %v2607_v5 = vadd.f32 1.0, %v6052_v27  ;;  %v3635_v51 = vrot.slane %v3633_v1, 1  ;;  %v3716_v53 = vrot.slane %v3570_v28, 1  ;;  %v2894_v55 = vadd.s32 6, %v8840_v52  ;;  %v1751_v1 = vpop.f32.mrf.mxu0 }
 0x1a7   : > { %v6054_v16 = vpop.eup %6053  ;;  %v3396_v44 = vcombine.low %v7946_v30, %v7958_v56  ;;  %6061 = vrcp.f32 %v2615_v42  ;;  %v3640_v4 = vrot.slane %v3638_v17, 1  ;;  %v8962_v60 = vcombine.low %v7821_v46, %v7793_v61 }
 0x1a8   : > { %v6056_v7 = vpop.eup %6055  ;;  %6063 = vrcp.f32 %v2607_v5  ;;  %v3636_v22 = vor.u32 %v3635_v51, %v3631_v34  ;;  %v7985_v35 = vsel %vm1628_vm1, %v3715_v25, %v3716_v53  ;;  %v7994_v24 = vrot.slane %v3395_v49, %v6385_v36  ;;  %v8971_v51 = vld [vmem:[#allocation3_spill] sm:$0xff] }
 0x1a9   : > { %v3345_v27 = vrot.slane %v8962_v60, %v6385_v36  ;;  %v7991_v28 = vpop.eup %6057  ;;  %6065 = vrcp.f32 %v2616_v21  ;;  %4518 = vmatmul.mubr.bf16.gmra.mxu0 %v7985_v35  ;;  %vm2911_vm4 = vcmp.ge.s32.totalorder %v2894_v55, 0  ;;  %vm2921_vm7 = vcmp.lt.s32.totalorder %v2894_v55, 16 }
 0x1aa   : > { %v2608_v61 = vadd.f32 1.0, %v6054_v16  ;;  %v8006_v46 = vsel %vm3581_vm15, %v3636_v22, %v3640_v4  ;;  %vm8008_vm9 = vmand %vm2911_vm4, %vm2921_vm7  ;;  %v8967_v21 = vcombine.low %v7545_v31, %v7561_v18  ;;  %v3362_v17 = vrot.slane %v8968_v23, %v6385_v36 }
 0x1ab   : > { %v8020_v25 = vadd.f32 1.0, %v6056_v7  ;;  %4420 = vmatprep.mubr.bf16.mxu1 %v8006_v46  ;;  %vm8027_vm0 = vmand %vm8008_vm9, %vm2935_vm8  ;;  %v1752_v31 = vadd.f32 %v1751_v1, %v8971_v51  ;;  %v3336_v18 = vrot.slane %v7829_v38, %v6385_v36  ;;  %v3643_v37 = vshrl.u32 %v7960_v0, 16  ;;  %v6060_v60 = vpop.eup %6059 }
 0x1ac   : > { %v3352_v34 = vrot.slane %v8967_v21, %v6385_v36  ;;  %v3370_v53 = vcombine.low %v3362_v17, %v7816_v14  ;;  %5200 = vmatmul.mubr.msk.bf16.gmra.mxu1 %vm7849_vm6, %v7857_v32  ;;  %v3645_v55 = vshll.u32 %v7960_v0, 16  ;;  %v3718_v16 = vrot.slane %v7960_v0, 1  ;;  %vm8045_vm2 = vmpackc.low %vm8008_vm9, %vm8027_vm0 }
 0x1ad   : > { %v2142_v38 = vcombine.high %v1752_v31, %v1752_v31  ;;  %v8050_v7 = vrot.slane %v1752_v31, %v6385_v36  ;;  %v3548_v14 = vsel %vm8001_vm10, %v3336_v18, 0.0  ;;  %v2895_v22 = vadd.s32 7, %v8840_v52  ;;  %vm8110_vm7 = vmand %vm8008_vm9, %vm2970_vm5 }
 0x1ae   : > { %v3353_v50 = vcombine.low %v3345_v27, %v3352_v34  ;;  %v3550_v27 = vsel %vm8008_vm9, %v3370_v53, 0.0  ;;  %v3572_v21 = vpack.c.bf16 %v3548_v14, %v3548_v14  ;;  %v3647_v5 = vrot.slane %v3645_v55, 1 }
 0x1af   : > { %v8064_v23 = vrot.slane %v2142_v38, %v6385_v36  ;;  %v8068_v42 = vcombine.high %v8050_v7, %v8050_v7  ;;  %v5103_v17 = vmul.f32 -1.442695, %v8050_v7  ;;  %vm2912_vm12 = vcmp.ge.s32.totalorder %v2895_v22, 0 }
 0x1b0   : > { %v3549_v0 = vsel %vm8027_vm0, %v3353_v50, 0.0  ;;  %v8059_v1 = vpack.c.bf16 %v3370_v53, %v3353_v50  ;;  %v3650_v51 = vshll.u32 %v3572_v21, 16  ;;  %v3719_v31 = vrot.slane %v3572_v21, 1 }
 0x1b1   : > { %v8061_v34 = vpack.c.bf16 %v3550_v27, %v3549_v0  ;;  %v8076_v18 = vcombine.high %v8064_v23, %v8064_v23  ;;  %6067 = vpow2.f32 %v5103_v17  ;;  %v5104_v50 = vmul.f32 -1.442695, %v8068_v42 }
 0x1b2   : > { %5227 = vmatprep.mubr.msk.bf16.mxu0 %vm8045_vm2, %v8059_v1  ;;  %v5105_v53 = vmul.f32 -1.442695, %v8064_v23  ;;  %v3648_v38 = vor.u32 %v3647_v5, %v3643_v37  ;;  %v3652_v14 = vrot.slane %v3650_v51, 1  ;;  %v8081_v0 = vsel %vm1628_vm1, %v3718_v16, %v3719_v31 }
 0x1b3   : > { %vm2922_vm14 = vcmp.lt.s32.totalorder %v2895_v22, 16  ;;  %v2610_v27 = vadd.f32 1.0, %v6060_v60  ;;  %6069 = vpow2.f32 %v5104_v50  ;;  %v5106_v55 = vmul.f32 -1.442695, %v8076_v18  ;;  %4526 = vmatmul.mubr.bf16.gmra.mxu0 %v8081_v0 }
 0x1b4   : > { %vm8085_vm4 = vmand %vm2912_vm12, %vm2922_vm14  ;;  %v8976_v17 = vcombine.low %v7797_v59, %v7854_v29  ;;  %v8093_v5 = vpop.eup %6061  ;;  %6071 = vpow2.f32 %v5105_v53  ;;  %v8096_v16 = vsel %vm3581_vm15, %v3648_v38, %v3652_v14  ;;  %v8977_v22 = vcombine.low %v7881_v2, %v7884_v57 }
 0x1b5   : > { %v3410_v51 = vrot.slane %v3396_v44, %v6385_v36  ;;  %v6064_v29 = vpop.eup %6063  ;;  %v3437_v31 = vcombine.low %v7968_v47, %v7971_v62  ;;  %v8980_v57 = vcombine.low %v7965_v15, %v7938_v40  ;;  %6073 = vpow2.f32 %v5106_v55  ;;  %4428 = vmatprep.mubr.bf16.mxu1 %v8096_v16  ;;  %vm8125_vm10 = vmand %vm8085_vm4, %vm2935_vm8  ;;  %v8983_v44 = vld [vmem:[#allocation58_spill] sm:$0xff] }
 0x1b6   : > { %v3386_v37 = vrot.slane %v8976_v17, %v6385_v36  ;;  %v3393_v60 = vrot.slane %v8977_v22, %v6385_v36  ;;  %v3377_v56 = vrot.slane %v7651_v39, %v6385_v36  ;;  %v8131_v62 = vpop.eup %6065  ;;  %6075 = vrcp.f32 %v2608_v61  ;;  %5203 = vmatmul.mubr.msk.bf16.gmra.mxu1 %vm7953_vm3, %v7962_v26  ;;  %vm8153_vm9 = vmpackc.low %vm8085_vm4, %vm8125_vm10 }
 0x1b7   : > { %v3444_v2 = vrot.slane %v8980_v57, %v6385_v36  ;;  %v3411_v40 = vcombine.low %v7994_v24, %v3410_v51  ;;  %v3657_v15 = vshll.u32 %v8061_v34, 16  ;;  %v2868_v49 = vmul.f32 %v7991_v28, %v8983_v44  ;;  %vm8165_vm14 = vmand %vm8085_vm4, %vm2970_vm5 }
 0x1b8   : > { %v3394_v47 = vcombine.low %v3386_v37, %v3393_v60  ;;  %6077 = vrcp.f32 %v8020_v25  ;;  %v3551_v39 = vsel %vm8110_vm7, %v3377_v56, 0.0  ;;  %v2896_v50 = vadd.s32 8, %v8840_v52 }
 0x1b9   : > { %6079 = vrcp.f32 %v2610_v27  ;;  %v2877_v61 = vmul.f32 %v6064_v29, %v7351_v41  ;;  %v3553_v53 = vsel %vm8085_vm4, %v3411_v40, 0.0  ;;  %v3574_v14 = vpack.c.bf16 %v3551_v39, %v3551_v39 }
 0x1ba   : > { %v3552_v24 = vsel %vm8125_vm10, %v3394_v47, 0.0  ;;  %v8157_v38 = vpack.c.bf16 %v3411_v40, %v3394_v47  ;;  %v3721_v41 = vrot.slane %v8061_v34, 1  ;;  %v3655_v27 = vshrl.u32 %v8061_v34, 16 }
 0x1bb   : > { %v3575_v25 = vpack.c.bf16 %v3553_v53, %v3552_v24  ;;  %v3659_v55 = vrot.slane %v3657_v15, 1  ;;  %vm2913_vm0 = vcmp.ge.s32.totalorder %v2896_v50, 0  ;;  %vm2923_vm12 = vcmp.lt.s32.totalorder %v2896_v50, 16 }
 0x1bc   : > { %5230 = vmatprep.mubr.msk.bf16.mxu0 %vm8153_vm9, %v8157_v38  ;;  %v3662_v37 = vshll.u32 %v3574_v14, 16  ;;  %v3722_v22 = vrot.slane %v3574_v14, 1  ;;  %vm8172_vm7 = vmand %vm2913_vm0, %vm2923_vm12  ;;  %v8990_v34 = vcombine.low %v7860_v9, %v7863_v63  ;;  %v8991_v21 = vcombine.low %v7867_v12, %v7876_v13 }
 0x1bd   : > { %v3459_v29 = vrot.slane %v2877_v61, %v6385_v36  ;;  %v3660_v57 = vor.u32 %v3659_v55, %v3655_v27  ;;  %vm8189_vm4 = vmand %vm8172_vm7, %vm2935_vm8  ;;  %v3451_v56 = vrot.slane %v3437_v31, %v6385_v36  ;;  %v3418_v9 = vrot.slane %v2868_v49, %v6385_v36 }
 0x1be   : > { %v3427_v51 = vrot.slane %v8990_v34, %v6385_v36  ;;  %v3434_v59 = vrot.slane %v8991_v21, %v6385_v36  ;;  %v3664_v63 = vrot.slane %v3662_v37, 1  ;;  %v8196_v47 = vsel %vm1628_vm1, %v3721_v41, %v3722_v22  ;;  %v6068_v40 = vpop.eup %6067  ;;  %vm2997_vm10 = vmand %vm8172_vm7, %vm2970_vm5 }
 0x1bf   : > { %v3667_v13 = vshrl.u32 %v3575_v25, 16  ;;  %4534 = vmatmul.mubr.bf16.gmra.mxu0 %v8196_v47  ;;  %v3452_v15 = vcombine.low %v3444_v2, %v3451_v56  ;;  %v3554_v44 = vsel %vm8165_vm14, %v3418_v9, 0.0  ;;  %v3669_v39 = vshll.u32 %v3575_v25, 16  ;;  %vm5231_vm0 = vmpackc.low %vm8172_vm7, %vm8189_vm4 }
 0x1c0   : > { %v3435_v12 = vcombine.low %v3427_v51, %v3434_v59  ;;  %v3724_v50 = vrot.slane %v3575_v25, 1  ;;  %v2611_v31 = vadd.f32 1.0, %v6068_v40  ;;  %v8206_v49 = vsel %vm3581_vm15, %v3660_v57, %v3664_v63  ;;  %v6070_v24 = vpop.eup %6069 }
 0x1c1   : > { %v3576_v2 = vpack.c.bf16 %v3554_v44, %v3554_v44  ;;  %4436 = vmatprep.mubr.bf16.mxu1 %v8206_v49  ;;  %v3556_v53 = vsel %vm8172_vm7, %v3452_v15, 0.0  ;;  %v3671_v14 = vrot.slane %v3669_v39, 1  ;;  %v3557_v41 = vsel %vm2997_vm10, %v3459_v29, 0.0  ;;  %v6072_v27 = vpop.eup %6071 }
 0x1c2   : > { %v3555_v61 = vsel %vm8189_vm4, %v3435_v12, 0.0  ;;  %v8217_v25 = vpack.c.bf16 %v3452_v15, %v3435_v12  ;;  %v2612_v55 = vadd.f32 1.0, %v6070_v24  ;;  %6081 = vrcp.f32 %v2611_v31  ;;  %5206 = vmatmul.mubr.msk.bf16.gmra.mxu1 %vm8045_vm2, %v8059_v1  ;;  %v6074_v22 = vpop.eup %6073 }
 0x1c3   : > { %v3577_v17 = vpack.c.bf16 %v3556_v53, %v3555_v61  ;;  %v3674_v37 = vshll.u32 %v3576_v2, 16  ;;  %v2613_v34 = vadd.f32 1.0, %v6072_v27  ;;  %v3672_v51 = vor.u32 %v3671_v14, %v3667_v13  ;;  %v6076_v29 = vpop.eup %6075  ;;  %v8994_v14 = vld [vmem:[#allocation66_spill] sm:$0xff] }
 0x1c4   : > { %5233 = vmatprep.mubr.msk.bf16.mxu0 %vm5231_vm0, %v8217_v25  ;;  %v3725_v21 = vrot.slane %v3576_v2, 1  ;;  %v3578_v59 = vpack.c.bf16 %v3557_v41, %v3557_v41  ;;  %v2614_v57 = vadd.f32 1.0, %v6074_v22  ;;  %6083 = vrcp.f32 %v2612_v55 }
 0x1c5   : > { %v3676_v56 = vrot.slane %v3674_v37, 1  ;;  %v6078_v9 = vpop.eup %6077  ;;  %6085 = vrcp.f32 %v2613_v34  ;;  %v3738_v12 = vshll.u32 %v3577_v17, 16  ;;  %v3736_v39 = vshrl.u32 %v3577_v17, 16  ;;  %v8996_v34 = vld [vmem:[#allocation29_spill] sm:$0xff] }
 0x1c6   : > { %v8229_v63 = vsel %vm1628_vm1, %v3724_v50, %v3725_v21  ;;  %v3743_v40 = vshll.u32 %v3578_v59, 16  ;;  %v6080_v15 = vpop.eup %6079  ;;  %6087 = vrcp.f32 %v2614_v57  ;;  %v3750_v61 = vrot.slane %v3577_v17, 1  ;;  %v8995_v17 = vld [vmem:[#allocation64_spill] sm:$0xff] }
 0x1c7   : > { %v8232_v44 = vsel %vm3581_vm15, %v3672_v51, %v3676_v56  ;;  %4542 = vmatmul.mubr.bf16.gmra.mxu0 %v8229_v63  ;;  %v3740_v13 = vrot.slane %v3738_v12, 1  ;;  %v3751_v2 = vrot.slane %v3578_v59, 1  ;;  %v2878_v53 = vmul.f32 %v6076_v29, %v7361_v19 }
 0x1c8   : > { %4444 = vmatprep.mubr.bf16.mxu1 %v8232_v44  ;;  %v3745_v31 = vrot.slane %v3743_v40, 1  ;;  %4679 = vmatprep.mubr.bf16.mxu0 %v7754_v3  ;;  %v2879_v41 = vmul.f32 %v6078_v9, %v8994_v14  ;;  %v2897_v55 = vadd.s32 9, %v8840_v52  ;;  %v2886_v37 = vmul.f32 %v8131_v62, %v8995_v17  ;;  %v5722_v52 = vld [vmem:[%s8633_s3 + $0x230] sm:$0xff]   ;;  %v8997_v62 = vld [vmem:[#allocation61_spill] sm:$0xff]  ;;  %v5723_v40 = vld [vmem:[%s8633_s3 + $0x228] sm:$0xff]  }
 0x1c9   : > { %v3741_v50 = vor.u32 %v3740_v13, %v3736_v39  ;;  %v8238_v24 = vsel %vm1628_vm1, %v3750_v61, %v3751_v2  ;;  %v2880_v51 = vmul.f32 %v6080_v15, %v8996_v34  ;;  %v2885_v59 = vmul.f32 %v8093_v5, %v8997_v62  ;;  %v9000_v5 = vld [vmem:[#allocation31_spill] sm:$0xff]  ;;  %v5724_v61 = vld [vmem:[%s8633_s3 + $0x220] sm:$0xff]   ;;  %v5726_v34 = vld [vmem:[%s8633_s3 + $0x210] sm:$0xff]  }
 0x1ca   : > { %5209 = vmatmul.mubr.msk.bf16.gmra.mxu1 %vm8153_vm9, %v8157_v38  ;;  %v3460_v22 = vcombine.low %v2878_v53, %v2879_v41  ;;  %vm2914_vm12 = vcmp.ge.s32.totalorder %v2897_v55, 0  ;;  %vm2924_vm14 = vcmp.lt.s32.totalorder %v2897_v55, 16  ;;  %v3500_v56 = vrot.slane %v2886_v37, %v6385_v36 }
 0x1cb   : > { %4582 = vmatprep.mubr.bf16.mxu1 %v7610_v58  ;;  %v8247_v27 = vsel %vm3581_vm15, %v3741_v50, %v3745_v31  ;;  %v9004_v50 = vld [vmem:[#allocation32_spill] sm:$0xff] }
 0x1cc   : > { %v3468_v57 = vrot.slane %v3460_v22, %v6385_v36 }
 0x1cf   : > { %v6082_v19 = vpop.eup %6081  ;;  %5236 = vmatmul.mubr.msk.bf16.vlgmr.msra.gmra.mxu0 %vm7510_vm11, %v7525_v45  ;;  %vm8266_vm11 = vmand %vm2914_vm12, %vm2924_vm14 }
 0x1d0   : > { %v2881_v58 = vmul.f32 %v6082_v19, %v8050_v7  ;;  %4687 = vmatprep.mubr.bf16.mxu0 %v7903_v6  ;;  %vm3000_vm10 = vmand %vm8266_vm11, %vm2970_vm5 }
 0x1d1   : > { %v6084_v21 = vpop.eup %6083  ;;  %v3560_v39 = vsel %vm3000_vm10, %v3500_v56, 0.0  ;;  %vm8293_vm5 = vmand %vm8266_vm11, %vm2935_vm8  ;;  %vm4841_vm8 = vcmask 97280  }
 0x1d2   : > { %v6086_v29 = vpop.eup %6085  ;;  %v2882_v48 = vmul.f32 %v6084_v21, %v8068_v42  ;;  %v3461_v45 = vcombine.low %v2880_v51, %v2881_v58  ;;  %4583 = vmatmul.mubr.bf16.vlgmr.msra.gmra.mxu1 %v7631_v54  ;;  %v3580_v2 = vpack.c.bf16 %v3560_v39, %v3560_v39 }
 0x1d3   : > { %v6088_v9 = vpop.eup %6087  ;;  %v2883_v12 = vmul.f32 %v6086_v29, %v8064_v23  ;;  %5579 = vmatpush3.bf16.msra.mxu1 %v7789_v10  ;;  %4590 = vmatprep.mubr.bf16.mxu1 %v9000_v5 }
 0x1d4   : > { %v2884_v54 = vmul.f32 %v6088_v9, %v8076_v18  ;;  %v3475_v42 = vrot.slane %v3461_v45, %v6385_v36  ;;  %5580 = vmatprep.subr.bf16.mxu1 %v5722_v52  ;;  %v3762_v55 = vshll.u32 %v3580_v2, 16 }
 0x1d5   : > { %v3477_v15 = vcombine.low %v2882_v48, %v2883_v12 }
 0x1d6   : > { %v8283_v23 = vcombine.low %v3468_v57, %v3475_v42  ;;  %v3478_v10 = vcombine.low %v2884_v54, %v2885_v59  ;;  %v3764_v19 = vrot.slane %v3762_v55, 1 }
 0x1d7   : > { %v3485_v13 = vrot.slane %v3477_v15, %v6385_v36  ;;  %5239 = vmatmul.mubr.msk.bf16.gmra.mxu0 %vm7721_vm13, %v7730_v11  ;;  %5581 = vmatpush3.bf16.msra.mxu1 %v5722_v52 }
 0x1d8   : > { %v3492_v31 = vrot.slane %v3478_v10, %v6385_v36  ;;  %4695 = vmatprep.mubr.bf16.mxu0 %v8006_v46  ;;  %5582 = vmatprep.subr.bf16.mxu1 %v5723_v40  ;;  %v3558_v33 = vsel %vm8293_vm5, %v8283_v23, 0.0  ;;  %v5725_v36 = vld [vmem:[%s8633_s3 + $0x218] sm:$0xff]  }
 0x1da   : > { %v3493_v11 = vcombine.low %v3485_v13, %v3492_v31  ;;  %4591 = vmatmul.mubr.bf16.gmra.mxu1 %v7754_v3  ;;  %v3770_v3 = vrot.slane %v3580_v2, 1 }
 0x1db   : > { %4598 = vmatprep.mubr.bf16.mxu1 %v9004_v50  ;;  %5583 = vmatpush3.bf16.msra.mxu1 %v5723_v40 }
 0x1dc   : > { %5584 = vmatprep.subr.bf16.mxu1 %v5724_v61  ;;  %v3559_v53 = vsel %vm8266_vm11, %v3493_v11, 0.0  ;;  %v5256_v14 = vpack.c.bf16 %v3493_v11, %v8283_v23 }
 0x1dd   : > { %v3579_v41 = vpack.c.bf16 %v3559_v53, %v3558_v33 }
 0x1df   : > { %5242 = vmatmul.mubr.msk.bf16.gmra.mxu0 %vm7849_vm6, %v7857_v32  ;;  %5585 = vmatpush3.bf16.msra.mxu1 %v5724_v61  ;;  %v3755_v17 = vshrl.u32 %v3579_v41, 16  ;;  %v3757_v37 = vshll.u32 %v3579_v41, 16  ;;  %v3769_v22 = vrot.slane %v3579_v41, 1  ;;  %v5727_v32 = vld [vmem:[%s8633_s3 + $0x208] sm:$0xff]  }
 0x1e0   : > { %4703 = vmatprep.mubr.bf16.mxu0 %v8096_v16  ;;  %5586 = vmatprep.subr.bf16.mxu1 %v5725_v36 }
 0x1e1   : > { %v3759_v51 = vrot.slane %v3757_v37, 1  ;;  %v3771_v58 = vsel %vm1628_vm1, %v3769_v22, %v3770_v3  ;;  %vm5255_vm1 = vmpackc.low %vm8266_vm11, %vm8293_vm5 }
 0x1e2   : > { %4599 = vmatmul.mubr.bf16.gmra.mxu1 %v7903_v6  ;;  %v5728_v6 = vld [vmem:[%s8633_s3 + $0x200] sm:$0xff]  }
 0x1e3   : > { %4606 = vmatprep.mubr.bf16.mxu1 %v7985_v35  ;;  %5587 = vmatpush3.bf16.msra.mxu1 %v5725_v36  ;;  %v3760_v8 = vor.u32 %v3759_v51, %v3755_v17 }
 0x1e4   : > { %5588 = vmatprep.subr.bf16.mxu1 %v5726_v34 }
 0x1e5   : > { %v3765_v52 = vsel %vm3581_vm15, %v3760_v8, %v3764_v19 }
 0x1e7   : > { %5245 = vmatmul.mubr.msk.bf16.gmra.mxu0 %vm7953_vm3, %v7962_v26  ;;  %5589 = vmatpush3.bf16.msra.mxu1 %v5726_v34 }
 0x1e8   : > { %4711 = vmatprep.mubr.bf16.mxu0 %v8206_v49  ;;  %5590 = vmatprep.subr.bf16.mxu1 %v5727_v32 }
 0x1ea   : > { %4607 = vmatmul.mubr.bf16.gmra.mxu1 %v8006_v46 }
 0x1eb   : > { %4614 = vmatprep.mubr.bf16.mxu1 %v8081_v0  ;;  %5591 = vmatpush3.bf16.msra.mxu1 %v5727_v32 }
 0x1ec   : > { %5592 = vmatprep.subr.bf16.mxu1 %v5728_v6 }
 0x1ef   : > { %5248 = vmatmul.mubr.msk.bf16.gmra.mxu0 %vm8045_vm2, %v8059_v1  ;;  %5593 = vmatpush3.bf16.msra.mxu1 %v5728_v6 }
 0x1f0   : > { %4719 = vmatprep.mubr.bf16.mxu0 %v8232_v44 }
 0x1f2   : > { %4615 = vmatmul.mubr.bf16.gmra.mxu1 %v8096_v16 }
 0x1f3   : > { %4622 = vmatprep.mubr.bf16.mxu1 %v8196_v47 }
 0x1f7   : > { %5251 = vmatmul.mubr.msk.bf16.gmra.mxu0 %vm8153_vm9, %v8157_v38 }
 0x1f8   : > { %4727 = vmatprep.mubr.bf16.mxu0 %v8247_v27 }
 0x1fa   : > { %4623 = vmatmul.mubr.bf16.gmra.mxu1 %v8206_v49 }
 0x1fb   : > { %4630 = vmatprep.mubr.bf16.mxu1 %v8229_v63 }
 0x1ff   : > { %5254 = vmatmul.mubr.msk.bf16.gmra.mxu0 %vm5231_vm0, %v8217_v25 }
 0x200   : > { %4735 = vmatprep.mubr.bf16.mxu0 %v3765_v52 }
 0x202   : > { %4631 = vmatmul.mubr.bf16.gmra.mxu1 %v8232_v44 }
 0x203   : > { %4638 = vmatprep.mubr.bf16.mxu1 %v8238_v24 }
 0x207   : > { %5257 = vmatmul.mubr.msk.bf16.gmra.mxu0 %vm5255_vm1, %v5256_v14 }
 0x20a   : > { %4639 = vmatmul.mubr.bf16.gmra.mxu1 %v8247_v27 }
 0x20b   : > { %5594 = vmatprep.mubr.bf16.mxu1 %v9000_v5 }
 0x212   : > { %5595 = vmatmul.mubr.bf16.vlgmr.msra.gmra.mxu1 %v9004_v50 }
 0x213   : > { %5598 = vmatprep.mubr.bf16.mxu1 %v7985_v35  ;;  %v8371_v35 = vld [vmem:[%s8634_s4] ss:$0 sm:$0xff] }
 0x21a   : > { %5599 = vmatmul.mubr.bf16.gmra.mxu1 %v8081_v0 }
 0x21b   : > { %5602 = vmatprep.mubr.bf16.mxu1 %v8196_v47 }
 0x222   : > { %5603 = vmatmul.mubr.bf16.gmra.mxu1 %v8229_v63 }
 0x223   : > { %5606 = vmatprep.mubr.bf16.mxu1 %v8238_v24 }
 0x22a   : > { %5607 = vmatmul.mubr.bf16.gmra.mxu1 %v3771_v58 }
 0x22d   : > { %v5356_v43 = vpop.f32.mrf.mxu0 }
 0x22f   : > { %v5357_v26 = vpop.f32.mrf.mxu0 }
 0x230   : > { %v5358_v46 = vadd.f32 %v5357_v26, %v5356_v43 }
 0x231   : > { %v5359_v4 = vpop.f32.mrf.mxu0 }
 0x233   : > { %v5360_v1 = vpop.f32.mrf.mxu0 }
 0x234   : > { %v5292_v16 = vpop.f32.mrf.mxu1  ;;  %v5361_v28 = vadd.f32 %v5360_v1, %v5359_v4 }
 0x236   : > { %v5293_v0 = vpop.f32.mrf.mxu1 }
 0x237   : > { %v5294_v38 = vadd.f32 %v5293_v0, %v5292_v16 }
 0x238   : > { %v5295_v60 = vpop.f32.mrf.mxu1 }
 0x239   : > { %v4391_v30 = vadd.f32 %v5294_v38, %v8371_v35 }
 0x23a   : > { %v5296_v47 = vpop.f32.mrf.mxu1 }
 0x23b   : > { %v5297_v49 = vadd.f32 %v5296_v47, %v5295_v60  ;;  %v8374_v25 = vadd.f32 %v5358_v46, %v4391_v30 }
 0x23d   : > { %v4394_v63 = vadd.f32 %v5297_v49, %v8371_v35 }
 0x23e   : > { %v5362_v44 = vpop.f32.mrf.mxu0 }
 0x23f   : > { %v8377_v24 = vadd.f32 %v5361_v28, %v4394_v63 }
 0x240   : > { %v5363_v27 = vpop.f32.mrf.mxu0 }
 0x241   : > { %v5364_v21 = vadd.f32 %v5363_v27, %v5362_v44  ;;  %v5298_v62 = vpop.f32.mrf.mxu1 }
 0x242   : > { %v5365_v59 = vpop.f32.mrf.mxu0 }
 0x243   : > { %v5299_v29 = vpop.f32.mrf.mxu1 }
 0x244   : > { %v5366_v57 = vpop.f32.mrf.mxu0  ;;  %v5300_v48 = vadd.f32 %v5299_v29, %v5298_v62 }
 0x245   : > { %v5367_v45 = vadd.f32 %v5366_v57, %v5365_v59  ;;  %v5301_v7 = vpop.f32.mrf.mxu1 }
 0x246   : > { %v4399_v56 = vadd.f32 %v5300_v48, %v8371_v35 }
 0x247   : > { %v5302_v9 = vpop.f32.mrf.mxu1 }
 0x248   : > { %v5303_v12 = vadd.f32 %v5302_v9, %v5301_v7  ;;  %v8380_v5 = vadd.f32 %v5364_v21, %v4399_v56 }
 0x24a   : > { %v4402_v54 = vadd.f32 %v5303_v12, %v8371_v35 }
 0x24c   : > { %v8383_v42 = vadd.f32 %v5367_v45, %v4402_v54 }
 0x250   : > { %v5368_v40 = vpop.f32.mrf.mxu0 }
 0x252   : > { %v5369_v15 = vpop.f32.mrf.mxu0  ;;  %v5304_v23 = vpop.f32.mrf.mxu1 }
 0x253   : > { %v5370_v10 = vadd.f32 %v5369_v15, %v5368_v40 }
 0x254   : > { %v5371_v39 = vpop.f32.mrf.mxu0  ;;  %v5305_v13 = vpop.f32.mrf.mxu1 }
 0x255   : > { %v5306_v20 = vadd.f32 %v5305_v13, %v5304_v23 }
 0x256   : > { %v5372_v18 = vpop.f32.mrf.mxu0  ;;  %v5307_v31 = vpop.f32.mrf.mxu1 }
 0x257   : > { %v5373_v61 = vadd.f32 %v5372_v18, %v5371_v39  ;;  %v4407_v2 = vadd.f32 %v5306_v20, %v8371_v35 }
 0x258   : > { %v5308_v11 = vpop.f32.mrf.mxu1 }
 0x259   : > { %v5309_v33 = vadd.f32 %v5308_v11, %v5307_v31  ;;  %v8386_v50 = vadd.f32 %v5370_v10, %v4407_v2 }
 0x25b   : > { %v4410_v36 = vadd.f32 %v5309_v33, %v8371_v35 }
 0x25d   : > { %v8389_v53 = vadd.f32 %v5373_v61, %v4410_v36 }
 0x25e   : > { %v5374_v14 = vpop.f32.mrf.mxu0 }
 0x260   : > { %v5310_v41 = vpop.f32.mrf.mxu1  ;;  %v5375_v55 = vpop.f32.mrf.mxu0 }
 0x261   : > { %v5376_v3 = vadd.f32 %v5375_v55, %v5374_v14 }
 0x262   : > { %v5311_v17 = vpop.f32.mrf.mxu1  ;;  %v5377_v37 = vpop.f32.mrf.mxu0 }
 0x263   : > { %v5312_v22 = vadd.f32 %v5311_v17, %v5310_v41 }
 0x264   : > { %v5313_v34 = vpop.f32.mrf.mxu1  ;;  %v5378_v51 = vpop.f32.mrf.mxu0 }
 0x265   : > { %v4415_v19 = vadd.f32 %v5312_v22, %v8371_v35  ;;  %v5379_v58 = vadd.f32 %v5378_v51, %v5377_v37 }
 0x266   : > { %v5314_v8 = vpop.f32.mrf.mxu1 }
 0x267   : > { %v5315_v32 = vadd.f32 %v5314_v8, %v5313_v34  ;;  %v8392_v52 = vadd.f32 %v5376_v3, %v4415_v19 }
 0x269   : > { %v5380_v6 = vpop.f32.mrf.mxu0  ;;  %v4418_v43 = vadd.f32 %v5315_v32, %v8371_v35 }
 0x26b   : > { %v5381_v26 = vpop.f32.mrf.mxu0  ;;  %v8395_v46 = vadd.f32 %v5379_v58, %v4418_v43 }
 0x26c   : > { %v5382_v4 = vadd.f32 %v5381_v26, %v5380_v6  ;;  %v5316_v1 = vpop.f32.mrf.mxu1 }
 0x26d   : > { %v5383_v16 = vpop.f32.mrf.mxu0 }
 0x26e   : > { %v5317_v28 = vpop.f32.mrf.mxu1 }
 0x26f   : > { %v5384_v0 = vpop.f32.mrf.mxu0  ;;  %v5318_v38 = vadd.f32 %v5317_v28, %v5316_v1 }
 0x270   : > { %v5385_v60 = vadd.f32 %v5384_v0, %v5383_v16  ;;  %v5319_v30 = vpop.f32.mrf.mxu1 }
 0x271   : > { %v4423_v47 = vadd.f32 %v5318_v38, %v8371_v35 }
 0x272   : > { %v5320_v49 = vpop.f32.mrf.mxu1 }
 0x273   : > { %v5386_v63 = vpop.f32.mrf.mxu0  ;;  %v5321_v44 = vadd.f32 %v5320_v49, %v5319_v30  ;;  %v8398_v27 = vadd.f32 %v5382_v4, %v4423_v47 }
 0x275   : > { %v5387_v21 = vpop.f32.mrf.mxu0  ;;  %v4426_v62 = vadd.f32 %v5321_v44, %v8371_v35 }
 0x276   : > { %v5388_v59 = vadd.f32 %v5387_v21, %v5386_v63  ;;  %v5322_v29 = vpop.f32.mrf.mxu1 }
 0x277   : > { %v5389_v57 = vpop.f32.mrf.mxu0  ;;  %v8401_v48 = vadd.f32 %v5385_v60, %v4426_v62 }
 0x278   : > { %v5323_v45 = vpop.f32.mrf.mxu1 }
 0x279   : > { %9005 = vst [vmem:[#allocation33_spill] sm:$0xff] %v8401_v48  ;;  %v5390_v7 = vpop.f32.mrf.mxu0  ;;  %v5324_v56 = vadd.f32 %v5323_v45, %v5322_v29 }
 0x27a   : > { %v5391_v9 = vadd.f32 %v5390_v7, %v5389_v57  ;;  %v5325_v12 = vpop.f32.mrf.mxu1 }
 0x27b   : > { %v4431_v54 = vadd.f32 %v5324_v56, %v8371_v35 }
 0x27c   : > { %v5326_v40 = vpop.f32.mrf.mxu1 }
 0x27d   : > { %v5327_v15 = vadd.f32 %v5326_v40, %v5325_v12  ;;  %v8404_v23 = vadd.f32 %v5388_v59, %v4431_v54 }
 0x27f   : > { %v5392_v10 = vpop.f32.mrf.mxu0  ;;  %v4434_v39 = vadd.f32 %v5327_v15, %v8371_v35 }
 0x281   : > { %v5393_v13 = vpop.f32.mrf.mxu0  ;;  %v8407_v31 = vadd.f32 %v5391_v9, %v4434_v39 }
 0x282   : > { %v5394_v20 = vadd.f32 %v5393_v13, %v5392_v10  ;;  %v5328_v18 = vpop.f32.mrf.mxu1 }
 0x283   : > { %9006 = vst [vmem:[#allocation40_spill] sm:$0xff] %v8407_v31  ;;  %v5395_v61 = vpop.f32.mrf.mxu0 }
 0x284   : > { %v5329_v2 = vpop.f32.mrf.mxu1 }
 0x285   : > { %v5396_v11 = vpop.f32.mrf.mxu0  ;;  %v5330_v33 = vadd.f32 %v5329_v2, %v5328_v18 }
 0x286   : > { %v5397_v36 = vadd.f32 %v5396_v11, %v5395_v61  ;;  %v5331_v14 = vpop.f32.mrf.mxu1 }
 0x287   : > { %v4439_v41 = vadd.f32 %v5330_v33, %v8371_v35  ;;  %v8410_v55 = vpop.f32.mrf.mxu0 }
 0x288   : > { %9007 = vst [vmem:[#allocation11_spill] sm:$0xff] %v8410_v55  ;;  %v5332_v3 = vpop.f32.mrf.mxu1 }
 0x289   : > { %v8412_v17 = vpop.f32.mrf.mxu0  ;;  %v5333_v37 = vadd.f32 %v5332_v3, %v5331_v14  ;;  %v8414_v22 = vadd.f32 %v5394_v20, %v4439_v41 }
 0x28a   : > { %9008 = vst [vmem:[#allocation36_spill] sm:$0xff] %v8412_v17  ;;  %v5334_v34 = vpop.f32.mrf.mxu1 }
 0x28b   : > { %9009 = vst [vmem:[#allocation35_spill] sm:$0xff] %v8414_v22  ;;  %v4442_v51 = vadd.f32 %v5333_v37, %v8371_v35  ;;  %v8417_v19 = vpop.f32.mrf.mxu0 }
 0x28c   : > { %9010 = vst [vmem:[#allocation27_spill] sm:$0xff] %v8417_v19  ;;  %v5335_v58 = vpop.f32.mrf.mxu1 }
 0x28d   : > { %v8419_v8 = vpop.f32.mrf.mxu0  ;;  %v8421_v32 = vadd.f32 %v5335_v58, %v5334_v34  ;;  %v8423_v6 = vadd.f32 %v5397_v36, %v4442_v51 }
 0x28e   : > { %9011 = vst [vmem:[#allocation37_spill] sm:$0xff] %v8419_v8  ;;  %v5337_v43 = vpop.f32.mrf.mxu1 }
 0x28f   : > { %9012 = vst [vmem:[#allocation34_spill] sm:$0xff] %v8423_v6  ;;  %v8425_v26 = vpop.f32.mrf.mxu0 }
 0x290   : > { %v5338_v4 = vpop.f32.mrf.mxu1 }
 0x291   : > { %v8427_v1 = vpop.f32.mrf.mxu0  ;;  %v8429_v16 = vadd.f32 %v5338_v4, %v5337_v43 }
 0x292   : > { %v5420_v28 = vpop.f32.mrf.mxu1 }
 0x293   : > { %9013 = vst [vmem:[#allocation28_spill] sm:$0xff] %v8429_v16  ;;  %v8431_v0 = vpop.f32.mrf.mxu0 }
 0x294   : > { %v5421_v38 = vpop.f32.mrf.mxu1 }
 0x295   : > { %v8433_v60 = vpop.f32.mrf.mxu0  ;;  %v5422_v17 = vadd.f32 %v5421_v38, %v5420_v28  ;;  %v5486_v28 = vadd.f32 %v8427_v1, %v8425_v26 }
 0x296   : > { %v5423_v30 = vpop.f32.mrf.mxu1 }
 0x297   : > { %v5490_v47 = vpop.f32.mrf.mxu0 }
 0x298   : > { %v5424_v49 = vpop.f32.mrf.mxu1 }
 0x299   : > { %v5491_v63 = vpop.f32.mrf.mxu0 }
 0x29a   : > { %v5426_v44 = vpop.f32.mrf.mxu1 }
 0x29b   : > { %v8435_v21 = vpop.f32.mrf.mxu0 }
 0x29c   : > { %v5427_v62 = vpop.f32.mrf.mxu1 }
 0x29d   : > { %v8437_v59 = vpop.f32.mrf.mxu0 }
 0x29e   : > { %v5429_v29 = vpop.f32.mrf.mxu1 }
 0x29f   : > { %v8439_v57 = vpop.f32.mrf.mxu0 }
 0x2a0   : > { %v5430_v45 = vpop.f32.mrf.mxu1 }
 0x2a1   : > { %v8441_v7 = vpop.f32.mrf.mxu0 }
 0x2a2   : > { %v5432_v56 = vpop.f32.mrf.mxu1 }
 0x2a3   : > { %v8443_v9 = vpop.f32.mrf.mxu0 }
 0x2a4   : > { %v5433_v12 = vpop.f32.mrf.mxu1 }
 0x2a5   : > { %v8445_v54 = vpop.f32.mrf.mxu0 }
 0x2a6   : > { %v8447_v40 = vpop.f32.mrf.mxu1 }
 0x2a7   : > { %v8449_v15 = vpop.f32.mrf.mxu0 }
 0x2a8   : > { %v8451_v10 = vpop.f32.mrf.mxu1 }
 0x2a9   : > { %v8453_v39 = vpop.f32.mrf.mxu0 }
 0x2aa   : > { %v5438_v13 = vpop.f32.mrf.mxu1 }
 0x2ab   : > { %v8455_v20 = vpop.f32.mrf.mxu0 }
 0x2ac   : > { %v5439_v18 = vpop.f32.mrf.mxu1 }
 0x2ad   : > { %v8457_v61 = vpop.f32.mrf.mxu0 }
 0x2ae   : > { %v5441_v2 = vpop.f32.mrf.mxu1 }
 0x2af   : > { %v8459_v11 = vpop.f32.mrf.mxu0 }
 0x2b0   : > { %9014 = vst [vmem:[#allocation8_spill] sm:$0xff] %v8459_v11  ;;  %v5442_v33 = vpop.f32.mrf.mxu1 }
 0x2b1   : > { %v8461_v36 = vpop.f32.mrf.mxu0 }
 0x2b2   : > { %9015 = vst [vmem:[#allocation15_spill] sm:$0xff] %v8461_v36  ;;  %v8463_v14 = vpop.f32.mrf.mxu1  ;;  %v5428_v36 = vadd.f32 %v5427_v62, %v5426_v44  ;;  %v5440_v62 = vadd.f32 %v5439_v18, %v5438_v13 }
 0x2b3   : > { %v8465_v41 = vpop.f32.mrf.mxu0 }
 0x2b4   : > { %9016 = vst [vmem:[#allocation43_spill] sm:$0xff] %v8465_v41  ;;  %v8467_v3 = vpop.f32.mrf.mxu1 }
 0x2b5   : > { %v8471_v34 = vpop.f32.mrf.mxu0 }
 0x2b6   : > { %v8469_v37 = vpop.f32.mrf.mxu1  ;;  %9017 = vst [vmem:[#allocation49_spill] sm:$0xff] %v8471_v34 }
 0x2b7   : > { %v8475_v43 = vpop.f32.mrf.mxu0 }
 0x2b8   : > { %v8473_v51 = vpop.f32.mrf.mxu1  ;;  %9018 = vst [vmem:[#allocation52_spill] sm:$0xff] %v8475_v43 }
 0x2b9   : > { %v8479_v22 = vpop.f32.mrf.mxu0 }
 0x2ba   : > { %v5450_v58 = vpop.f32.mrf.mxu1  ;;  %9019 = vst [vmem:[#allocation38_spill] sm:$0xff] %v8479_v22 }
 0x2bb   : > { %v8486_v19 = vpop.f32.mrf.mxu0 }
 0x2bc   : > { %v5451_v4 = vpop.f32.mrf.mxu1  ;;  %9021 = vst [vmem:[#allocation42_spill] sm:$0xff] %v8486_v19  ;;  %v5431_v19 = vadd.f32 %v5430_v45, %v5429_v29 }
 0x2bd   : > { %v8493_v16 = vpop.f32.mrf.mxu0  ;;  %v5452_v45 = vadd.f32 %v5451_v4, %v5450_v58  ;;  %v9030_v58 = vld [vmem:[#allocation36_spill] sm:$0xff] }
 0x2be   : > { %v8477_v6 = vpop.f32.mrf.mxu1  ;;  %9024 = vst [vmem:[#allocation25_spill] sm:$0xff] %v8493_v16  ;;  %v5425_v16 = vadd.f32 %v5424_v49, %v5423_v30  ;;  %v4596_v38 = vadd.f32 %v5431_v19, %v8383_v42  ;;  %v5495_v30 = vadd.f32 %v8437_v59, %v8435_v21  ;;  %v5489_v42 = vadd.f32 %v8433_v60, %v8431_v0 }
 0x2bf   : > { %v8500_v55 = vpop.f32.mrf.mxu0  ;;  %v4609_v19 = vadd.f32 %v5440_v62, %v8392_v52  ;;  %v5437_v0 = vadd.f32 %v8451_v10, %v8447_v40  ;;  %v5498_v21 = vadd.f32 %v8441_v7, %v8439_v57  ;;  %v5446_v57 = vadd.f32 %v8467_v3, %v8463_v14 }
 0x2c0   : > { %v8481_v8 = vpop.f32.mrf.mxu1  ;;  %9026 = vst [vmem:[#allocation17_spill] sm:$0xff] %v8500_v55  ;;  %v5501_v7 = vadd.f32 %v8445_v54, %v8443_v9  ;;  %v9027_v54 = vld [vmem:[#allocation52_spill] sm:$0xff] }
 0x2c1   : > { %v8508_v43 = vpop.f32.mrf.mxu0  ;;  %v4604_v10 = vadd.f32 %v5437_v0, %v8389_v53  ;;  %v5455_v53 = vadd.f32 %v8481_v8, %v8477_v6  ;;  %v4617_v9 = vadd.f32 %v5446_v57, %v8398_v27  ;;  %v9028_v3 = vld [vmem:[#allocation38_spill] sm:$0xff]  ;;  %v9040_v0 = vld [vmem:[#allocation27_spill] sm:$0xff] }
 0x2c2   : > { %v8484_v41 = vpop.f32.mrf.mxu1 }
 0x2c3   : > { %9020 = vst [vmem:[#allocation41_spill] sm:$0xff] %v8484_v41  ;;  %v4701_v6 = vadd.f32 %v5501_v7, %v4604_v10 }
 0x2c4   : > { %v8488_v48 = vpop.f32.mrf.mxu1 }
 0x2c5   : > { %9022 = vst [vmem:[#allocation4_spill] sm:$0xff] %v8488_v48  ;;  %v4593_v48 = vadd.f32 %v5428_v36, %v8380_v5  ;;  %v5449_v36 = vadd.f32 %v8473_v51, %v8469_v37  ;;  %v9033_v37 = vld [vmem:[#allocation40_spill] sm:$0xff] }
 0x2c6   : > { %v8491_v34 = vpop.f32.mrf.mxu1  ;;  %v4628_v51 = vadd.f32 %v5455_v53, %v9033_v37 }
 0x2c7   : > { %9023 = vst [vmem:[#allocation44_spill] sm:$0xff] %v8491_v34  ;;  %v4585_v34 = vadd.f32 %v5422_v17, %v8374_v25  ;;  %v5434_v25 = vadd.f32 %v5433_v12, %v5432_v56  ;;  %v4588_v17 = vadd.f32 %v5425_v16, %v8377_v24  ;;  %v4693_v24 = vadd.f32 %v5495_v30, %v4596_v38  ;;  %v9032_v38 = vld [vmem:[#allocation15_spill] sm:$0xff]  ;;  %v9034_v30 = vld [vmem:[#allocation28_spill] sm:$0xff] }
 0x2c8   : > { %v8495_v31 = vpop.f32.mrf.mxu1 }
 0x2c9   : > { %9025 = vst [vmem:[#allocation39_spill] sm:$0xff] %v8495_v31  ;;  %v5492_v31 = vadd.f32 %v5491_v63, %v5490_v47  ;;  %v4682_v1 = vadd.f32 %v5486_v28, %v4585_v34  ;;  %v5443_v47 = vadd.f32 %v5442_v33, %v5441_v2  ;;  %v4601_v16 = vadd.f32 %v5434_v25, %v8386_v50  ;;  %v9029_v34 = vld [vmem:[#allocation11_spill] sm:$0xff]  ;;  %v9031_v28 = vld [vmem:[#allocation8_spill] sm:$0xff] }
 0x2ca   : > { %v8498_v11 = vpop.f32.mrf.mxu1  ;;  %v4685_v52 = vadd.f32 %v5489_v42, %v4588_v17  ;;  %v4625_v2 = vadd.f32 %v5452_v45, %v8404_v23  ;;  %v4447_v33 = vadd.f32 %v8421_v32, %v8371_v35  ;;  %v5516_v23 = vadd.f32 %v9028_v3, %v9027_v54 }
 0x2cb   : > { %v4690_v55 = vadd.f32 %v5492_v31, %v4593_v48  ;;  %v8525_v48 = vpop.f32.mrf.mxu0  ;;  %v4612_v50 = vadd.f32 %v5443_v47, %v8395_v46  ;;  %v5400_v4 = vadd.f32 %v9030_v58, %v9029_v34  ;;  %v5510_v32 = vadd.f32 %v9032_v38, %v9031_v28  ;;  %v9036_v47 = vld [vmem:[#allocation42_spill] sm:$0xff] }
 0x2cc   : > { %v8502_v41 = vpop.f32.mrf.mxu1  ;;  %v4722_v17 = vadd.f32 %v5516_v23, %v4625_v2 }
 0x2cd   : > { %v8539_v59 = vpop.f32.mrf.mxu0  ;;  %v5464_v27 = vadd.f32 %v8502_v41, %v8498_v11  ;;  %v4714_v41 = vadd.f32 %v5510_v32, %v4617_v9 }
 0x2ce   : > { %v8505_v22 = vpop.f32.mrf.mxu1  ;;  %v9045_v2 = vld [vmem:[#allocation44_spill] sm:$0xff] }
 0x2cf   : > { %v5526_v13 = vpop.f32.mrf.mxu0 }
 0x2d0   : > { %v8510_v44 = vpop.f32.mrf.mxu1  ;;  %v9046_v53 = vld [vmem:[#allocation39_spill] sm:$0xff] }
 0x2d1   : > { %v5527_v62 = vpop.f32.mrf.mxu0 }
 0x2d2   : > { %v5596_v5 = vpop.f32.mrf.mxu1 }
 0x2d3   : > { %v4787_v26 = vadd.f32 %v5596_v5, %v4690_v55  ;;  %v5504_v55 = vadd.f32 %v8453_v39, %v8449_v15  ;;  %v4698_v15 = vadd.f32 %v5498_v21, %v4601_v16  ;;  %v5507_v39 = vadd.f32 %v8457_v61, %v8455_v20  ;;  %v9038_v16 = vld [vmem:[#allocation41_spill] sm:$0xff]  ;;  %v9042_v21 = vld [vmem:[#allocation43_spill] sm:$0xff] }
 0x2d4   : > { %v4778_v31 = vpop.f32.mrf.mxu1 }
 0x2d5   : > { %4844 = vst.msk [vmem:[%s8518_s28 + $0x10] sm:$0xff] %vm4841_vm8, %v4787_v26  ;;  %v4779_v49 = vadd.f32 %v4778_v31, %v4682_v1  ;;  %v4706_v12 = vadd.f32 %v5504_v55, %v4609_v19  ;;  %v4709_v61 = vadd.f32 %v5507_v39, %v4612_v50  ;;  %v4450_v26 = vadd.f32 %v9034_v30, %v8371_v35  ;;  %v9035_v1 = vld [vmem:[#allocation33_spill] sm:$0xff]  ;;  %v5529_v50 = vpop.f32.mrf.mxu0 }
 0x2d6   : > { %v5597_v63 = vpop.f32.mrf.mxu1  ;;  %v4620_v42 = vadd.f32 %v5449_v36, %v9035_v1  ;;  %v4544_v31 = vadd.f32 %v5400_v4, %v4447_v33  ;;  %v9043_v35 = vld [vmem:[#allocation49_spill] sm:$0xff] }
 0x2d7   : > { %4842 = vst.msk [vmem:[%s8518_s28] sm:$0xff] %vm4841_vm8, %v4779_v49  ;;  %v4790_v60 = vadd.f32 %v5597_v63, %v4693_v24  ;;  %v9037_v49 = vld [vmem:[#allocation25_spill] sm:$0xff]  ;;  %v9039_v63 = vld [vmem:[#allocation4_spill] sm:$0xff] }
 0x2d8   : > { %v4781_v29 = vpop.f32.mrf.mxu1  ;;  %v5519_v24 = vadd.f32 %v9037_v49, %v9036_v47  ;;  %v5458_v55 = vadd.f32 %v9039_v63, %v9038_v16  ;;  %v9047_v33 = vld [vmem:[#allocation17_spill] sm:$0xff] }
 0x2d9   : > { %4845 = vst.msk [vmem:[%s8518_s28 + $0x18] sm:$0xff] %vm4841_vm8, %v4790_v60  ;;  %v4782_v56 = vadd.f32 %v4781_v29, %v4685_v52  ;;  %v9041_v60 = vld [vmem:[#allocation37_spill] sm:$0xff]  ;;  %v5513_v29 = vadd.f32 %v9043_v35, %v9042_v21  ;;  %v5522_v36 = vadd.f32 %v8508_v43, %v9047_v33  ;;  %v5525_v43 = vadd.f32 %v8539_v59, %v8525_v48 }
 0x2da   : > { %v5600_v40 = vpop.f32.mrf.mxu1  ;;  %v5403_v52 = vadd.f32 %v9041_v60, %v9040_v0 }
 0x2db   : > { %4843 = vst.msk [vmem:[%s8518_s28 + $0x8] sm:$0xff] %vm4841_vm8, %v4782_v56  ;;  %v4803_v46 = vadd.f32 %v5600_v40, %v4706_v12  ;;  %v4641_v56 = vadd.f32 %v5464_v27, %v4544_v31  ;;  %v5467_v12 = vadd.f32 %v8510_v44, %v8505_v22  ;;  %v4717_v57 = vadd.f32 %v5513_v29, %v4620_v42  ;;  %v5530_v22 = vpop.f32.mrf.mxu0 }
 0x2dc   : > { %v4794_v18 = vpop.f32.mrf.mxu1  ;;  %v4547_v10 = vadd.f32 %v5403_v52, %v4450_v26 }
 0x2dd   : > { %4848 = vst.msk [vmem:[%s8518_s28 + $0x30] sm:$0xff] %vm4841_vm8, %v4803_v46  ;;  %v4795_v20 = vadd.f32 %v4794_v18, %v4698_v15  ;;  %v4725_v15 = vadd.f32 %v5519_v24, %v4628_v51  ;;  %v9044_v46 = vld [vmem:[#allocation35_spill] sm:$0xff]  ;;  %v5528_v18 = vadd.f32 %v5527_v62, %v5526_v13  ;;  %v9048_v13 = vld [vmem:[#allocation34_spill] sm:$0xff] }
 0x2de   : > { %v5601_v14 = vpop.f32.mrf.mxu1  ;;  %v4633_v7 = vadd.f32 %v5458_v55, %v9044_v46 }
 0x2df   : > { %4846 = vst.msk [vmem:[%s8518_s28 + $0x20] sm:$0xff] %vm4841_vm8, %v4795_v20  ;;  %v4806_v8 = vadd.f32 %v5601_v14, %v4709_v61  ;;  %v5461_v20 = vadd.f32 %v9046_v53, %v9045_v2  ;;  %v4644_v14 = vadd.f32 %v5467_v12, %v4547_v10  ;;  %v4738_v54 = vadd.f32 %v5528_v18, %v4641_v56 }
 0x2e0   : > { %v4797_v25 = vpop.f32.mrf.mxu1  ;;  %v4730_v34 = vadd.f32 %v5522_v36, %v4633_v7 }
 0x2e1   : > { %4849 = vst.msk [vmem:[%s8518_s28 + $0x38] sm:$0xff] %vm4841_vm8, %v4806_v8  ;;  %v4798_v5 = vadd.f32 %v4797_v25, %v4701_v6  ;;  %v4636_v23 = vadd.f32 %v5461_v20, %v9048_v13  ;;  %v5531_v8 = vadd.f32 %v5530_v22, %v5529_v50 }
 0x2e2   : > { %v5604_v19 = vpop.f32.mrf.mxu1 }
 0x2e3   : > { %4847 = vst.msk [vmem:[%s8518_s28 + $0x28] sm:$0xff] %vm4841_vm8, %v4798_v5  ;;  %v4819_v11 = vadd.f32 %v5604_v19, %v4722_v17  ;;  %v4741_v28 = vadd.f32 %v5531_v8, %v4644_v14  ;;  %v4733_v62 = vadd.f32 %v5525_v43, %v4636_v23 }
 0x2e4   : > { %v4810_v45 = vpop.f32.mrf.mxu1 }
 0x2e5   : > { %4852 = vst.msk [vmem:[%s8518_s28 + $0x50] sm:$0xff] %vm4841_vm8, %v4819_v11  ;;  %v4811_v40 = vadd.f32 %v4810_v45, %v4714_v41 }
 0x2e6   : > { %v5605_v39 = vpop.f32.mrf.mxu1 }
 0x2e7   : > { %4850 = vst.msk [vmem:[%s8518_s28 + $0x40] sm:$0xff] %vm4841_vm8, %v4811_v40  ;;  %v4822_v61 = vadd.f32 %v5605_v39, %v4725_v15 }
 0x2e8   : > { %v4813_v44 = vpop.f32.mrf.mxu1 }
 0x2e9   : > { %4853 = vst.msk [vmem:[%s8518_s28 + $0x58] sm:$0xff] %vm4841_vm8, %v4822_v61  ;;  %v4814_v9 = vadd.f32 %v4813_v44, %v4717_v57 }
 0x2ea   : > { %v5608_v3 = vpop.f32.mrf.mxu1 }
 0x2eb   : > { %4851 = vst.msk [vmem:[%s8518_s28 + $0x48] sm:$0xff] %vm4841_vm8, %v4814_v9  ;;  %v4835_v6 = vadd.f32 %v5608_v3, %v4738_v54 }
 0x2ec   : > { %v4826_v58 = vpop.f32.mrf.mxu1 }
 0x2ed   : > { %4856 = vst.msk [vmem:[%s8518_s28 + $0x70] sm:$0xff] %vm4841_vm8, %v4835_v6  ;;  %v4827_v4 = vadd.f32 %v4826_v58, %v4730_v34 }
 0x2ee   : > { %v5609_v38 = vpop.f32.mrf.mxu1 }
 0x2ef   : > { %4854 = vst.msk [vmem:[%s8518_s28 + $0x60] sm:$0xff] %vm4841_vm8, %v4827_v4  ;;  %v4838_v32 = vadd.f32 %v5609_v38, %v4741_v28 }
 0x2f0   : > { %v4829_v25 = vpop.f32.mrf.mxu1 }
 0x2f1   : > { %4857 = vst.msk [vmem:[%s8518_s28 + $0x78] sm:$0xff] %vm4841_vm8, %v4838_v32  ;;  %v4830_v37 = vadd.f32 %v4829_v25, %v4733_v62 }
 0x2f3   : > { %4855 = vst.msk [vmem:[%s8518_s28 + $0x68] sm:$0xff] %vm4841_vm8, %v4830_v37 }
 0x2f4 PF: > { %s15_s22 = sadd.s32 1, %s6127_s22   ;;  %s9049_s18 = smov %s6119_s20 }
 0x2f5   : > { %p12_p7 = scmp.ge.s32.totalorder %s15_s22, 6   ;;  %s9050_s19 = smov %s6123_s21 }
 0x2f6   : > { %s9051_s20 = smov %s9054_s23  ;;  %s9052_s21 = smov %s9058_s24 }
 0x2f7   :  { %14 = sbr.rel (!%p12_p7) target bundleno = 3 (0x3), region = 71 }

</bundles_post_ra>
